<compile_context>
chip_gen: v7x
topology: tpu7x:2x2x1
jax: 0.10.0
libtpu: 0.0.40
codegen_flags: <defaults>
</compile_context>

<pallas_src>
import numpy as np
import jax
import jax.numpy as jnp
from jax import lax
from jax.experimental import pallas as pl
from jax.experimental.pallas import tpu as pltpu


_LH = 8           # halo width; interior starts at a sublane-aligned column (8)
_NEG = -3.0e38    # Python float (NOT a jnp scalar) -> no captured constant


def _make_crp_kernel(H, W, C, n_stages):
    WB = W + 2 * _LH          # scratch width; multiple of 8 when W is

    def kernel(x_ref, w_ref, out_ref, pbuf, cbuf):
        # x_ref:   (1, H, W, C)        one batch element, NHWC (C on lanes)
        # w_ref:   (n_stages, 9*C, C)  conv weights, row index = (ky*3+kx)*C + cin
        # out_ref: (1, H, W, C)
        # pbuf:    (H+4, WB, C)  maxpool scratch, -inf halo, interior [2:2+H, 8:8+W]
        # cbuf:    (H+2, WB, C)  conv scratch,    zero halo, interior [1:1+H, 8:8+W]

        # ---- halo strips: initialized ONCE per grid step (not per stage) ----
        pbuf[0:2, :, :] = jnp.full((2, WB, C), _NEG, jnp.float32)
        pbuf[2 + H:4 + H, :, :] = jnp.full((2, WB, C), _NEG, jnp.float32)
        pbuf[2:2 + H, 0:_LH, :] = jnp.full((H, _LH, C), _NEG, jnp.float32)
        pbuf[2:2 + H, _LH + W:WB, :] = jnp.full((H, _LH, C), _NEG, jnp.float32)

        cbuf[0:1, :, :] = jnp.zeros((1, WB, C), jnp.float32)
        cbuf[1 + H:2 + H, :, :] = jnp.zeros((1, WB, C), jnp.float32)
        cbuf[1:1 + H, 0:_LH, :] = jnp.zeros((H, _LH, C), jnp.float32)
        cbuf[1:1 + H, _LH + W:WB, :] = jnp.zeros((H, _LH, C), jnp.float32)

        x = jnp.maximum(x_ref[0], 0.0)          # ReLU (VPU, lane-dense)
        acc = x
        path = x

        for i in range(n_stages):
            # ---- MaxPool2d(kernel=5, stride=1, padding=2), separable ----
            # single aligned interior write per stage; halo stays -inf
            pbuf[2:2 + H, _LH:_LH + W, :] = path
            # row pass: 5 aligned full-width leading-dim loads
            r = pbuf[0:H, :, :]
            for dy in range(1, 5):
                r = jnp.maximum(r, pbuf[dy:dy + H, :, :])
            # column pass on the VALUE r (no write-back / re-read); the -inf
            # halo columns carried in r give the correct padding=2 edge handling.
            p = r[:, _LH:_LH + W, :]
            for dx in (-2, -1, 1, 2):
                p = jnp.maximum(p, r[:, _LH + dx:_LH + dx + W, :])

            # ---- conv3x3 (stride 1, pad 1, no bias): 9 accumulated MXU dots ----
            cbuf[1:1 + H, _LH:_LH + W, :] = p     # aligned interior write
            conv_acc = jnp.zeros((H * W, C), jnp.float32)
            for ky in range(3):
                row = cbuf[ky:ky + H, :, :]        # aligned full-width load
                for kx in range(3):
                    tap = row[:, _LH + kx - 1:_LH + kx - 1 + W, :].reshape(H * W, C)
                    k = ky * 3 + kx
                    conv_acc = conv_acc + jnp.dot(
                        tap, w_ref[i, k * C:(k + 1) * C, :],
                        preferred_element_type=jnp.float32)
            path = conv_acc.reshape(H, W, C)

            acc = acc + path                       # x = path + x

        out_ref[0] = acc

    return kernel


def crp_block_forward(x_nchw, weights_hwio):
    """CRPBlock.forward (maxpool=True, act=ReLU, bias-free 3x3 convs).

    x_nchw:       (N, C, H, W) float32
    weights_hwio: list of n_stages arrays, each (3, 3, C, C) in HWIO layout.
    """
    N, C, H, W = x_nchw.shape
    n_stages = len(weights_hwio)
    # Layout assumptions baked into the kernel (lane-dense C, free reshapes in W).
    assert C % 128 == 0, "features must be a multiple of 128 (lane width)"
    assert W % 8 == 0, "W must be a multiple of 8 (sublane tile)"

    x_nhwc = jnp.transpose(x_nchw, (0, 2, 3, 1)).astype(jnp.float32)
    # (3,3,C,C) -> (9C, C) with row index (ky*3+kx)*C + cin; stack over stages.
    w_stack = jnp.stack([w.reshape(9 * C, C) for w in weights_hwio],
                        axis=0).astype(jnp.float32)

    WB = W + 2 * _LH
    kernel = _make_crp_kernel(H, W, C, n_stages)

    # Explicit VMEM budget: double-buffered blocks + scratches + headroom.
    elt = 4
    structural = (2 * (H * W * C) * elt                 # x block (double-buffered)
                  + 2 * (H * W * C) * elt               # out block
                  + 2 * (n_stages * 9 * C * C) * elt    # weights
                  + (H + 4) * WB * C * elt              # pool scratch
                  + (H + 2) * WB * C * elt)             # conv scratch
    vmem_limit = int(min(structural + (16 << 20), 100 << 20))

    out = pl.pallas_call(
        kernel,
        out_shape=jax.ShapeDtypeStruct((N, H, W, C), jnp.float32),
        grid_spec=pltpu.PrefetchScalarGridSpec(
            num_scalar_prefetch=0,
            grid=(N,),
            in_specs=[
                pl.BlockSpec((1, H, W, C), lambda n: (n, 0, 0, 0)),
                pl.BlockSpec((n_stages, 9 * C, C), lambda n: (0, 0, 0)),
            ],
            out_specs=pl.BlockSpec((1, H, W, C), lambda n: (n, 0, 0, 0)),
            scratch_shapes=[
                pltpu.VMEM((H + 4, WB, C), jnp.float32),   # maxpool halo scratch
                pltpu.VMEM((H + 2, WB, C), jnp.float32),   # conv halo scratch
            ],
        ),
        compiler_params=pltpu.CompilerParams(
            dimension_semantics=("parallel",),   # batch across TensorCores
            vmem_limit_bytes=vmem_limit),
    )(x_nhwc, w_stack)
    return jnp.transpose(out, (0, 3, 1, 2))      # back to NCHW


def _reference_forward(x_nchw, weights_hwio):
    """Pure-JAX reference: reduce_window maxpool + lax.conv."""
    x = jnp.transpose(x_nchw, (0, 2, 3, 1)).astype(jnp.float32)
    x = jnp.maximum(x, 0.0)
    path = x
    for w in weights_hwio:
        path = lax.reduce_window(
            path, jnp.float32(-jnp.inf), lax.max,
            window_dimensions=(1, 5, 5, 1),
            window_strides=(1, 1, 1, 1),
            padding=((0, 0), (2, 2), (2, 2), (0, 0)))
        path = lax.conv_general_dilated(
            path, w, window_strides=(1, 1), padding=((1, 1), (1, 1)),
            dimension_numbers=('NHWC', 'HWIO', 'NHWC'))
        x = x + path
    return jnp.transpose(x, (0, 3, 1, 2))


if __name__ == "__main__":
    key = jax.random.PRNGKey(0)

    # CRPBlock(features=128, n_stages=2, act=ReLU(), maxpool=True)
    batch, features, H, W = 2, 128, 16, 16
    n_stages = 2

    keys = jax.random.split(key, 1 + n_stages)
    x = jax.random.normal(keys[0], (batch, features, H, W), jnp.float32)
    weights = [jax.random.normal(k, (3, 3, features, features), jnp.float32) * 0.05
               for k in keys[1:]]

    out = jax.block_until_ready(crp_block_forward(x, weights))
    ref = _reference_forward(x, weights)

    assert out.shape == (batch, features, H, W), out.shape
    np.testing.assert_allclose(np.asarray(out), np.asarray(ref),
                               rtol=5e-4, atol=5e-4)
    print("KERNEL_OK")
</pallas_src>

<mosaic_0001>
module attributes {stable_mosaic.version = 11 : i64} {
  func.func @kernel(%arg0: i32, %arg1: memref<1x16x16x128xf32, #tpu.memory_space<vmem>>, %arg2: memref<2x1152x128xf32, #tpu.memory_space<vmem>>, %arg3: memref<1x16x16x128xf32, #tpu.memory_space<vmem>>, %arg4: memref<20x32x128xf32, #tpu.memory_space<vmem>>, %arg5: memref<18x32x128xf32, #tpu.memory_space<vmem>>) attributes {dimension_semantics = [#tpu.dimension_semantics<parallel>], iteration_bounds = array<i64: 2>, scalar_prefetch = 0 : i64, scratch_operands = 2 : i64, tpu.core_type = #tpu.core_type<tc>, window_params = [{transform_indices = @transform_0, window_bounds = array<i64: 1, 16, 16, 128>}, {pipeline_mode = #tpu.pipeline_mode<synchronous>, transform_indices = @transform_1, window_bounds = array<i64: 2, 1152, 128>}, {transform_indices = @transform_2, window_bounds = array<i64: 1, 16, 16, 128>}]} {
    %cst = arith.constant -3.000000e+38 : f32
    %0 = vector.broadcast %cst : f32 to vector<2x32x128xf32>
    %c0 = arith.constant 0 : index
    %c0_0 = arith.constant 0 : index
    %c0_1 = arith.constant 0 : index
    %1 = vector.load %arg4[%c0, %c0_0, %c0_1] : memref<20x32x128xf32, #tpu.memory_space<vmem>>, vector<2x32x128xf32>
    tpu.vector_store %arg4[%c0, %c0_0, %c0_1], %0 {strides = array<i32>} : memref<20x32x128xf32, #tpu.memory_space<vmem>>, vector<2x32x128xf32>,
    %cst_2 = arith.constant -3.000000e+38 : f32
    %2 = vector.broadcast %cst_2 : f32 to vector<2x32x128xf32>
    %c18 = arith.constant 18 : index
    %c0_3 = arith.constant 0 : index
    %c0_4 = arith.constant 0 : index
    %3 = vector.load %arg4[%c18, %c0_3, %c0_4] : memref<20x32x128xf32, #tpu.memory_space<vmem>>, vector<2x32x128xf32>
    tpu.vector_store %arg4[%c18, %c0_3, %c0_4], %2 {strides = array<i32>} : memref<20x32x128xf32, #tpu.memory_space<vmem>>, vector<2x32x128xf32>,
    %cst_5 = arith.constant -3.000000e+38 : f32
    %4 = vector.broadcast %cst_5 : f32 to vector<16x8x128xf32>
    %c2 = arith.constant 2 : index
    %c0_6 = arith.constant 0 : index
    %c0_7 = arith.constant 0 : index
    %5 = vector.load %arg4[%c2, %c0_6, %c0_7] : memref<20x32x128xf32, #tpu.memory_space<vmem>>, vector<16x8x128xf32>
    tpu.vector_store %arg4[%c2, %c0_6, %c0_7], %4 {strides = array<i32>} : memref<20x32x128xf32, #tpu.memory_space<vmem>>, vector<16x8x128xf32>,
    %cst_8 = arith.constant -3.000000e+38 : f32
    %6 = vector.broadcast %cst_8 : f32 to vector<16x8x128xf32>
    %c2_9 = arith.constant 2 : index
    %c24 = arith.constant 24 : index
    %c0_10 = arith.constant 0 : index
    %7 = vector.load %arg4[%c2_9, %c24, %c0_10] : memref<20x32x128xf32, #tpu.memory_space<vmem>>, vector<16x8x128xf32>
    tpu.vector_store %arg4[%c2_9, %c24, %c0_10], %6 {strides = array<i32>} : memref<20x32x128xf32, #tpu.memory_space<vmem>>, vector<16x8x128xf32>,
    %cst_11 = arith.constant 0.000000e+00 : f32
    %8 = vector.broadcast %cst_11 : f32 to vector<1x32x128xf32>
    %c0_12 = arith.constant 0 : index
    %c0_13 = arith.constant 0 : index
    %c0_14 = arith.constant 0 : index
    %9 = vector.load %arg5[%c0_12, %c0_13, %c0_14] : memref<18x32x128xf32, #tpu.memory_space<vmem>>, vector<1x32x128xf32>
    tpu.vector_store %arg5[%c0_12, %c0_13, %c0_14], %8 {strides = array<i32>} : memref<18x32x128xf32, #tpu.memory_space<vmem>>, vector<1x32x128xf32>,
    %cst_15 = arith.constant 0.000000e+00 : f32
    %10 = vector.broadcast %cst_15 : f32 to vector<1x32x128xf32>
    %c17 = arith.constant 17 : index
    %c0_16 = arith.constant 0 : index
    %c0_17 = arith.constant 0 : index
    %11 = vector.load %arg5[%c17, %c0_16, %c0_17] : memref<18x32x128xf32, #tpu.memory_space<vmem>>, vector<1x32x128xf32>
    tpu.vector_store %arg5[%c17, %c0_16, %c0_17], %10 {strides = array<i32>} : memref<18x32x128xf32, #tpu.memory_space<vmem>>, vector<1x32x128xf32>,
    %cst_18 = arith.constant 0.000000e+00 : f32
    %12 = vector.broadcast %cst_18 : f32 to vector<16x8x128xf32>
    %c1 = arith.constant 1 : index
    %c0_19 = arith.constant 0 : index
    %c0_20 = arith.constant 0 : index
    %13 = vector.load %arg5[%c1, %c0_19, %c0_20] : memref<18x32x128xf32, #tpu.memory_space<vmem>>, vector<16x8x128xf32>
    tpu.vector_store %arg5[%c1, %c0_19, %c0_20], %12 {strides = array<i32>} : memref<18x32x128xf32, #tpu.memory_space<vmem>>, vector<16x8x128xf32>,
    %cst_21 = arith.constant 0.000000e+00 : f32
    %14 = vector.broadcast %cst_21 : f32 to vector<16x8x128xf32>
    %c1_22 = arith.constant 1 : index
    %c24_23 = arith.constant 24 : index
    %c0_24 = arith.constant 0 : index
    %15 = vector.load %arg5[%c1_22, %c24_23, %c0_24] : memref<18x32x128xf32, #tpu.memory_space<vmem>>, vector<16x8x128xf32>
    tpu.vector_store %arg5[%c1_22, %c24_23, %c0_24], %14 {strides = array<i32>} : memref<18x32x128xf32, #tpu.memory_space<vmem>>, vector<16x8x128xf32>,
    %c0_25 = arith.constant 0 : index
    %c0_26 = arith.constant 0 : index
    %c0_27 = arith.constant 0 : index
    %c0_28 = arith.constant 0 : index
    %16 = vector.load %arg1[%c0_25, %c0_26, %c0_27, %c0_28] : memref<1x16x16x128xf32, #tpu.memory_space<vmem>>, vector<1x16x16x128xf32>
    %17 = vector.shape_cast %16 : vector<1x16x16x128xf32> to vector<16x16x128xf32>
    %cst_29 = arith.constant 0.000000e+00 : f32
    %18 = vector.broadcast %cst_29 : f32 to vector<16x16x128xf32>
    %19 = arith.maximumf %17, %18 : vector<16x16x128xf32>
    %c2_30 = arith.constant 2 : index
    %c8 = arith.constant 8 : index
    %c0_31 = arith.constant 0 : index
    %20 = vector.load %arg4[%c2_30, %c8, %c0_31] : memref<20x32x128xf32, #tpu.memory_space<vmem>>, vector<16x16x128xf32>
    tpu.vector_store %arg4[%c2_30, %c8, %c0_31], %19 {strides = array<i32>} : memref<20x32x128xf32, #tpu.memory_space<vmem>>, vector<16x16x128xf32>,
    %c0_32 = arith.constant 0 : index
    %c0_33 = arith.constant 0 : index
    %c0_34 = arith.constant 0 : index
    %21 = vector.load %arg4[%c0_32, %c0_33, %c0_34] : memref<20x32x128xf32, #tpu.memory_space<vmem>>, vector<16x32x128xf32>
    %c1_35 = arith.constant 1 : index
    %c0_36 = arith.constant 0 : index
    %c0_37 = arith.constant 0 : index
    %22 = vector.load %arg4[%c1_35, %c0_36, %c0_37] : memref<20x32x128xf32, #tpu.memory_space<vmem>>, vector<16x32x128xf32>
    %23 = arith.maximumf %21, %22 : vector<16x32x128xf32>
    %c2_38 = arith.constant 2 : index
    %c0_39 = arith.constant 0 : index
    %c0_40 = arith.constant 0 : index
    %24 = vector.load %arg4[%c2_38, %c0_39, %c0_40] : memref<20x32x128xf32, #tpu.memory_space<vmem>>, vector<16x32x128xf32>
    %25 = arith.maximumf %23, %24 : vector<16x32x128xf32>
    %c3 = arith.constant 3 : index
    %c0_41 = arith.constant 0 : index
    %c0_42 = arith.constant 0 : index
    %26 = vector.load %arg4[%c3, %c0_41, %c0_42] : memref<20x32x128xf32, #tpu.memory_space<vmem>>, vector<16x32x128xf32>
    %27 = arith.maximumf %25, %26 : vector<16x32x128xf32>
    %c4 = arith.constant 4 : index
    %c0_43 = arith.constant 0 : index
    %c0_44 = arith.constant 0 : index
    %28 = vector.load %arg4[%c4, %c0_43, %c0_44] : memref<20x32x128xf32, #tpu.memory_space<vmem>>, vector<16x32x128xf32>
    %29 = arith.maximumf %27, %28 : vector<16x32x128xf32>
    %30 = vector.extract_strided_slice %29 {offsets = [0, 8, 0], sizes = [16, 16, 128], strides = [1, 1, 1]} : vector<16x32x128xf32> to vector<16x16x128xf32>
    %31 = vector.extract_strided_slice %29 {offsets = [0, 6, 0], sizes = [16, 16, 128], strides = [1, 1, 1]} : vector<16x32x128xf32> to vector<16x16x128xf32>
    %32 = arith.maximumf %30, %31 : vector<16x16x128xf32>
    %33 = vector.extract_strided_slice %29 {offsets = [0, 7, 0], sizes = [16, 16, 128], strides = [1, 1, 1]} : vector<16x32x128xf32> to vector<16x16x128xf32>
    %34 = arith.maximumf %32, %33 : vector<16x16x128xf32>
    %35 = vector.extract_strided_slice %29 {offsets = [0, 9, 0], sizes = [16, 16, 128], strides = [1, 1, 1]} : vector<16x32x128xf32> to vector<16x16x128xf32>
    %36 = arith.maximumf %34, %35 : vector<16x16x128xf32>
    %37 = vector.extract_strided_slice %29 {offsets = [0, 10, 0], sizes = [16, 16, 128], strides = [1, 1, 1]} : vector<16x32x128xf32> to vector<16x16x128xf32>
    %38 = arith.maximumf %36, %37 : vector<16x16x128xf32>
    %c1_45 = arith.constant 1 : index
    %c8_46 = arith.constant 8 : index
    %c0_47 = arith.constant 0 : index
    %39 = vector.load %arg5[%c1_45, %c8_46, %c0_47] : memref<18x32x128xf32, #tpu.memory_space<vmem>>, vector<16x16x128xf32>
    tpu.vector_store %arg5[%c1_45, %c8_46, %c0_47], %38 {strides = array<i32>} : memref<18x32x128xf32, #tpu.memory_space<vmem>>, vector<16x16x128xf32>,
    %cst_48 = arith.constant 0.000000e+00 : f32
    %40 = vector.broadcast %cst_48 : f32 to vector<256x128xf32>
    %c0_49 = arith.constant 0 : index
    %c0_50 = arith.constant 0 : index
    %c0_51 = arith.constant 0 : index
    %41 = vector.load %arg5[%c0_49, %c0_50, %c0_51] : memref<18x32x128xf32, #tpu.memory_space<vmem>>, vector<16x32x128xf32>
    %42 = vector.extract_strided_slice %41 {offsets = [0, 7, 0], sizes = [16, 16, 128], strides = [1, 1, 1]} : vector<16x32x128xf32> to vector<16x16x128xf32>
    %43 = vector.shape_cast %42 : vector<16x16x128xf32> to vector<256x128xf32>
    %c0_52 = arith.constant 0 : index
    %c0_53 = arith.constant 0 : index
    %c0_54 = arith.constant 0 : index
    %44 = vector.load %arg2[%c0_52, %c0_53, %c0_54] : memref<2x1152x128xf32, #tpu.memory_space<vmem>>, vector<1x128x128xf32>
    %45 = vector.shape_cast %44 : vector<1x128x128xf32> to vector<128x128xf32>
    %cst_55 = arith.constant dense<0.000000e+00> : vector<256x128xf32>
    %46 = tpu.matmul %43, %45, %cst_55 {dimension_numbers = #tpu.dot_dimension_numbers<[1], [0], [0], [1], [0, 0, 1, 1], [], []>} : vector<256x128xf32>, vector<128x128xf32>, vector<256x128xf32> -> vector<256x128xf32>
    %47 = arith.addf %40, %46 : vector<256x128xf32>
    %48 = vector.extract_strided_slice %41 {offsets = [0, 8, 0], sizes = [16, 16, 128], strides = [1, 1, 1]} : vector<16x32x128xf32> to vector<16x16x128xf32>
    %49 = vector.shape_cast %48 : vector<16x16x128xf32> to vector<256x128xf32>
    %c0_56 = arith.constant 0 : index
    %c128 = arith.constant 128 : index
    %c0_57 = arith.constant 0 : index
    %50 = vector.load %arg2[%c0_56, %c128, %c0_57] : memref<2x1152x128xf32, #tpu.memory_space<vmem>>, vector<1x128x128xf32>
    %51 = vector.shape_cast %50 : vector<1x128x128xf32> to vector<128x128xf32>
    %cst_58 = arith.constant dense<0.000000e+00> : vector<256x128xf32>
    %52 = tpu.matmul %49, %51, %cst_58 {dimension_numbers = #tpu.dot_dimension_numbers<[1], [0], [0], [1], [0, 0, 1, 1], [], []>} : vector<256x128xf32>, vector<128x128xf32>, vector<256x128xf32> -> vector<256x128xf32>
    %53 = arith.addf %47, %52 : vector<256x128xf32>
    %54 = vector.extract_strided_slice %41 {offsets = [0, 9, 0], sizes = [16, 16, 128], strides = [1, 1, 1]} : vector<16x32x128xf32> to vector<16x16x128xf32>
    %55 = vector.shape_cast %54 : vector<16x16x128xf32> to vector<256x128xf32>
    %c0_59 = arith.constant 0 : index
    %c256 = arith.constant 256 : index
    %c0_60 = arith.constant 0 : index
    %56 = vector.load %arg2[%c0_59, %c256, %c0_60] : memref<2x1152x128xf32, #tpu.memory_space<vmem>>, vector<1x128x128xf32>
    %57 = vector.shape_cast %56 : vector<1x128x128xf32> to vector<128x128xf32>
    %cst_61 = arith.constant dense<0.000000e+00> : vector<256x128xf32>
    %58 = tpu.matmul %55, %57, %cst_61 {dimension_numbers = #tpu.dot_dimension_numbers<[1], [0], [0], [1], [0, 0, 1, 1], [], []>} : vector<256x128xf32>, vector<128x128xf32>, vector<256x128xf32> -> vector<256x128xf32>
    %59 = arith.addf %53, %58 : vector<256x128xf32>
    %c1_62 = arith.constant 1 : index
    %c0_63 = arith.constant 0 : index
    %c0_64 = arith.constant 0 : index
    %60 = vector.load %arg5[%c1_62, %c0_63, %c0_64] : memref<18x32x128xf32, #tpu.memory_space<vmem>>, vector<16x32x128xf32>
    %61 = vector.extract_strided_slice %60 {offsets = [0, 7, 0], sizes = [16, 16, 128], strides = [1, 1, 1]} : vector<16x32x128xf32> to vector<16x16x128xf32>
    %62 = vector.shape_cast %61 : vector<16x16x128xf32> to vector<256x128xf32>
    %c0_65 = arith.constant 0 : index
    %c384 = arith.constant 384 : index
    %c0_66 = arith.constant 0 : index
    %63 = vector.load %arg2[%c0_65, %c384, %c0_66] : memref<2x1152x128xf32, #tpu.memory_space<vmem>>, vector<1x128x128xf32>
    %64 = vector.shape_cast %63 : vector<1x128x128xf32> to vector<128x128xf32>
    %cst_67 = arith.constant dense<0.000000e+00> : vector<256x128xf32>
    %65 = tpu.matmul %62, %64, %cst_67 {dimension_numbers = #tpu.dot_dimension_numbers<[1], [0], [0], [1], [0, 0, 1, 1], [], []>} : vector<256x128xf32>, vector<128x128xf32>, vector<256x128xf32> -> vector<256x128xf32>
    %66 = arith.addf %59, %65 : vector<256x128xf32>
    %67 = vector.extract_strided_slice %60 {offsets = [0, 8, 0], sizes = [16, 16, 128], strides = [1, 1, 1]} : vector<16x32x128xf32> to vector<16x16x128xf32>
    %68 = vector.shape_cast %67 : vector<16x16x128xf32> to vector<256x128xf32>
    %c0_68 = arith.constant 0 : index
    %c512 = arith.constant 512 : index
    %c0_69 = arith.constant 0 : index
    %69 = vector.load %arg2[%c0_68, %c512, %c0_69] : memref<2x1152x128xf32, #tpu.memory_space<vmem>>, vector<1x128x128xf32>
    %70 = vector.shape_cast %69 : vector<1x128x128xf32> to vector<128x128xf32>
    %cst_70 = arith.constant dense<0.000000e+00> : vector<256x128xf32>
    %71 = tpu.matmul %68, %70, %cst_70 {dimension_numbers = #tpu.dot_dimension_numbers<[1], [0], [0], [1], [0, 0, 1, 1], [], []>} : vector<256x128xf32>, vector<128x128xf32>, vector<256x128xf32> -> vector<256x128xf32>
    %72 = arith.addf %66, %71 : vector<256x128xf32>
    %73 = vector.extract_strided_slice %60 {offsets = [0, 9, 0], sizes = [16, 16, 128], strides = [1, 1, 1]} : vector<16x32x128xf32> to vector<16x16x128xf32>
    %74 = vector.shape_cast %73 : vector<16x16x128xf32> to vector<256x128xf32>
    %c0_71 = arith.constant 0 : index
    %c640 = arith.constant 640 : index
    %c0_72 = arith.constant 0 : index
    %75 = vector.load %arg2[%c0_71, %c640, %c0_72] : memref<2x1152x128xf32, #tpu.memory_space<vmem>>, vector<1x128x128xf32>
    %76 = vector.shape_cast %75 : vector<1x128x128xf32> to vector<128x128xf32>
    %cst_73 = arith.constant dense<0.000000e+00> : vector<256x128xf32>
    %77 = tpu.matmul %74, %76, %cst_73 {dimension_numbers = #tpu.dot_dimension_numbers<[1], [0], [0], [1], [0, 0, 1, 1], [], []>} : vector<256x128xf32>, vector<128x128xf32>, vector<256x128xf32> -> vector<256x128xf32>
    %78 = arith.addf %72, %77 : vector<256x128xf32>
    %c2_74 = arith.constant 2 : index
    %c0_75 = arith.constant 0 : index
    %c0_76 = arith.constant 0 : index
    %79 = vector.load %arg5[%c2_74, %c0_75, %c0_76] : memref<18x32x128xf32, #tpu.memory_space<vmem>>, vector<16x32x128xf32>
    %80 = vector.extract_strided_slice %79 {offsets = [0, 7, 0], sizes = [16, 16, 128], strides = [1, 1, 1]} : vector<16x32x128xf32> to vector<16x16x128xf32>
    %81 = vector.shape_cast %80 : vector<16x16x128xf32> to vector<256x128xf32>
    %c0_77 = arith.constant 0 : index
    %c768 = arith.constant 768 : index
    %c0_78 = arith.constant 0 : index
    %82 = vector.load %arg2[%c0_77, %c768, %c0_78] : memref<2x1152x128xf32, #tpu.memory_space<vmem>>, vector<1x128x128xf32>
    %83 = vector.shape_cast %82 : vector<1x128x128xf32> to vector<128x128xf32>
    %cst_79 = arith.constant dense<0.000000e+00> : vector<256x128xf32>
    %84 = tpu.matmul %81, %83, %cst_79 {dimension_numbers = #tpu.dot_dimension_numbers<[1], [0], [0], [1], [0, 0, 1, 1], [], []>} : vector<256x128xf32>, vector<128x128xf32>, vector<256x128xf32> -> vector<256x128xf32>
    %85 = arith.addf %78, %84 : vector<256x128xf32>
    %86 = vector.extract_strided_slice %79 {offsets = [0, 8, 0], sizes = [16, 16, 128], strides = [1, 1, 1]} : vector<16x32x128xf32> to vector<16x16x128xf32>
    %87 = vector.shape_cast %86 : vector<16x16x128xf32> to vector<256x128xf32>
    %c0_80 = arith.constant 0 : index
    %c896 = arith.constant 896 : index
    %c0_81 = arith.constant 0 : index
    %88 = vector.load %arg2[%c0_80, %c896, %c0_81] : memref<2x1152x128xf32, #tpu.memory_space<vmem>>, vector<1x128x128xf32>
    %89 = vector.shape_cast %88 : vector<1x128x128xf32> to vector<128x128xf32>
    %cst_82 = arith.constant dense<0.000000e+00> : vector<256x128xf32>
    %90 = tpu.matmul %87, %89, %cst_82 {dimension_numbers = #tpu.dot_dimension_numbers<[1], [0], [0], [1], [0, 0, 1, 1], [], []>} : vector<256x128xf32>, vector<128x128xf32>, vector<256x128xf32> -> vector<256x128xf32>
    %91 = arith.addf %85, %90 : vector<256x128xf32>
    %92 = vector.extract_strided_slice %79 {offsets = [0, 9, 0], sizes = [16, 16, 128], strides = [1, 1, 1]} : vector<16x32x128xf32> to vector<16x16x128xf32>
    %93 = vector.shape_cast %92 : vector<16x16x128xf32> to vector<256x128xf32>
    %c0_83 = arith.constant 0 : index
    %c1024 = arith.constant 1024 : index
    %c0_84 = arith.constant 0 : index
    %94 = vector.load %arg2[%c0_83, %c1024, %c0_84] : memref<2x1152x128xf32, #tpu.memory_space<vmem>>, vector<1x128x128xf32>
    %95 = vector.shape_cast %94 : vector<1x128x128xf32> to vector<128x128xf32>
    %cst_85 = arith.constant dense<0.000000e+00> : vector<256x128xf32>
    %96 = tpu.matmul %93, %95, %cst_85 {dimension_numbers = #tpu.dot_dimension_numbers<[1], [0], [0], [1], [0, 0, 1, 1], [], []>} : vector<256x128xf32>, vector<128x128xf32>, vector<256x128xf32> -> vector<256x128xf32>
    %97 = arith.addf %91, %96 : vector<256x128xf32>
    %98 = vector.shape_cast %97 : vector<256x128xf32> to vector<16x16x128xf32>
    %99 = arith.addf %19, %98 : vector<16x16x128xf32>
    %c2_86 = arith.constant 2 : index
    %c8_87 = arith.constant 8 : index
    %c0_88 = arith.constant 0 : index
    %100 = vector.load %arg4[%c2_86, %c8_87, %c0_88] : memref<20x32x128xf32, #tpu.memory_space<vmem>>, vector<16x16x128xf32>
    tpu.vector_store %arg4[%c2_86, %c8_87, %c0_88], %98 {strides = array<i32>} : memref<20x32x128xf32, #tpu.memory_space<vmem>>, vector<16x16x128xf32>,
    %c0_89 = arith.constant 0 : index
    %c0_90 = arith.constant 0 : index
    %c0_91 = arith.constant 0 : index
    %101 = vector.load %arg4[%c0_89, %c0_90, %c0_91] : memref<20x32x128xf32, #tpu.memory_space<vmem>>, vector<16x32x128xf32>
    %c1_92 = arith.constant 1 : index
    %c0_93 = arith.constant 0 : index
    %c0_94 = arith.constant 0 : index
    %102 = vector.load %arg4[%c1_92, %c0_93, %c0_94] : memref<20x32x128xf32, #tpu.memory_space<vmem>>, vector<16x32x128xf32>
    %103 = arith.maximumf %101, %102 : vector<16x32x128xf32>
    %c2_95 = arith.constant 2 : index
    %c0_96 = arith.constant 0 : index
    %c0_97 = arith.constant 0 : index
    %104 = vector.load %arg4[%c2_95, %c0_96, %c0_97] : memref<20x32x128xf32, #tpu.memory_space<vmem>>, vector<16x32x128xf32>
    %105 = arith.maximumf %103, %104 : vector<16x32x128xf32>
    %c3_98 = arith.constant 3 : index
    %c0_99 = arith.constant 0 : index
    %c0_100 = arith.constant 0 : index
    %106 = vector.load %arg4[%c3_98, %c0_99, %c0_100] : memref<20x32x128xf32, #tpu.memory_space<vmem>>, vector<16x32x128xf32>
    %107 = arith.maximumf %105, %106 : vector<16x32x128xf32>
    %c4_101 = arith.constant 4 : index
    %c0_102 = arith.constant 0 : index
    %c0_103 = arith.constant 0 : index
    %108 = vector.load %arg4[%c4_101, %c0_102, %c0_103] : memref<20x32x128xf32, #tpu.memory_space<vmem>>, vector<16x32x128xf32>
    %109 = arith.maximumf %107, %108 : vector<16x32x128xf32>
    %110 = vector.extract_strided_slice %109 {offsets = [0, 8, 0], sizes = [16, 16, 128], strides = [1, 1, 1]} : vector<16x32x128xf32> to vector<16x16x128xf32>
    %111 = vector.extract_strided_slice %109 {offsets = [0, 6, 0], sizes = [16, 16, 128], strides = [1, 1, 1]} : vector<16x32x128xf32> to vector<16x16x128xf32>
    %112 = arith.maximumf %110, %111 : vector<16x16x128xf32>
    %113 = vector.extract_strided_slice %109 {offsets = [0, 7, 0], sizes = [16, 16, 128], strides = [1, 1, 1]} : vector<16x32x128xf32> to vector<16x16x128xf32>
    %114 = arith.maximumf %112, %113 : vector<16x16x128xf32>
    %115 = vector.extract_strided_slice %109 {offsets = [0, 9, 0], sizes = [16, 16, 128], strides = [1, 1, 1]} : vector<16x32x128xf32> to vector<16x16x128xf32>
    %116 = arith.maximumf %114, %115 : vector<16x16x128xf32>
    %117 = vector.extract_strided_slice %109 {offsets = [0, 10, 0], sizes = [16, 16, 128], strides = [1, 1, 1]} : vector<16x32x128xf32> to vector<16x16x128xf32>
    %118 = arith.maximumf %116, %117 : vector<16x16x128xf32>
    %c1_104 = arith.constant 1 : index
    %c8_105 = arith.constant 8 : index
    %c0_106 = arith.constant 0 : index
    %119 = vector.load %arg5[%c1_104, %c8_105, %c0_106] : memref<18x32x128xf32, #tpu.memory_space<vmem>>, vector<16x16x128xf32>
    tpu.vector_store %arg5[%c1_104, %c8_105, %c0_106], %118 {strides = array<i32>} : memref<18x32x128xf32, #tpu.memory_space<vmem>>, vector<16x16x128xf32>,
    %cst_107 = arith.constant 0.000000e+00 : f32
    %120 = vector.broadcast %cst_107 : f32 to vector<256x128xf32>
    %c0_108 = arith.constant 0 : index
    %c0_109 = arith.constant 0 : index
    %c0_110 = arith.constant 0 : index
    %121 = vector.load %arg5[%c0_108, %c0_109, %c0_110] : memref<18x32x128xf32, #tpu.memory_space<vmem>>, vector<16x32x128xf32>
    %122 = vector.extract_strided_slice %121 {offsets = [0, 7, 0], sizes = [16, 16, 128], strides = [1, 1, 1]} : vector<16x32x128xf32> to vector<16x16x128xf32>
    %123 = vector.shape_cast %122 : vector<16x16x128xf32> to vector<256x128xf32>
    %c1_111 = arith.constant 1 : index
    %c0_112 = arith.constant 0 : index
    %c0_113 = arith.constant 0 : index
    %124 = vector.load %arg2[%c1_111, %c0_112, %c0_113] : memref<2x1152x128xf32, #tpu.memory_space<vmem>>, vector<1x128x128xf32>
    %125 = vector.shape_cast %124 : vector<1x128x128xf32> to vector<128x128xf32>
    %cst_114 = arith.constant dense<0.000000e+00> : vector<256x128xf32>
    %126 = tpu.matmul %123, %125, %cst_114 {dimension_numbers = #tpu.dot_dimension_numbers<[1], [0], [0], [1], [0, 0, 1, 1], [], []>} : vector<256x128xf32>, vector<128x128xf32>, vector<256x128xf32> -> vector<256x128xf32>
    %127 = arith.addf %120, %126 : vector<256x128xf32>
    %128 = vector.extract_strided_slice %121 {offsets = [0, 8, 0], sizes = [16, 16, 128], strides = [1, 1, 1]} : vector<16x32x128xf32> to vector<16x16x128xf32>
    %129 = vector.shape_cast %128 : vector<16x16x128xf32> to vector<256x128xf32>
    %c1_115 = arith.constant 1 : index
    %c128_116 = arith.constant 128 : index
    %c0_117 = arith.constant 0 : index
    %130 = vector.load %arg2[%c1_115, %c128_116, %c0_117] : memref<2x1152x128xf32, #tpu.memory_space<vmem>>, vector<1x128x128xf32>
    %131 = vector.shape_cast %130 : vector<1x128x128xf32> to vector<128x128xf32>
    %cst_118 = arith.constant dense<0.000000e+00> : vector<256x128xf32>
    %132 = tpu.matmul %129, %131, %cst_118 {dimension_numbers = #tpu.dot_dimension_numbers<[1], [0], [0], [1], [0, 0, 1, 1], [], []>} : vector<256x128xf32>, vector<128x128xf32>, vector<256x128xf32> -> vector<256x128xf32>
    %133 = arith.addf %127, %132 : vector<256x128xf32>
    %134 = vector.extract_strided_slice %121 {offsets = [0, 9, 0], sizes = [16, 16, 128], strides = [1, 1, 1]} : vector<16x32x128xf32> to vector<16x16x128xf32>
    %135 = vector.shape_cast %134 : vector<16x16x128xf32> to vector<256x128xf32>
    %c1_119 = arith.constant 1 : index
    %c256_120 = arith.constant 256 : index
    %c0_121 = arith.constant 0 : index
    %136 = vector.load %arg2[%c1_119, %c256_120, %c0_121] : memref<2x1152x128xf32, #tpu.memory_space<vmem>>, vector<1x128x128xf32>
    %137 = vector.shape_cast %136 : vector<1x128x128xf32> to vector<128x128xf32>
    %cst_122 = arith.constant dense<0.000000e+00> : vector<256x128xf32>
    %138 = tpu.matmul %135, %137, %cst_122 {dimension_numbers = #tpu.dot_dimension_numbers<[1], [0], [0], [1], [0, 0, 1, 1], [], []>} : vector<256x128xf32>, vector<128x128xf32>, vector<256x128xf32> -> vector<256x128xf32>
    %139 = arith.addf %133, %138 : vector<256x128xf32>
    %c1_123 = arith.constant 1 : index
    %c0_124 = arith.constant 0 : index
    %c0_125 = arith.constant 0 : index
    %140 = vector.load %arg5[%c1_123, %c0_124, %c0_125] : memref<18x32x128xf32, #tpu.memory_space<vmem>>, vector<16x32x128xf32>
    %141 = vector.extract_strided_slice %140 {offsets = [0, 7, 0], sizes = [16, 16, 128], strides = [1, 1, 1]} : vector<16x32x128xf32> to vector<16x16x128xf32>
    %142 = vector.shape_cast %141 : vector<16x16x128xf32> to vector<256x128xf32>
    %c1_126 = arith.constant 1 : index
    %c384_127 = arith.constant 384 : index
    %c0_128 = arith.constant 0 : index
    %143 = vector.load %arg2[%c1_126, %c384_127, %c0_128] : memref<2x1152x128xf32, #tpu.memory_space<vmem>>, vector<1x128x128xf32>
    %144 = vector.shape_cast %143 : vector<1x128x128xf32> to vector<128x128xf32>
    %cst_129 = arith.constant dense<0.000000e+00> : vector<256x128xf32>
    %145 = tpu.matmul %142, %144, %cst_129 {dimension_numbers = #tpu.dot_dimension_numbers<[1], [0], [0], [1], [0, 0, 1, 1], [], []>} : vector<256x128xf32>, vector<128x128xf32>, vector<256x128xf32> -> vector<256x128xf32>
    %146 = arith.addf %139, %145 : vector<256x128xf32>
    %147 = vector.extract_strided_slice %140 {offsets = [0, 8, 0], sizes = [16, 16, 128], strides = [1, 1, 1]} : vector<16x32x128xf32> to vector<16x16x128xf32>
    %148 = vector.shape_cast %147 : vector<16x16x128xf32> to vector<256x128xf32>
    %c1_130 = arith.constant 1 : index
    %c512_131 = arith.constant 512 : index
    %c0_132 = arith.constant 0 : index
    %149 = vector.load %arg2[%c1_130, %c512_131, %c0_132] : memref<2x1152x128xf32, #tpu.memory_space<vmem>>, vector<1x128x128xf32>
    %150 = vector.shape_cast %149 : vector<1x128x128xf32> to vector<128x128xf32>
    %cst_133 = arith.constant dense<0.000000e+00> : vector<256x128xf32>
    %151 = tpu.matmul %148, %150, %cst_133 {dimension_numbers = #tpu.dot_dimension_numbers<[1], [0], [0], [1], [0, 0, 1, 1], [], []>} : vector<256x128xf32>, vector<128x128xf32>, vector<256x128xf32> -> vector<256x128xf32>
    %152 = arith.addf %146, %151 : vector<256x128xf32>
    %153 = vector.extract_strided_slice %140 {offsets = [0, 9, 0], sizes = [16, 16, 128], strides = [1, 1, 1]} : vector<16x32x128xf32> to vector<16x16x128xf32>
    %154 = vector.shape_cast %153 : vector<16x16x128xf32> to vector<256x128xf32>
    %c1_134 = arith.constant 1 : index
    %c640_135 = arith.constant 640 : index
    %c0_136 = arith.constant 0 : index
    %155 = vector.load %arg2[%c1_134, %c640_135, %c0_136] : memref<2x1152x128xf32, #tpu.memory_space<vmem>>, vector<1x128x128xf32>
    %156 = vector.shape_cast %155 : vector<1x128x128xf32> to vector<128x128xf32>
    %cst_137 = arith.constant dense<0.000000e+00> : vector<256x128xf32>
    %157 = tpu.matmul %154, %156, %cst_137 {dimension_numbers = #tpu.dot_dimension_numbers<[1], [0], [0], [1], [0, 0, 1, 1], [], []>} : vector<256x128xf32>, vector<128x128xf32>, vector<256x128xf32> -> vector<256x128xf32>
    %158 = arith.addf %152, %157 : vector<256x128xf32>
    %c2_138 = arith.constant 2 : index
    %c0_139 = arith.constant 0 : index
    %c0_140 = arith.constant 0 : index
    %159 = vector.load %arg5[%c2_138, %c0_139, %c0_140] : memref<18x32x128xf32, #tpu.memory_space<vmem>>, vector<16x32x128xf32>
    %160 = vector.extract_strided_slice %159 {offsets = [0, 7, 0], sizes = [16, 16, 128], strides = [1, 1, 1]} : vector<16x32x128xf32> to vector<16x16x128xf32>
    %161 = vector.shape_cast %160 : vector<16x16x128xf32> to vector<256x128xf32>
    %c1_141 = arith.constant 1 : index
    %c768_142 = arith.constant 768 : index
    %c0_143 = arith.constant 0 : index
    %162 = vector.load %arg2[%c1_141, %c768_142, %c0_143] : memref<2x1152x128xf32, #tpu.memory_space<vmem>>, vector<1x128x128xf32>
    %163 = vector.shape_cast %162 : vector<1x128x128xf32> to vector<128x128xf32>
    %cst_144 = arith.constant dense<0.000000e+00> : vector<256x128xf32>
    %164 = tpu.matmul %161, %163, %cst_144 {dimension_numbers = #tpu.dot_dimension_numbers<[1], [0], [0], [1], [0, 0, 1, 1], [], []>} : vector<256x128xf32>, vector<128x128xf32>, vector<256x128xf32> -> vector<256x128xf32>
    %165 = arith.addf %158, %164 : vector<256x128xf32>
    %166 = vector.extract_strided_slice %159 {offsets = [0, 8, 0], sizes = [16, 16, 128], strides = [1, 1, 1]} : vector<16x32x128xf32> to vector<16x16x128xf32>
    %167 = vector.shape_cast %166 : vector<16x16x128xf32> to vector<256x128xf32>
    %c1_145 = arith.constant 1 : index
    %c896_146 = arith.constant 896 : index
    %c0_147 = arith.constant 0 : index
    %168 = vector.load %arg2[%c1_145, %c896_146, %c0_147] : memref<2x1152x128xf32, #tpu.memory_space<vmem>>, vector<1x128x128xf32>
    %169 = vector.shape_cast %168 : vector<1x128x128xf32> to vector<128x128xf32>
    %cst_148 = arith.constant dense<0.000000e+00> : vector<256x128xf32>
    %170 = tpu.matmul %167, %169, %cst_148 {dimension_numbers = #tpu.dot_dimension_numbers<[1], [0], [0], [1], [0, 0, 1, 1], [], []>} : vector<256x128xf32>, vector<128x128xf32>, vector<256x128xf32> -> vector<256x128xf32>
    %171 = arith.addf %165, %170 : vector<256x128xf32>
    %172 = vector.extract_strided_slice %159 {offsets = [0, 9, 0], sizes = [16, 16, 128], strides = [1, 1, 1]} : vector<16x32x128xf32> to vector<16x16x128xf32>
    %173 = vector.shape_cast %172 : vector<16x16x128xf32> to vector<256x128xf32>
    %c1_149 = arith.constant 1 : index
    %c1024_150 = arith.constant 1024 : index
    %c0_151 = arith.constant 0 : index
    %174 = vector.load %arg2[%c1_149, %c1024_150, %c0_151] : memref<2x1152x128xf32, #tpu.memory_space<vmem>>, vector<1x128x128xf32>
    %175 = vector.shape_cast %174 : vector<1x128x128xf32> to vector<128x128xf32>
    %cst_152 = arith.constant dense<0.000000e+00> : vector<256x128xf32>
    %176 = tpu.matmul %173, %175, %cst_152 {dimension_numbers = #tpu.dot_dimension_numbers<[1], [0], [0], [1], [0, 0, 1, 1], [], []>} : vector<256x128xf32>, vector<128x128xf32>, vector<256x128xf32> -> vector<256x128xf32>
    %177 = arith.addf %171, %176 : vector<256x128xf32>
    %178 = vector.shape_cast %177 : vector<256x128xf32> to vector<16x16x128xf32>
    %179 = arith.addf %99, %178 : vector<16x16x128xf32>
    %c0_153 = arith.constant 0 : index
    %c0_154 = arith.constant 0 : index
    %c0_155 = arith.constant 0 : index
    %c0_156 = arith.constant 0 : index
    %180 = vector.load %arg3[%c0_153, %c0_154, %c0_155, %c0_156] : memref<1x16x16x128xf32, #tpu.memory_space<vmem>>, vector<1x16x16x128xf32>
    %181 = vector.shape_cast %180 : vector<1x16x16x128xf32> to vector<16x16x128xf32>
    %182 = vector.shape_cast %179 : vector<16x16x128xf32> to vector<1x16x16x128xf32>
    tpu.vector_store %arg3[%c0_153, %c0_154, %c0_155, %c0_156], %182 {strides = array<i32>} : memref<1x16x16x128xf32, #tpu.memory_space<vmem>>, vector<1x16x16x128xf32>,
    return
  }
  func.func @transform_0(%arg0: i32) -> (i32, i32, i32, i32) {
    %c0_i32 = arith.constant 0 : i32
    %c0_i32_0 = arith.constant 0 : i32
    %c0_i32_1 = arith.constant 0 : i32
    %c0_i32_2 = arith.constant 0 : i32
    return %arg0, %c0_i32, %c0_i32_0, %c0_i32_1 : i32, i32, i32, i32
  }
  func.func @transform_1(%arg0: i32) -> (i32, i32, i32) {
    %c0_i32 = arith.constant 0 : i32
    %c0_i32_0 = arith.constant 0 : i32
    %c0_i32_1 = arith.constant 0 : i32
    %c0_i32_2 = arith.constant 0 : i32
    return %c0_i32, %c0_i32_0, %c0_i32_1 : i32, i32, i32
  }
  func.func @transform_2(%arg0: i32) -> (i32, i32, i32, i32) {
    %c0_i32 = arith.constant 0 : i32
    %c0_i32_0 = arith.constant 0 : i32
    %c0_i32_1 = arith.constant 0 : i32
    %c0_i32_2 = arith.constant 0 : i32
    return %arg0, %c0_i32, %c0_i32_0, %c0_i32_1 : i32, i32, i32, i32
  }
}

</mosaic_0001>

<bundles_post_ra>
// kernel: tpu_custom_call.1
= control target key start
LH: loop header
LB: loop body
LE: loop exit
PB: predicated region body
PF: predicated region fallthrough
CT: control target
= control target key end

     0   :  { %7 = vsyncpa [#allocation5], 0  ;;  %s16411_s0 = inlined_call_operand.hbm [shape: f32[2,16,16,128], index: 0, kind: input, shape index: {}]   ;;  %s16412_s1 = inlined_call_operand.hbm [shape: f32[2,1152,128], index: 1, kind: input, shape index: {}]   ;;  %s16413_s2 = inlined_call_operand.hbm [shape: f32[2,16,16,128], index: 2, kind: output, shape index: {}]  }
   0x1   :  { %9 = vsyncpa [#allocation5 + $0x1], 0 }
   0x2   :  { %10 = vsyncpa [#allocation8], 0 }
   0x3   :  { %11 = vsyncpa [#allocation6], 0 }
   0x4   :  { %13 = vsyncpa [#allocation6 + $0x1], 0  ;;  %s13620_s9 = smov 0   ;;  %s13622_s10 = smov 0  }
   0x5   :  { %s13624_s11 = smov 0   ;;  %s13626_s12 = smov 0  }
   0x6 LB: > { %s13641_s13 = sadd.s32 4294967295, %s13594_s12   ;;  %s9993_s14 = sadd.s32 4294967294, %s13594_s12   ;;  %s13594_s12 = sphi %s13626_s12, %s17159_s12   ;;  %s13590_s11 = sphi %s13624_s11, %s17158_s11   ;;  %s13586_s10 = sphi %s13622_s10, %s17157_s10   ;;  %s13582_s9 = sphi %s13620_s9, %s17156_s9  }
   0x7   : > { %p39_p0 = scmp.ne.s32.totalorder %s13586_s10, %s13582_s9  ;;  %p16414_p1 = scmp.eq.s32.totalorder %s13641_s13, 0 }
   0x8   : > { %p90_p3 = scmp.eq.s32.totalorder %s9993_s14, 1  ;;  %p9994_p5 = scmp.ge.s32.totalorder %s13594_s12, 1 }
   0x9   : > { %p13650_p4 = por %p16414_p1, %p39_p0  ;;  %p97_p7 = scmp.lt.s32.totalorder %s13594_s12, 3 }
   0xa   : > { %p13655_p6 = por %p90_p3, %p39_p0  ;;  %s13596_s18 = smov [#allocation7]  }
   0xb   : > { %s16691_s15 = scalar_select %p13650_p4, 1, 0 }
   0xc   : > { %s16692_s16 = scalar_select %p13655_p6, 1, 0 }
   0xd   : > { %p13660_p8 = pnand %p9994_p5, %p97_p7  ;;  %s109_s19 = sshll.u32 %s13596_s18, 4  ;;  %s13664_s19 = int_to_ptr.vmem [resolvable:$true] %s109_s19 }
   0xe   : > { %s13676_s21 = sadd.s32 1, %s13594_s12   ;;  %s26_s22 = sadd.s32 1, %s13590_s11 }
   0xf   : > { %s16693_s17 = scalar_select %p13660_p8, 1, 0 }
  0x10   : > { %p13411_p9 = pneg %p13660_p8  ;;  %s23_s23 = ssub.s32 %s13594_s12, %s13676_s21 }
  0x11   : > { %s13466_s26 = scalar_lea.hbm %s16412_s1, 36864 }
  0x12   : > { %p13671_p11 = pnand %p13411_p9, %p16414_p1  ;;  %p13467_p12 = scmp.ne.s32.totalorder %s16412_s1, %s13466_s26 }
  0x13   : > { %p13473_p5 = scmp.lt.u32.totalorder %s13466_s26, %s16412_s1 }
  0x14   : > { %p13468_p13 = pneg %p13671_p11 }
  0x16   : > { %p13469_p0 = pnand %p13468_p13, %p13467_p12 }
  0x18   : > { %p13470_p3 = pneg %p13469_p0 }
  0x1a   : > { %p13475_p7 = pnand %p13473_p5, %p13470_p3 }
  0x1c   : > { %13478 = shalt.err (!%p13475_p7)
}
  0x1d   : > { %s13479_s3 = scalar_lea.vmem %s13664_s19, 36864  ;;  %p13487_p2 = scmp.lt.s32.totalorder %s13664_s19, %s13664_s19 }
  0x1e   : > { %p13480_p9 = scmp.ne.s32.totalorder %s13664_s19, %s13479_s3  ;;  %p13488_p6 = scmp.lt.s32.totalorder %s13479_s3, %s13479_s3 }
  0x20   : > { %p13482_p10 = pnand %p13480_p9, %p13468_p13  ;;  %p13489_p4 = por %p13488_p6, %p13487_p2 }
  0x22   : > { %p13483_p1 = pneg %p13482_p10 }
  0x24   : > { %p13490_p8 = pnand %p13489_p4, %p13483_p1 }
  0x26   : > { %13493 = shalt.err (!%p13490_p8)
}
  0x27   : > { %s13597_s4 = smov 128   ;;  %s13598_s5 = smov 8  }
  0x28   : > { %13414 = dma.hbm_to_vmem [thread:$0]  (!%p13671_p11), %s16412_s1, 36864, %s13664_s19, [#allocation8], %s13597_s4, %s13597_s4, %s13598_s5  }
  0x29   : > { %p24_p1 = scmp.eq.s32.totalorder %s23_s23, 0  ;;  %p33_p2 = scmp.ne.s32.totalorder %s13590_s11, %s13586_s10 }
  0x2a   : > { %p34_p4 = scmp.eq.s32.totalorder %s13594_s12, 0  ;;  %p13424_p6 = scmp.lt.s32.totalorder %s13594_s12, 2 }
  0x2b   : > { %s13710_s8 = scalar_select %p24_p1, %s13590_s11, %s26_s22  }
  0x2c   : > { %p35_p8 = por %p34_p4, %p33_p2  ;;  %p16695_p10 = scmp.eq.s32.totalorder %s13641_s13, 1 }
  0x2d   : > { %s123_s18 = sand.u32 1, %s13590_s11   ;;  %s10009_s20 = sshll.u32 %s13594_s12, 12 }
  0x2e   : > { %p13714_p12 = por %p16695_p10, %p33_p2  ;;  %s9997_s24 = sshll.u32 %s123_s18, 8 }
  0x2f   : > { %s13723_s27 = scalar_lea.hbm %s16411_s0, %s10009_s20  ;;  %s127_s19 = scalar_lea.vmem [#allocation4], %s9997_s24 }
  0x30   : > { %s134_s22 = sshll.u32 %s127_s19, 4  ;;  %p13725_p11 = pnand %p13424_p6, %p35_p8  ;;  %s13729_s22 = int_to_ptr.vmem [resolvable:$true] %s134_s22 }
  0x31   : > { %s13731_s28 = scalar_lea.sflag [#allocation5], %s123_s18  ;;  %s13494_s29 = scalar_lea.hbm %s13723_s27, 4096 }
  0x32   : > { %p13495_p13 = scmp.ne.s32.totalorder %s13723_s27, %s13494_s29  ;;  %p13496_p0 = pneg %p13725_p11 }
  0x33   : > { %s13499_s6 = scalar_lea.hbm %s16411_s0, 8192  ;;  %p13500_p7 = scmp.lt.u32.totalorder %s13723_s27, %s16411_s0 }
  0x34   : > { %p13497_p3 = pnand %p13496_p0, %p13495_p13  ;;  %p13501_p9 = scmp.lt.u32.totalorder %s13499_s6, %s13494_s29 }
  0x35   : > { %p13503_p2 = scmp.lt.u32.totalorder %s13494_s29, %s13723_s27 }
  0x36   : > { %p13498_p5 = pneg %p13497_p3  ;;  %p13502_p1 = por %p13501_p9, %p13500_p7 }
  0x38   : > { %p13504_p4 = por %p13503_p2, %p13502_p1 }
  0x3a   : > { %p13505_p6 = pnand %p13504_p4, %p13498_p5 }
  0x3c   : > { %13508 = shalt.err (!%p13505_p6)
}
  0x3d   : > { %s13509_s18 = scalar_lea.vmem %s13729_s22, 4096  ;;  %s13599_s24 = smov [#allocation4]  }
  0x3e   : > { %p13510_p8 = scmp.ne.s32.totalorder %s13729_s22, %s13509_s18  ;;  %s13514_s25 = sshll.u32 %s13599_s24, 4  ;;  %s13515_s25 = int_to_ptr.vmem [resolvable:$false] %s13514_s25 }
  0x3f   : > { %s13516_s26 = scalar_lea.vmem %s13515_s25, 8192  ;;  %p13517_p3 = scmp.lt.s32.totalorder %s13729_s22, %s13515_s25 }
  0x40   : > { %p13512_p10 = pnand %p13510_p8, %p13496_p0  ;;  %p13518_p7 = scmp.lt.s32.totalorder %s13516_s26, %s13509_s18 }
  0x42   : > { %p13513_p13 = pneg %p13512_p10  ;;  %p13519_p9 = por %p13518_p7, %p13517_p3 }
  0x44   : > { %p13520_p1 = pnand %p13519_p9, %p13513_p13 }
  0x46   : > { %13523 = shalt.err (!%p13520_p1)
}
  0x47   : > { %13418 = dma.hbm_to_vmem [thread:$0]  (!%p13725_p11), %s13723_s27, 4096, %s13729_s22, %s13731_s28, %s13597_s4, %s13597_s4, %s13598_s5  }
  0x48   : > { %p16698_p0 = scmp.ne.s32.totalorder %s16693_s17, 0 }
  0x4a   : > { %146 = sbr.rel (%p16698_p0) target bundleno = 1773 (0x6ed), region = 28 }
  0x51   : > { %s13765_s19 = sand.u32 1, %s13586_s10   ;;  %p16699_p5 = scmp.ne.s32.totalorder %s16691_s15, 0 }
  0x52   : > { %s10001_s29 = sshll.u32 %s13765_s19, 8  ;;  %s149_s30 = scalar_lea.sflag [#allocation5], %s13765_s19 }
  0x53   : > { %s13771_s23 = scalar_lea.vmem [#allocation4], %s10001_s29 }
  0x54   : > { %13569 = dma.done.wait (%p16699_p5), %s149_s30, 4096  }
  0x55   : > { %13571 = vsyncadd (%p16699_p5), %s149_s30, 4294963200  ;;  %p16700_p11 = scmp.eq.s32.totalorder %s13641_s13, 0 }
  0x57   : > { %13573 = dma.done.wait (%p16700_p11), [#allocation8], 36864   ;;  %p16701_p2 = pmov %p16700_p11 }
  0x58   : > { %v16417_v0 = vmov 0.0   ;;  %v1860_v1 = vld [vmem:[#allocation7 + $0x80] sm:$0xff]  ;;  %v1861_v2 = vld [vmem:[#allocation7 + $0x88] sm:$0xff]  ;;  %v1862_v3 = vld [vmem:[#allocation7 + $0x90] sm:$0xff]  ;;  %v13601_v22 = vmov -3e+38  }
  0x59   : > { %13575 = vsyncadd (%p16701_p2), [#allocation8], 4294930432  ;;  %10907 = vmatprep.mubr.f32.mxu0 %v16417_v0  ;;  %11627 = vmatprep.mubr.f32.mxu1 %v16417_v0  ;;  %v12315_v4 = vpack.c.bf16 %v1861_v2, %v1860_v1  ;;  %v1863_v5 = vld [vmem:[#allocation7 + $0x98] sm:$0xff]  ;;  %v1864_v6 = vld [vmem:[#allocation7 + $0xa0] sm:$0xff]  ;;  %v13783_v23 = vrot.slane %v13601_v22, 6  ;;  %v13785_v24 = vrot.slane %v13601_v22, 7 }
  0x5a   : > { %v1865_v7 = vld [vmem:[#allocation7 + $0xa8] sm:$0xff]  ;;  %v12319_v8 = vpack.c.bf16 %v1863_v5, %v1862_v3  ;;  %v1866_v9 = vld [vmem:[#allocation7 + $0xb0] sm:$0xff]  ;;  %v1867_v10 = vld [vmem:[#allocation7 + $0xb8] sm:$0xff]  ;;  %vm992_vm0 = vcmask 1041408   ;;  %vm1137_vm1 = vcmask 1040384   ;;  %v13794_v30 = vrot.slane %v13601_v22, 1 }
  0x5b   : > { %v1868_v11 = vld [vmem:[#allocation7 + $0xc0] sm:$0xff]  ;;  %12316 = vmatprep.subr.bf16.mxu0 %v12315_v4  ;;  %v1869_v12 = vld [vmem:[#allocation7 + $0xc8] sm:$0xff]  ;;  %v1870_v13 = vld [vmem:[#allocation7 + $0xd0] sm:$0xff]  ;;  %v12323_v18 = vpack.c.bf16 %v1865_v7, %v1864_v6  ;;  %16702 = vst [vmem:[#allocation13_spill] sm:$0xff] %v13783_v23  ;;  %v13787_v25 = vpack.c.bf16 %v1867_v10, %v1866_v9  ;;  %v13796_v31 = vrot.slane %v13601_v22, 2  ;;  %vm1298_vm2 = vcmask 1046528  }
  0x5c   : > { %v1871_v14 = vld [vmem:[#allocation7 + $0xd8] sm:$0xff]  ;;  %12318 = vmatpush3.bf16.msra.mxu0 %v12315_v4  ;;  %v1872_v15 = vld [vmem:[#allocation7 + $0xe0] sm:$0xff]  ;;  %v1873_v16 = vld [vmem:[#allocation7 + $0xe8] sm:$0xff]  ;;  %16703 = vst [vmem:[#allocation14_spill] sm:$0xff] %v13785_v24  ;;  %v13789_v26 = vpack.c.bf16 %v1869_v12, %v1868_v11  ;;  %vm1443_vm3 = vcmask 1045504   ;;  %s16266_s15 = scalar_lea.vmem [#allocation9], %s10001_s29 }
  0x5d   : > { %v1874_v17 = vld [vmem:[#allocation7 + $0xf0] sm:$0xff]  ;;  %12320 = vmatprep.subr.bf16.mxu0 %v12319_v8  ;;  %v1875_v19 = vld [vmem:[#allocation7 + $0xf8] sm:$0xff]  ;;  %v1844_v20 = vld [vmem:[#allocation7] sm:$0xff]  ;;  %16704 = vst [vmem:[#allocation15_spill] sm:$0xff] %v13794_v30  ;;  %v13798_v32 = vpack.c.bf16 %v1871_v14, %v1870_v13  ;;  %v13809_v39 = vpack.c.bf16 %v1873_v16, %v1872_v15  ;;  %s10010_s17 = sshll.u32 %s13641_s13, 12  ;;  %s9910_s4 = sshll.u32 %s16266_s15, 4  ;;  %s16365_s4 = int_to_ptr.vmem [resolvable:$true] %s9910_s4 }
  0x5e   : > { %v1845_v21 = vld [vmem:[#allocation7 + $0x8] sm:$0xff]  ;;  %v269_v27 = vld [vmem:[%s13771_s23] sm:$0xff]  ;;  %v271_v29 = vld [vmem:[%s13771_s23 + $0x10] sm:$0xff]  ;;  %16705 = vst [vmem:[#allocation16_spill] sm:$0xff] %v13796_v31  ;;  %v13811_v40 = vpack.c.bf16 %v1875_v19, %v1874_v17  ;;  %s16363_s22 = scalar_lea.hbm %s16413_s2, %s10010_s17  ;;  %s9897_s13 = scalar_lea.sflag [#allocation6], %s13765_s19 }
  0x5f   : > { %v270_v28 = vld [vmem:[%s13771_s23 + $0x8] sm:$0xff]  ;;  %v272_v33 = vld [vmem:[%s13771_s23 + $0x18] sm:$0xff]  ;;  %v273_v34 = vld [vmem:[%s13771_s23 + $0x20] sm:$0xff]  ;;  %v13803_v36 = vmax.f32 %v269_v27, 0.0  ;;  %v13807_v38 = vmax.f32 %v271_v29, 0.0  ;;  %v13819_v45 = vpack.c.bf16 %v1845_v21, %v1844_v20  ;;  %s13524_s28 = scalar_lea.vmem %s16365_s4, 4096 }
  0x60   : > { %v274_v35 = vld [vmem:[%s13771_s23 + $0x28] sm:$0xff]  ;;  %v13805_v37 = vmax.f32 %v270_v28, 0.0  ;;  %12322 = vmatpush3.bf16.msra.mxu0 %v12319_v8  ;;  %v13813_v41 = vmax.f32 %v272_v33, 0.0  ;;  %v13815_v42 = vmax.f32 %v273_v34, 0.0  ;;  %v275_v43 = vld [vmem:[%s13771_s23 + $0x30] sm:$0xff]  ;;  %v276_v44 = vld [vmem:[%s13771_s23 + $0x38] sm:$0xff]  ;;  %p13525_p4 = scmp.ne.s32.totalorder %s16365_s4, %s13524_s28 }
  0x61   : > { %16706 = vst [vmem:[#allocation17_spill] sm:$0xff] %v13803_v36  ;;  %16708 = vst [vmem:[#allocation19_spill] sm:$0xff] %v13807_v38  ;;  %12324 = vmatprep.subr.bf16.mxu0 %v12323_v18  ;;  %v13821_v46 = vmax.f32 %v274_v35, 0.0  ;;  %v499_v47 = vmax.f32 %v13803_v36, -3e+38  ;;  %v1846_v49 = vld [vmem:[#allocation7 + $0x10] sm:$0xff]  ;;  %v503_v54 = vmax.f32 %v13803_v36, %v13807_v38 }
  0x62   : > { %16707 = vst [vmem:[#allocation18_spill] sm:$0xff] %v13805_v37  ;;  %16709 = vst [vmem:[#allocation20_spill] sm:$0xff] %v13813_v41  ;;  %v500_v48 = vmax.f32 %v13805_v37, -3e+38  ;;  %v13825_v50 = vmax.f32 %v275_v43, 0.0  ;;  %v1847_v51 = vld [vmem:[#allocation7 + $0x18] sm:$0xff]  ;;  %v504_v55 = vmax.f32 %v13805_v37, %v13813_v41  ;;  %v507_v56 = vmax.f32 %v13807_v38, %v13815_v42  ;;  %p13526_p6 = pnand %p13525_p4, %p13714_p12 }
  0x63   : > { %16710 = vst [vmem:[#allocation21_spill] sm:$0xff] %v13815_v42  ;;  %16711 = vst [vmem:[#allocation22_spill] sm:$0xff] %v13821_v46  ;;  %v277_v52 = vld [vmem:[%s13771_s23 + $0x40] sm:$0xff]  ;;  %v278_v53 = vld [vmem:[%s13771_s23 + $0x48] sm:$0xff]  ;;  %v627_v57 = vmax.f32 %v499_v47, %v13807_v38  ;;  %v13837_v59 = vmax.f32 %v276_v44, 0.0  ;;  %v508_v62 = vmax.f32 %v13813_v41, %v13821_v46  ;;  %v13843_v63 = vpack.c.bf16 %v1847_v51, %v1846_v49  ;;  %s13602_s3 = smov [#allocation9]  }
  0x64   : > { %16712 = vst [vmem:[#allocation23_spill] sm:$0xff] %v13825_v50  ;;  %v628_v58 = vmax.f32 %v500_v48, %v13813_v41  ;;  %v279_v60 = vld [vmem:[%s13771_s23 + $0x50] sm:$0xff]  ;;  %v280_v61 = vld [vmem:[%s13771_s23 + $0x58] sm:$0xff]  ;;  %12326 = vmatpush3.bf16.msra.mxu0 %v12323_v18  ;;  %v13845_v1 = vmax.f32 %v277_v52, 0.0  ;;  %v631_v2 = vmax.f32 %v503_v54, %v13815_v42  ;;  %v632_v3 = vmax.f32 %v504_v55, %v13821_v46  ;;  %v1848_v12 = vld [vmem:[#allocation7 + $0x20] sm:$0xff]  ;;  %p13527_p8 = pneg %p13526_p6  ;;  %s13528_s6 = sshll.u32 %s13602_s3, 4  ;;  %s13529_s6 = int_to_ptr.vmem [resolvable:$false] %s13528_s6 }
  0x65   : > { %16713 = vst [vmem:[#allocation24_spill] sm:$0xff] %v13837_v59  ;;  %12328 = vmatprep.subr.bf16.mxu0 %v13787_v25  ;;  %v756_v4 = vmax.f32 %v627_v57, %v13815_v42  ;;  %v13852_v6 = vmax.f32 %v278_v53, 0.0  ;;  %v13854_v7 = vmax.f32 %v279_v60, 0.0  ;;  %v13858_v10 = vmax.f32 %v280_v61, 0.0  ;;  %v1849_v13 = vld [vmem:[#allocation7 + $0x28] sm:$0xff]  ;;  %s13530_s7 = scalar_lea.vmem %s13529_s6, 8192  ;;  %p13531_p10 = scmp.lt.s32.totalorder %s16365_s4, %s13529_s6 }
  0x66   : > { %16714 = vst [vmem:[#allocation25_spill] sm:$0xff] %v13845_v1  ;;  %v757_v5 = vmax.f32 %v628_v58, %v13821_v46  ;;  %v760_v8 = vmax.f32 %v631_v2, %v13825_v50  ;;  %v761_v9 = vmax.f32 %v632_v3, %v13837_v59  ;;  %v13861_v11 = vmax.f32 %v507_v56, %v13825_v50  ;;  %p13532_p13 = scmp.lt.s32.totalorder %s13530_s7, %s13524_s28 }
  0x67   : > { %16715 = vst [vmem:[#allocation26_spill] sm:$0xff] %v13852_v6  ;;  %16716 = vst [vmem:[#allocation27_spill] sm:$0xff] %v13854_v7  ;;  %v994_v14 = vrot.slane %v756_v4, 6  ;;  %v1139_v15 = vrot.slane %v756_v4, 7  ;;  %v1299_v16 = vrot.slane %v756_v4, 1  ;;  %v1444_v18 = vrot.slane %v756_v4, 2 }
  0x68   : > { %16717 = vst [vmem:[#allocation28_spill] sm:$0xff] %v13858_v10  ;;  %v1300_v17 = vrot.slane %v757_v5, 1  ;;  %12330 = vmatpush3.bf16.msra.mxu0 %v13787_v25  ;;  %v1445_v19 = vrot.slane %v757_v5, 2  ;;  %v996_v20 = vrot.slane %v757_v5, 6  ;;  %v1141_v21 = vrot.slane %v757_v5, 7  ;;  %p13533_p3 = por %p13532_p13, %p13531_p10 }
  0x69   : > { %12332 = vmatprep.subr.bf16.mxu0 %v13789_v26  ;;  %v995_v22 = vsel %vm992_vm0, %v13783_v23, %v994_v14  ;;  %v1140_v27 = vsel %vm1137_vm1, %v13785_v24, %v1139_v15  ;;  %v13870_v28 = vmax.f32 %v508_v62, %v13837_v59  ;;  %v13872_v29 = vpack.c.bf16 %v1849_v13, %v1848_v12 }
  0x6a   : > { %v1105_v33 = vmax.f32 %v756_v4, %v995_v22  ;;  %v1301_v25 = vsel %vm1298_vm2, %v1299_v16, %v1300_v17  ;;  %v997_v34 = vsel %vm992_vm0, %v994_v14, %v996_v20  ;;  %v1142_v35 = vsel %vm1137_vm1, %v1139_v15, %v1141_v21  ;;  %p13534_p7 = pnand %p13533_p3, %p13527_p8 }
  0x6b   : > { %v1106_v43 = vmax.f32 %v757_v5, %v997_v34  ;;  %v1303_v44 = vsel %vm1298_vm2, %v1300_v17, %v13794_v30  ;;  %v885_v47 = vmax.f32 %v756_v4, %v13825_v50  ;;  %v886_v48 = vmax.f32 %v757_v5, %v13837_v59 }
  0x6c   : > { %12334 = vmatpush3.bf16.msra.mxu0 %v13789_v26  ;;  %v1250_v49 = vmax.f32 %v1105_v33, %v1140_v27  ;;  %v1446_v51 = vsel %vm1443_vm3, %v1444_v18, %v1445_v19  ;;  %v1448_v52 = vsel %vm1443_vm3, %v1445_v19, %v13796_v31  ;;  %v889_v53 = vmax.f32 %v760_v8, %v13845_v1 }
  0x6d   : > { %12336 = vmatprep.subr.bf16.mxu0 %v13798_v32  ;;  %v1251_v54 = vmax.f32 %v1106_v43, %v1142_v35  ;;  %v999_v55 = vrot.slane %v885_v47, 6  ;;  %v1144_v56 = vrot.slane %v885_v47, 7  ;;  %v1304_v57 = vrot.slane %v885_v47, 1 }
  0x6e   : > { %v1411_v58 = vmax.f32 %v1250_v49, %v1301_v25  ;;  %v1305_v60 = vrot.slane %v886_v48, 1  ;;  %v1449_v61 = vrot.slane %v885_v47, 2  ;;  %v1450_v62 = vrot.slane %v886_v48, 2 }
  0x6f   : > { %v1000_v26 = vsel %vm992_vm0, %v13783_v23, %v999_v55  ;;  %v1145_v2 = vsel %vm1137_vm1, %v13785_v24, %v1144_v56  ;;  %v1001_v3 = vrot.slane %v886_v48, 6  ;;  %v890_v4 = vmax.f32 %v761_v9, %v13852_v6 }
  0x70   : > { %12338 = vmatpush3.bf16.msra.mxu0 %v13798_v32  ;;  %v13893_v5 = vmax.f32 %v1411_v58, %v1446_v51  ;;  %v1412_v8 = vmax.f32 %v1251_v54, %v1303_v44  ;;  %v1107_v12 = vmax.f32 %v885_v47, %v1000_v26  ;;  %v764_v13 = vmax.f32 %v13861_v11, %v13845_v1 }
  0x71   : > { %12340 = vmatprep.subr.bf16.mxu0 %v13809_v39  ;;  %v1306_v14 = vsel %vm1298_vm2, %v1304_v57, %v1305_v60  ;;  %v1451_v15 = vsel %vm1443_vm3, %v1449_v61, %v1450_v62  ;;  %v1002_v16 = vsel %vm992_vm0, %v999_v55, %v1001_v3  ;;  %v1146_v17 = vrot.slane %v886_v48, 7 }
  0x72   : > { %16718 = vst [vmem:[#allocation29_spill] sm:$0xff] %v13893_v5  ;;  %v1252_v18 = vmax.f32 %v1107_v12, %v1145_v2  ;;  %v1108_v9 = vmax.f32 %v886_v48, %v1002_v16  ;;  %v1308_v32 = vsel %vm1298_vm2, %v1305_v60, %v13794_v30  ;;  %v1004_v19 = vrot.slane %v889_v53, 6 }
  0x73   : > { %v1147_v20 = vsel %vm1137_vm1, %v1144_v56, %v1146_v17  ;;  %v1149_v21 = vrot.slane %v889_v53, 7  ;;  %v1309_v22 = vrot.slane %v889_v53, 1  ;;  %v1310_v11 = vrot.slane %v890_v4, 1 }
  0x74   : > { %12342 = vmatpush3.bf16.msra.mxu0 %v13809_v39  ;;  %v1413_v27 = vmax.f32 %v1252_v18, %v1306_v14  ;;  %v1253_v33 = vmax.f32 %v1108_v9, %v1147_v20  ;;  %v1005_v25 = vsel %vm992_vm0, %v13783_v23, %v1004_v19  ;;  %v1454_v34 = vrot.slane %v889_v53, 2 }
  0x75   : > { %12344 = vmatprep.subr.bf16.mxu0 %v13811_v40  ;;  %v13908_v35 = vmax.f32 %v1412_v8, %v1448_v52  ;;  %v1109_v43 = vmax.f32 %v889_v53, %v1005_v25  ;;  %v1150_v44 = vsel %vm1137_vm1, %v13785_v24, %v1149_v21  ;;  %v1455_v47 = vrot.slane %v890_v4, 2  ;;  %v281_v52 = vld [vmem:[%s13771_s23 + $0x60] sm:$0xff] }
  0x76   : > { %v1414_v48 = vmax.f32 %v1253_v33, %v1308_v32  ;;  %v1453_v39 = vsel %vm1443_vm3, %v1450_v62, %v13796_v31  ;;  %v1006_v49 = vrot.slane %v890_v4, 6  ;;  %v1151_v51 = vrot.slane %v890_v4, 7 }
  0x77   : > { %16719 = vst [vmem:[#allocation30_spill] sm:$0xff] %v13908_v35  ;;  %v13914_v54 = vmax.f32 %v1413_v27, %v1451_v15  ;;  %v1254_v55 = vmax.f32 %v1109_v43, %v1150_v44  ;;  %v1311_v56 = vsel %vm1298_vm2, %v1309_v22, %v1310_v11  ;;  %v1456_v57 = vsel %vm1443_vm3, %v1454_v34, %v1455_v47  ;;  %v282_v22 = vld [vmem:[%s13771_s23 + $0x68] sm:$0xff] }
  0x78   : > { %12346 = vmatpush3.bf16.msra.mxu0 %v13811_v40  ;;  %v1007_v53 = vsel %vm992_vm0, %v1004_v19, %v1006_v49  ;;  %v1152_v58 = vsel %vm1137_vm1, %v1149_v21, %v1151_v51  ;;  %v1313_v60 = vsel %vm1298_vm2, %v1310_v11, %v13794_v30  ;;  %v765_v61 = vmax.f32 %v13870_v28, %v13852_v6 }
  0x79   : > { %16720 = vst [vmem:[#allocation31_spill] sm:$0xff] %v13914_v54  ;;  %12348 = vmatprep.subr.bf16.mxu0 %v13819_v45  ;;  %v13927_v62 = vmax.f32 %v1414_v48, %v1453_v39  ;;  %v1110_v26 = vmax.f32 %v890_v4, %v1007_v53  ;;  %v1458_v2 = vsel %vm1443_vm3, %v1455_v47, %v13796_v31  ;;  %v13933_v12 = vmax.f32 %v281_v52, 0.0  ;;  %v1850_v47 = vld [vmem:[#allocation7 + $0x30] sm:$0xff]  ;;  %v1851_v48 = vld [vmem:[#allocation7 + $0x38] sm:$0xff] }
  0x7a   : > { %v893_v40 = vmax.f32 %v764_v13, %v13854_v7  ;;  %v1415_v3 = vmax.f32 %v1254_v55, %v1311_v56  ;;  %v894_v8 = vmax.f32 %v765_v61, %v13858_v10  ;;  %v511_v14 = vmax.f32 %v13815_v42, %v13825_v50  ;;  %v283_v56 = vld [vmem:[%s13771_s23 + $0x70] sm:$0xff]  ;;  %v2455_v42 = vld [vmem:[#allocation7 + $0x108] sm:$0xff] }
  0x7b   : > { %16721 = vst [vmem:[#allocation32_spill] sm:$0xff] %v13927_v62  ;;  %16722 = vst [vmem:[#allocation33_spill] sm:$0xff] %v13933_v12  ;;  %10908 = vmatmul.mubr.f32.vlgmr.msra.gmra.mrb[0].mxu0 %v16417_v0  ;;  %v1255_v28 = vmax.f32 %v1110_v26, %v1152_v58  ;;  %v512_v4 = vmax.f32 %v13821_v46, %v13837_v59  ;;  %v13961_v55 = vmax.f32 %v282_v22, 0.0  ;;  %v284_v58 = vld [vmem:[%s13771_s23 + $0x78] sm:$0xff] }
  0x7c   : > { %v1009_v15 = vrot.slane %v893_v40, 6  ;;  %v1154_v16 = vrot.slane %v893_v40, 7  ;;  %12350 = vmatpush3.bf16.msra.mxu0 %v13819_v45  ;;  %10910 = vmatprep.mubr.f32.mxu0 %v13893_v5  ;;  %v1314_v13 = vrot.slane %v893_v40, 1  ;;  %v1315_v17 = vrot.slane %v894_v8, 1 }
  0x7d   : > { %v1459_v18 = vrot.slane %v893_v40, 2  ;;  %v1460_v9 = vrot.slane %v894_v8, 2  ;;  %12352 = vmatprep.subr.bf16.mxu0 %v13843_v63  ;;  %v1416_v32 = vmax.f32 %v1255_v28, %v1313_v60  ;;  %v1011_v21 = vrot.slane %v894_v8, 6  ;;  %16724 = vst [vmem:[#allocation35_spill] sm:$0xff] %v13961_v55 }
  0x7e   : > { %v1010_v19 = vsel %vm992_vm0, %v13783_v23, %v1009_v15  ;;  %v1155_v20 = vsel %vm1137_vm1, %v13785_v24, %v1154_v16  ;;  %v13948_v11 = vmax.f32 %v1415_v3, %v1456_v57  ;;  %v1316_v27 = vsel %vm1298_vm2, %v1314_v13, %v1315_v17 }
  0x7f   : > { %v1111_v45 = vmax.f32 %v893_v40, %v1010_v19  ;;  %v1156_v33 = vrot.slane %v894_v8, 7  ;;  %10911 = vmatmul.mubr.f32.gmra.mrb[2].mxu0 %v13908_v35  ;;  %v13952_v25 = vmax.f32 %v1416_v32, %v1458_v2  ;;  %v1461_v34 = vsel %vm1443_vm3, %v1459_v18, %v1460_v9  ;;  %v285_v40 = vld [vmem:[%s13771_s23 + $0x80] sm:$0xff] }
  0x80   : > { %v1012_v43 = vsel %vm992_vm0, %v1009_v15, %v1011_v21  ;;  %v1318_v44 = vsel %vm1298_vm2, %v1315_v17, %v13794_v30  ;;  %10913 = vmatprep.mubr.f32.mxu0 %v13914_v54  ;;  %12354 = vmatpush3.bf16.msra.mxu0 %v13843_v63  ;;  %v1463_v57 = vsel %vm1443_vm3, %v1460_v9, %v13796_v31  ;;  %v13991_v32 = vmax.f32 %v285_v40, 0.0  ;;  %v286_v21 = vld [vmem:[%s13771_s23 + $0x88] sm:$0xff] }
  0x81   : > { %16723 = vst [vmem:[#allocation34_spill] sm:$0xff] %v13952_v25  ;;  %v1256_v39 = vmax.f32 %v1111_v45, %v1155_v20  ;;  %v1112_v49 = vmax.f32 %v894_v8, %v1012_v43  ;;  %v1157_v51 = vsel %vm1137_vm1, %v1154_v16, %v1156_v33  ;;  %12356 = vmatprep.subr.bf16.mxu0 %v13872_v29 }
  0x82   : > { %v639_v52 = vmax.f32 %v511_v14, %v13845_v1  ;;  %v640_v53 = vmax.f32 %v512_v4, %v13852_v6  ;;  %v515_v63 = vmax.f32 %v13825_v50, %v13845_v1  ;;  %v516_v26 = vmax.f32 %v13837_v59, %v13852_v6  ;;  %16727 = vst [vmem:[#allocation38_spill] sm:$0xff] %v13991_v32 }
  0x83   : > { %v1417_v60 = vmax.f32 %v1256_v39, %v1316_v27  ;;  %v1257_v61 = vmax.f32 %v1112_v49, %v1157_v51  ;;  %v12359_v2 = vpack.c.bf16 %v1851_v48, %v1850_v47  ;;  %10914 = vmatmul.mubr.f32.gmra.mrb[4].mxu0 %v13927_v62  ;;  %v13978_v14 = vmax.f32 %v283_v56, 0.0 }
  0x84   : > { %v768_v3 = vmax.f32 %v639_v52, %v13854_v7  ;;  %v769_v8 = vmax.f32 %v640_v53, %v13858_v10  ;;  %v643_v28 = vmax.f32 %v515_v63, %v13854_v7  ;;  %10916 = vmatprep.mubr.f32.mxu0 %v13948_v11  ;;  %12358 = vmatpush3.bf16.msra.mxu0 %v13872_v29  ;;  %v13985_v4 = vmax.f32 %v284_v58, 0.0 }
  0x85   : > { %16725 = vst [vmem:[#allocation36_spill] sm:$0xff] %v13978_v14  ;;  %v13982_v15 = vmax.f32 %v1417_v60, %v1461_v34  ;;  %v1418_v16 = vmax.f32 %v1257_v61, %v1318_v44  ;;  %v644_v13 = vmax.f32 %v516_v26, %v13858_v10  ;;  %12360 = vmatprep.subr.bf16.mxu0 %v12359_v2  ;;  %v14008_v56 = vmax.f32 %v286_v21, 0.0  ;;  %v287_v21 = vld [vmem:[%s13771_s23 + $0x90] sm:$0xff] }
  0x86   : > { %16726 = vst [vmem:[#allocation37_spill] sm:$0xff] %v13985_v4  ;;  %v897_v17 = vmax.f32 %v768_v3, %v13933_v12  ;;  %v898_v18 = vmax.f32 %v769_v8, %v13961_v55  ;;  %v772_v9 = vmax.f32 %v643_v28, %v13933_v12  ;;  %v519_v29 = vmax.f32 %v13845_v1, %v13854_v7 }
  0x87   : > { %v13993_v19 = vmax.f32 %v1418_v16, %v1463_v57  ;;  %v773_v20 = vmax.f32 %v644_v13, %v13961_v55  ;;  %v520_v22 = vmax.f32 %v13852_v6, %v13858_v10  ;;  %10917 = vmatmul.mubr.f32.gmra.mrb[6].mxu0 %v13952_v25  ;;  %16728 = vst [vmem:[#allocation39_spill] sm:$0xff] %v14008_v56 }
  0x88   : > { %v1014_v45 = vrot.slane %v897_v17, 6  ;;  %v1159_v27 = vrot.slane %v897_v17, 7  ;;  %v1319_v33 = vrot.slane %v897_v17, 1  ;;  %v1320_v34 = vrot.slane %v898_v18, 1  ;;  %10919 = vmatprep.mubr.f32.mxu0 %v13982_v15  ;;  %12362 = vmatpush3.bf16.msra.mxu0 %v12359_v2 }
  0x89   : > { %v1464_v43 = vrot.slane %v897_v17, 2  ;;  %v1465_v44 = vrot.slane %v898_v18, 2  ;;  %v1016_v47 = vrot.slane %v898_v18, 6  ;;  %v1161_v48 = vrot.slane %v898_v18, 7 }
  0x8a   : > { %v1015_v39 = vsel %vm992_vm0, %v13783_v23, %v1014_v45  ;;  %v1160_v49 = vsel %vm1137_vm1, %v13785_v24, %v1159_v27  ;;  %v1321_v51 = vsel %vm1298_vm2, %v1319_v33, %v1320_v34  ;;  %v1323_v58 = vsel %vm1298_vm2, %v1320_v34, %v13794_v30 }
  0x8b   : > { %v1113_v57 = vmax.f32 %v897_v17, %v1015_v39  ;;  %v1017_v52 = vsel %vm992_vm0, %v1014_v45, %v1016_v47  ;;  %v1162_v53 = vsel %vm1137_vm1, %v1159_v27, %v1161_v48  ;;  %10920 = vmatmul.mubr.f32.gmra.mrb[8].mxu0 %v13993_v19  ;;  %v1466_v63 = vsel %vm1443_vm3, %v1464_v43, %v1465_v44 }
  0x8c   : > { %v1114_v60 = vmax.f32 %v898_v18, %v1017_v52  ;;  %v901_v61 = vmax.f32 %v772_v9, %v13978_v14  ;;  %v902_v26 = vmax.f32 %v773_v20, %v13985_v4  ;;  %v1468_v40 = vsel %vm1443_vm3, %v1465_v44, %v13796_v31  ;;  %v1853_v52 = vld [vmem:[#allocation7 + $0x48] sm:$0xff] }
  0x8d   : > { %v1258_v2 = vmax.f32 %v1113_v57, %v1160_v49  ;;  %v647_v3 = vmax.f32 %v519_v29, %v13933_v12  ;;  %v648_v8 = vmax.f32 %v520_v22, %v13961_v55  ;;  %v14030_v47 = vmax.f32 %v287_v21, 0.0  ;;  %v1852_v57 = vld [vmem:[#allocation7 + $0x40] sm:$0xff] }
  0x8e   : > { %v1259_v28 = vmax.f32 %v1114_v60, %v1162_v53  ;;  %v1019_v16 = vrot.slane %v901_v61, 6  ;;  %v1164_v13 = vrot.slane %v901_v61, 7  ;;  %v1324_v17 = vrot.slane %v901_v61, 1 }
  0x8f   : > { %v1419_v45 = vmax.f32 %v1258_v2, %v1321_v51  ;;  %v1325_v27 = vrot.slane %v902_v26, 1  ;;  %v1469_v18 = vrot.slane %v901_v61, 2  ;;  %v1470_v33 = vrot.slane %v902_v26, 2  ;;  %16729 = vst [vmem:[#allocation40_spill] sm:$0xff] %v14030_v47 }
  0x90   : > { %v1420_v9 = vmax.f32 %v1259_v28, %v1323_v58  ;;  %v1020_v20 = vsel %vm992_vm0, %v13783_v23, %v1019_v16  ;;  %v1165_v34 = vsel %vm1137_vm1, %v13785_v24, %v1164_v13  ;;  %v1021_v43 = vrot.slane %v902_v26, 6 }
  0x91   : > { %v14027_v29 = vmax.f32 %v1419_v45, %v1466_v63  ;;  %v1115_v22 = vmax.f32 %v901_v61, %v1020_v20  ;;  %v1326_v44 = vsel %vm1298_vm2, %v1324_v17, %v1325_v27  ;;  %v1471_v39 = vsel %vm1443_vm3, %v1469_v18, %v1470_v33 }
  0x92   : > { %v14032_v48 = vmax.f32 %v1420_v9, %v1468_v40  ;;  %v1022_v49 = vsel %vm992_vm0, %v1019_v16, %v1021_v43  ;;  %v1166_v51 = vrot.slane %v902_v26, 7  ;;  %v1328_v63 = vsel %vm1298_vm2, %v1325_v27, %v13794_v30  ;;  %v289_v43 = vld [vmem:[%s13771_s23 + $0xa0] sm:$0xff] }
  0x93   : > { %10922 = vmatprep.mubr.f32.mxu0 %v14027_v29  ;;  %v1260_v53 = vmax.f32 %v1115_v22, %v1165_v34  ;;  %v1116_v58 = vmax.f32 %v902_v26, %v1022_v49  ;;  %v776_v60 = vmax.f32 %v647_v3, %v13978_v14  ;;  %v777_v2 = vmax.f32 %v648_v8, %v13985_v4  ;;  %v288_v34 = vld [vmem:[%s13771_s23 + $0x98] sm:$0xff] }
  0x94   : > { %10923 = vmatmul.mubr.f32.gmra.mrb[10].mxu0 %v14032_v48  ;;  %v1167_v61 = vsel %vm1137_vm1, %v1164_v13, %v1166_v51  ;;  %v523_v40 = vmax.f32 %v13854_v7, %v13933_v12  ;;  %v524_v28 = vmax.f32 %v13858_v10, %v13961_v55  ;;  %v12363_v21 = vpack.c.bf16 %v1853_v52, %v1852_v57  ;;  %v293_v10 = vld [vmem:[%s13771_s23 + $0xc0] sm:$0xff] }
  0x95   : > { %v1421_v26 = vmax.f32 %v1260_v53, %v1326_v44  ;;  %v1261_v16 = vmax.f32 %v1116_v58, %v1167_v61  ;;  %v905_v17 = vmax.f32 %v776_v60, %v13991_v32  ;;  %v1473_v3 = vsel %vm1443_vm3, %v1470_v33, %v13796_v31 }
  0x96   : > { %v906_v13 = vmax.f32 %v777_v2, %v14008_v56  ;;  %v651_v45 = vmax.f32 %v523_v40, %v13978_v14  ;;  %v652_v8 = vmax.f32 %v524_v28, %v13985_v4  ;;  %12364 = vmatprep.subr.bf16.mxu0 %v12363_v21  ;;  %v14066_v60 = vmax.f32 %v289_v43, 0.0 }
  0x97   : > { %v14053_v27 = vmax.f32 %v1421_v26, %v1471_v39  ;;  %v1422_v18 = vmax.f32 %v1261_v16, %v1328_v63  ;;  %v1024_v9 = vrot.slane %v905_v17, 6  ;;  %v1169_v20 = vrot.slane %v905_v17, 7  ;;  %12366 = vmatpush3.bf16.msra.mxu0 %v12363_v21 }
  0x98   : > { %v1329_v22 = vrot.slane %v905_v17, 1  ;;  %v1330_v44 = vrot.slane %v906_v13, 1  ;;  %v1474_v49 = vrot.slane %v905_v17, 2  ;;  %v1475_v51 = vrot.slane %v906_v13, 2  ;;  %16731 = vst [vmem:[#allocation42_spill] sm:$0xff] %v14066_v60 }
  0x99   : > { %10925 = vmatprep.mubr.f32.mxu0 %v14053_v27  ;;  %v14058_v33 = vmax.f32 %v1422_v18, %v1473_v3  ;;  %v1025_v57 = vsel %vm992_vm0, %v13783_v23, %v1024_v9  ;;  %v1170_v39 = vsel %vm1137_vm1, %v13785_v24, %v1169_v20  ;;  %v1026_v52 = vrot.slane %v906_v13, 6 }
  0x9a   : > { %v1117_v53 = vmax.f32 %v905_v17, %v1025_v57  ;;  %v1171_v58 = vrot.slane %v906_v13, 7  ;;  %v14064_v63 = vmax.f32 %v288_v34, 0.0  ;;  %v1331_v61 = vsel %vm1298_vm2, %v1329_v22, %v1330_v44 }
  0x9b   : > { %10926 = vmatmul.mubr.f32.gmra.mrb[12].mxu0 %v14058_v33  ;;  %v1476_v2 = vsel %vm1443_vm3, %v1474_v49, %v1475_v51  ;;  %v1027_v40 = vsel %vm992_vm0, %v1024_v9, %v1026_v52  ;;  %v780_v28 = vmax.f32 %v651_v45, %v13991_v32  ;;  %v781_v21 = vmax.f32 %v652_v8, %v14008_v56 }
  0x9c   : > { %16730 = vst [vmem:[#allocation41_spill] sm:$0xff] %v14064_v63  ;;  %v1262_v26 = vmax.f32 %v1117_v53, %v1170_v39  ;;  %v1118_v16 = vmax.f32 %v906_v13, %v1027_v40  ;;  %v1172_v17 = vsel %vm1137_vm1, %v1169_v20, %v1171_v58  ;;  %v1333_v3 = vsel %vm1298_vm2, %v1330_v44, %v13794_v30  ;;  %v290_v44 = vld [vmem:[%s13771_s23 + $0xa8] sm:$0xff]  ;;  %v291_v39 = vld [vmem:[%s13771_s23 + $0xb0] sm:$0xff] }
  0x9d   : > { %v1478_v18 = vsel %vm1443_vm3, %v1475_v51, %v13796_v31  ;;  %v909_v34 = vmax.f32 %v780_v28, %v14030_v47  ;;  %v527_v9 = vmax.f32 %v13933_v12, %v13978_v14  ;;  %v910_v13 = vmax.f32 %v781_v21, %v14064_v63 }
  0x9e   : > { %v1423_v45 = vmax.f32 %v1262_v26, %v1331_v61  ;;  %v1263_v43 = vmax.f32 %v1118_v16, %v1172_v17  ;;  %v528_v20 = vmax.f32 %v13961_v55, %v13985_v4  ;;  %v14096_v21 = vmax.f32 %v290_v44, 0.0 }
  0x9f   : > { %v1029_v22 = vrot.slane %v909_v34, 6  ;;  %v1174_v8 = vrot.slane %v909_v34, 7  ;;  %v1334_v49 = vrot.slane %v909_v34, 1  ;;  %v1479_v57 = vrot.slane %v909_v34, 2 }
  0xa0   : > { %v14087_v52 = vmax.f32 %v1423_v45, %v1476_v2  ;;  %v1424_v51 = vmax.f32 %v1263_v43, %v1333_v3  ;;  %v1335_v53 = vrot.slane %v910_v13, 1  ;;  %v1480_v58 = vrot.slane %v910_v13, 2  ;;  %16732 = vst [vmem:[#allocation43_spill] sm:$0xff] %v14096_v21  ;;  %v1854_v3 = vld [vmem:[#allocation7 + $0x50] sm:$0xff]  ;;  %v1855_v45 = vld [vmem:[#allocation7 + $0x58] sm:$0xff] }
  0xa1   : > { %v1030_v61 = vsel %vm992_vm0, %v13783_v23, %v1029_v22  ;;  %v1175_v40 = vsel %vm1137_vm1, %v13785_v24, %v1174_v8  ;;  %v1031_v28 = vrot.slane %v910_v13, 6  ;;  %v1176_v26 = vrot.slane %v910_v13, 7 }
  0xa2   : > { %10928 = vmatprep.mubr.f32.mxu0 %v14087_v52  ;;  %v14094_v16 = vmax.f32 %v1424_v51, %v1478_v18  ;;  %v1119_v17 = vmax.f32 %v909_v34, %v1030_v61  ;;  %v14098_v2 = vmax.f32 %v291_v39, 0.0  ;;  %v1336_v43 = vsel %vm1298_vm2, %v1334_v49, %v1335_v53  ;;  %v292_v39 = vld [vmem:[%s13771_s23 + $0xb8] sm:$0xff] }
  0xa3   : > { %v1481_v0 = vsel %vm1443_vm3, %v1479_v57, %v1480_v58  ;;  %v1032_v12 = vsel %vm992_vm0, %v1029_v22, %v1031_v28  ;;  %v1177_v55 = vsel %vm1137_vm1, %v1174_v8, %v1176_v26  ;;  %v655_v34 = vmax.f32 %v527_v9, %v13991_v32 }
  0xa4   : > { %16733 = vst [vmem:[#allocation44_spill] sm:$0xff] %v14098_v2  ;;  %10929 = vmatmul.mubr.f32.gmra.mrb[14].mxu0 %v14094_v16  ;;  %v1264_v7 = vmax.f32 %v1119_v17, %v1175_v40  ;;  %v1120_v18 = vmax.f32 %v910_v13, %v1032_v12  ;;  %v656_v44 = vmax.f32 %v528_v20, %v14008_v56  ;;  %v14118_v13 = vmax.f32 %v292_v39, 0.0 }
  0xa5   : > { %v1338_v51 = vsel %vm1298_vm2, %v1335_v53, %v13794_v30  ;;  %v531_v49 = vmax.f32 %v13978_v14, %v13991_v32  ;;  %v532_v22 = vmax.f32 %v13985_v4, %v14008_v56  ;;  %v12367_v57 = vpack.c.bf16 %v1855_v45, %v1854_v3 }
  0xa6   : > { %v1425_v8 = vmax.f32 %v1264_v7, %v1336_v43  ;;  %v1265_v61 = vmax.f32 %v1120_v18, %v1177_v55  ;;  %v784_v40 = vmax.f32 %v655_v34, %v14030_v47  ;;  %v785_v12 = vmax.f32 %v656_v44, %v14064_v63  ;;  %16734 = vst [vmem:[#allocation45_spill] sm:$0xff] %v14118_v13 }
  0xa7   : > { %v1483_v9 = vsel %vm1443_vm3, %v1480_v58, %v13796_v31  ;;  %v659_v20 = vmax.f32 %v531_v49, %v14030_v47  ;;  %v660_v53 = vmax.f32 %v532_v22, %v14064_v63  ;;  %12368 = vmatprep.subr.bf16.mxu0 %v12367_v57  ;;  %v535_v58 = vmax.f32 %v13991_v32, %v14030_v47 }
  0xa8   : > { %v14122_v28 = vmax.f32 %v1425_v8, %v1481_v0  ;;  %v1426_v26 = vmax.f32 %v1265_v61, %v1338_v51  ;;  %v913_v7 = vmax.f32 %v784_v40, %v14066_v60  ;;  %v914_v55 = vmax.f32 %v785_v12, %v14096_v21  ;;  %12370 = vmatpush3.bf16.msra.mxu0 %v12367_v57 }
  0xa9   : > { %v788_v17 = vmax.f32 %v659_v20, %v14066_v60  ;;  %v789_v3 = vmax.f32 %v660_v53, %v14096_v21  ;;  %v536_v45 = vmax.f32 %v14008_v56, %v14064_v63  ;;  %v1768_v37 = vrot.slane %v14087_v52, 7 }
  0xaa   : > { %10931 = vmatprep.mubr.f32.mxu0 %v14122_v28  ;;  %v14133_v0 = vmax.f32 %v1426_v26, %v1483_v9  ;;  %v1034_v43 = vrot.slane %v913_v7, 6  ;;  %v1179_v18 = vrot.slane %v913_v7, 7  ;;  %v1339_v34 = vrot.slane %v913_v7, 1 }
  0xab   : > { %v1340_v44 = vrot.slane %v914_v55, 1  ;;  %v1484_v39 = vrot.slane %v913_v7, 2  ;;  %v1485_v51 = vrot.slane %v914_v55, 2  ;;  %v1036_v49 = vrot.slane %v914_v55, 6 }
  0xac   : > { %10932 = vmatmul.mubr.f32.gmra.mrb[16].mxu0 %v14133_v0  ;;  %v1035_v22 = vsel %vm992_vm0, %v13783_v23, %v1034_v43  ;;  %v1180_v57 = vsel %vm1137_vm1, %v13785_v24, %v1179_v18  ;;  %v1181_v8 = vrot.slane %v914_v55, 7  ;;  %v917_v61 = vmax.f32 %v788_v17, %v14098_v2 }
  0xad   : > { %v1121_v40 = vmax.f32 %v913_v7, %v1035_v22  ;;  %v1341_v12 = vsel %vm1298_vm2, %v1339_v34, %v1340_v44  ;;  %v1486_v9 = vsel %vm1443_vm3, %v1484_v39, %v1485_v51  ;;  %v1037_v20 = vsel %vm992_vm0, %v1034_v43, %v1036_v49 }
  0xae   : > { %v1122_v53 = vmax.f32 %v914_v55, %v1037_v20  ;;  %v1182_v26 = vsel %vm1137_vm1, %v1179_v18, %v1181_v8  ;;  %v1343_v32 = vsel %vm1298_vm2, %v1340_v44, %v13794_v30  ;;  %v1488_v56 = vsel %vm1443_vm3, %v1485_v51, %v13796_v31  ;;  %v294_v51 = vld [vmem:[%s13771_s23 + $0xc8] sm:$0xff] }
  0xaf   : > { %v1266_v14 = vmax.f32 %v1121_v40, %v1180_v57  ;;  %v918_v17 = vmax.f32 %v789_v3, %v14118_v13  ;;  %v1039_v7 = vrot.slane %v917_v61, 6  ;;  %v1184_v22 = vrot.slane %v917_v61, 7 }
  0xb0   : > { %v1267_v34 = vmax.f32 %v1122_v53, %v1182_v26  ;;  %v1344_v4 = vrot.slane %v917_v61, 1  ;;  %v1489_v39 = vrot.slane %v917_v61, 2  ;;  %v663_v55 = vmax.f32 %v535_v58, %v14066_v60 }
  0xb1   : > { %v1427_v43 = vmax.f32 %v1266_v14, %v1341_v12  ;;  %v1040_v18 = vsel %vm992_vm0, %v13783_v23, %v1039_v7  ;;  %v1185_v44 = vsel %vm1137_vm1, %v13785_v24, %v1184_v22  ;;  %v1345_v49 = vrot.slane %v918_v17, 1 }
  0xb2   : > { %v1428_v57 = vmax.f32 %v1267_v34, %v1343_v32  ;;  %v1123_v8 = vmax.f32 %v917_v61, %v1040_v18  ;;  %v1490_v3 = vrot.slane %v918_v17, 2  ;;  %v1041_v40 = vrot.slane %v918_v17, 6 }
  0xb3   : > { %v14157_v20 = vmax.f32 %v1427_v43, %v1486_v9  ;;  %v1346_v53 = vsel %vm1298_vm2, %v1344_v4, %v1345_v49  ;;  %v1186_v26 = vrot.slane %v918_v17, 7  ;;  %v14160_v58 = vmax.f32 %v293_v10, 0.0  ;;  %v295_v4 = vld [vmem:[%s13771_s23 + $0xd0] sm:$0xff]  ;;  %v1856_v43 = vld [vmem:[#allocation7 + $0x60] sm:$0xff]  ;;  %v1857_v10 = vld [vmem:[#allocation7 + $0x68] sm:$0xff] }
  0xb4   : > { %v14162_v14 = vmax.f32 %v1428_v57, %v1488_v56  ;;  %v1268_v12 = vmax.f32 %v1123_v8, %v1185_v44  ;;  %v1042_v1 = vsel %vm992_vm0, %v1039_v7, %v1041_v40  ;;  %v14165_v6 = vmax.f32 %v294_v51, 0.0 }
  0xb5   : > { %16735 = vst [vmem:[#allocation46_spill] sm:$0xff] %v14160_v58  ;;  %10934 = vmatprep.mubr.f32.mxu0 %v14157_v20  ;;  %v1491_v32 = vsel %vm1443_vm3, %v1489_v39, %v1490_v3  ;;  %v1124_v61 = vmax.f32 %v918_v17, %v1042_v1  ;;  %v1187_v9 = vsel %vm1137_vm1, %v1184_v22, %v1186_v26  ;;  %v14186_v51 = vmax.f32 %v295_v4, 0.0 }
  0xb6   : > { %16736 = vst [vmem:[#allocation47_spill] sm:$0xff] %v14165_v6  ;;  %v664_v34 = vmax.f32 %v536_v45, %v14096_v21  ;;  %10935 = vmatmul.mubr.f32.gmra.mrb[18].mxu0 %v14162_v14  ;;  %v1429_v56 = vmax.f32 %v1268_v12, %v1346_v53  ;;  %v1348_v7 = vsel %vm1298_vm2, %v1345_v49, %v13794_v30 }
  0xb7   : > { %v1493_v18 = vsel %vm1443_vm3, %v1490_v3, %v13796_v31  ;;  %v792_v44 = vmax.f32 %v663_v55, %v14098_v2  ;;  %v1269_v39 = vmax.f32 %v1124_v61, %v1187_v9  ;;  %v539_v45 = vmax.f32 %v14030_v47, %v14066_v60  ;;  %16737 = vst [vmem:[#allocation48_spill] sm:$0xff] %v14186_v51  ;;  %v297_v9 = vld [vmem:[%s13771_s23 + $0xe0] sm:$0xff] }
  0xb8   : > { %v793_v1 = vmax.f32 %v664_v34, %v14118_v13  ;;  %v540_v17 = vmax.f32 %v14064_v63, %v14096_v21  ;;  %v14183_v22 = vmax.f32 %v1429_v56, %v1491_v32  ;;  %v12371_v57 = vpack.c.bf16 %v1857_v10, %v1856_v43  ;;  %v296_v32 = vld [vmem:[%s13771_s23 + $0xd8] sm:$0xff] }
  0xb9   : > { %v921_v49 = vmax.f32 %v792_v44, %v14160_v58  ;;  %v1430_v8 = vmax.f32 %v1269_v39, %v1348_v7  ;;  %v667_v3 = vmax.f32 %v539_v45, %v14098_v2 }
  0xba   : > { %v922_v55 = vmax.f32 %v793_v1, %v14165_v6  ;;  %v668_v40 = vmax.f32 %v540_v17, %v14118_v13  ;;  %10937 = vmatprep.mubr.f32.mxu0 %v14183_v22  ;;  %12372 = vmatprep.subr.bf16.mxu0 %v12371_v57  ;;  %v14205_v17 = vmax.f32 %v297_v9, 0.0 }
  0xbb   : > { %v1044_v53 = vrot.slane %v921_v49, 6  ;;  %v1189_v26 = vrot.slane %v921_v49, 7  ;;  %v1349_v12 = vrot.slane %v921_v49, 1  ;;  %v1494_v61 = vrot.slane %v921_v49, 2  ;;  %12374 = vmatpush3.bf16.msra.mxu0 %v12371_v57 }
  0xbc   : > { %v14194_v34 = vmax.f32 %v1430_v8, %v1493_v18  ;;  %v1350_v4 = vrot.slane %v922_v55, 1  ;;  %v1495_v43 = vrot.slane %v922_v55, 2  ;;  %v1046_v10 = vrot.slane %v922_v55, 6  ;;  %16739 = vst [vmem:[#allocation50_spill] sm:$0xff] %v14205_v17 }
  0xbd   : > { %v1045_v56 = vsel %vm992_vm0, %v13783_v23, %v1044_v53  ;;  %v1190_v7 = vsel %vm1137_vm1, %v13785_v24, %v1189_v26  ;;  %v1191_v44 = vrot.slane %v922_v55, 7  ;;  %v796_v39 = vmax.f32 %v667_v3, %v14160_v58 }
  0xbe   : > { %10938 = vmatmul.mubr.f32.gmra.mrb[20].mxu0 %v14194_v34  ;;  %v1125_v1 = vmax.f32 %v921_v49, %v1045_v56  ;;  %v1047_v45 = vsel %vm992_vm0, %v1044_v53, %v1046_v10  ;;  %v14203_v18 = vmax.f32 %v296_v32, 0.0  ;;  %v1351_v57 = vsel %vm1298_vm2, %v1349_v12, %v1350_v4 }
  0xbf   : > { %v1496_v8 = vsel %vm1443_vm3, %v1494_v61, %v1495_v43  ;;  %v1126_v47 = vmax.f32 %v922_v55, %v1047_v45  ;;  %v1192_v63 = vsel %vm1137_vm1, %v1189_v26, %v1191_v44  ;;  %v1353_v3 = vsel %vm1298_vm2, %v1350_v4, %v13794_v30  ;;  %v298_v44 = vld [vmem:[%s13771_s23 + $0xe8] sm:$0xff] }
  0xc0   : > { %16738 = vst [vmem:[#allocation49_spill] sm:$0xff] %v14203_v18  ;;  %v1270_v50 = vmax.f32 %v1125_v1, %v1190_v7  ;;  %v797_v49 = vmax.f32 %v668_v40, %v14165_v6  ;;  %v925_v53 = vmax.f32 %v796_v39, %v14186_v51  ;;  %v1498_v9 = vsel %vm1443_vm3, %v1495_v43, %v13796_v31 }
  0xc1   : > { %v1271_v32 = vmax.f32 %v1126_v47, %v1192_v63  ;;  %v543_v12 = vmax.f32 %v14066_v60, %v14098_v2  ;;  %v544_v55 = vmax.f32 %v14096_v21, %v14118_v13 }
  0xc2   : > { %v1431_v26 = vmax.f32 %v1270_v50, %v1351_v57  ;;  %v926_v61 = vmax.f32 %v797_v49, %v14203_v18  ;;  %v1049_v10 = vrot.slane %v925_v53, 6  ;;  %v1194_v56 = vrot.slane %v925_v53, 7 }
  0xc3   : > { %v1432_v4 = vmax.f32 %v1271_v32, %v1353_v3  ;;  %v1354_v7 = vrot.slane %v925_v53, 1  ;;  %v1499_v40 = vrot.slane %v925_v53, 2  ;;  %v671_v47 = vmax.f32 %v543_v12, %v14160_v58 }
  0xc4   : > { %v14223_v63 = vmax.f32 %v1431_v26, %v1496_v8  ;;  %v1050_v43 = vsel %vm992_vm0, %v13783_v23, %v1049_v10  ;;  %v1195_v39 = vsel %vm1137_vm1, %v13785_v24, %v1194_v56  ;;  %v1355_v1 = vrot.slane %v926_v61, 1 }
  0xc5   : > { %v14229_v50 = vmax.f32 %v1432_v4, %v1498_v9  ;;  %v1127_v45 = vmax.f32 %v925_v53, %v1050_v43  ;;  %v1500_v57 = vrot.slane %v926_v61, 2  ;;  %v1051_v49 = vrot.slane %v926_v61, 6  ;;  %v1858_v4 = vld [vmem:[#allocation7 + $0x70] sm:$0xff]  ;;  %v1859_v43 = vld [vmem:[#allocation7 + $0x78] sm:$0xff] }
  0xc6   : > { %10940 = vmatprep.mubr.f32.mxu0 %v14223_v63  ;;  %v1356_v3 = vsel %vm1298_vm2, %v1354_v7, %v1355_v1  ;;  %v1196_v32 = vrot.slane %v926_v61, 7  ;;  %v14233_v12 = vmax.f32 %v298_v44, 0.0  ;;  %v672_v8 = vmax.f32 %v544_v55, %v14165_v6 }
  0xc7   : > { %10941 = vmatmul.mubr.f32.gmra.mrb[22].mxu0 %v14229_v50  ;;  %v1272_v26 = vmax.f32 %v1127_v45, %v1195_v39  ;;  %v1501_v60 = vsel %vm1443_vm3, %v1499_v40, %v1500_v57  ;;  %v1052_v9 = vsel %vm992_vm0, %v1049_v10, %v1051_v49  ;;  %v1358_v53 = vsel %vm1298_vm2, %v1355_v1, %v13794_v30 }
  0xc8   : > { %16740 = vst [vmem:[#allocation51_spill] sm:$0xff] %v14233_v12  ;;  %v1128_v21 = vmax.f32 %v926_v61, %v1052_v9  ;;  %v1197_v7 = vsel %vm1137_vm1, %v1194_v56, %v1196_v32  ;;  %v800_v44 = vmax.f32 %v671_v47, %v14186_v51  ;;  %v801_v59 = vmax.f32 %v672_v8, %v14203_v18 }
  0xc9   : > { %v1433_v55 = vmax.f32 %v1272_v26, %v1356_v3  ;;  %v1503_v39 = vsel %vm1443_vm3, %v1500_v57, %v13796_v31  ;;  %v547_v10 = vmax.f32 %v14098_v2, %v14160_v58  ;;  %v548_v40 = vmax.f32 %v14118_v13, %v14165_v6  ;;  %v299_v2 = vld [vmem:[%s13771_s23 + $0xf0] sm:$0xff]  ;;  %v2454_v13 = vld [vmem:[#allocation7 + $0x100] sm:$0xff] }
  0xca   : > { %v1273_v1 = vmax.f32 %v1128_v21, %v1197_v7  ;;  %v929_v61 = vmax.f32 %v800_v44, %v14205_v17  ;;  %v930_v56 = vmax.f32 %v801_v59, %v14233_v12  ;;  %v12375_v47 = vpack.c.bf16 %v1859_v43, %v1858_v4  ;;  %v300_v21 = vld [vmem:[%s13771_s23 + $0xf8] sm:$0xff] }
  0xcb   : > { %v14252_v45 = vmax.f32 %v1433_v55, %v1501_v60  ;;  %v675_v49 = vmax.f32 %v547_v10, %v14186_v51  ;;  %v676_v3 = vmax.f32 %v548_v40, %v14203_v18  ;;  %v551_v57 = vmax.f32 %v14160_v58, %v14186_v51 }
  0xcc   : > { %v1434_v32 = vmax.f32 %v1273_v1, %v1358_v53  ;;  %v1054_v8 = vrot.slane %v929_v61, 6  ;;  %v1199_v26 = vrot.slane %v929_v61, 7  ;;  %v1359_v9 = vrot.slane %v929_v61, 1  ;;  %12376 = vmatprep.subr.bf16.mxu0 %v12375_v47 }
  0xcd   : > { %10943 = vmatprep.mubr.f32.mxu0 %v14252_v45  ;;  %v1360_v59 = vrot.slane %v930_v56, 1  ;;  %v1504_v4 = vrot.slane %v929_v61, 2  ;;  %v1505_v60 = vrot.slane %v930_v56, 2  ;;  %v1056_v43 = vrot.slane %v930_v56, 6  ;;  %12378 = vmatpush3.bf16.msra.mxu0 %v12375_v47 }
  0xce   : > { %v14261_v7 = vmax.f32 %v1434_v32, %v1503_v39  ;;  %v1055_v44 = vsel %vm992_vm0, %v13783_v23, %v1054_v8  ;;  %v1200_v53 = vsel %vm1137_vm1, %v13785_v24, %v1199_v26  ;;  %v1201_v55 = vrot.slane %v930_v56, 7 }
  0xcf   : > { %v1129_v10 = vmax.f32 %v929_v61, %v1055_v44  ;;  %v1057_v40 = vsel %vm992_vm0, %v1054_v8, %v1056_v43  ;;  %v14268_v1 = vmax.f32 %v299_v2, 0.0  ;;  %v14270_v58 = vmax.f32 %v300_v21, 0.0 }
  0xd0   : > { %10944 = vmatmul.mubr.f32.gmra.mrb[24].mxu0 %v14261_v7  ;;  %v1361_v39 = vsel %vm1298_vm2, %v1359_v9, %v1360_v59  ;;  %v1130_v47 = vmax.f32 %v930_v56, %v1057_v40  ;;  %v1202_v32 = vsel %vm1137_vm1, %v1199_v26, %v1201_v55  ;;  %v1363_v46 = vsel %vm1298_vm2, %v1360_v59, %v13794_v30 }
  0xd1   : > { %16741 = vst [vmem:[#allocation52_spill] sm:$0xff] %v14268_v1  ;;  %16742 = vst [vmem:[#allocation53_spill] sm:$0xff] %v14270_v58  ;;  %v1274_v38 = vmax.f32 %v1129_v10, %v1200_v53  ;;  %v804_v61 = vmax.f32 %v675_v49, %v14205_v17  ;;  %v805_v2 = vmax.f32 %v676_v3, %v14233_v12 }
  0xd2   : > { %v552_v8 = vmax.f32 %v14165_v6, %v14203_v18  ;;  %v1506_v21 = vsel %vm1443_vm3, %v1504_v4, %v1505_v60  ;;  %v1275_v43 = vmax.f32 %v1130_v47, %v1202_v32  ;;  %v679_v44 = vmax.f32 %v551_v57, %v14205_v17 }
  0xd3   : > { %v14283_v9 = vpack.c.bf16 %v2455_v42, %v2454_v13  ;;  %v1435_v56 = vmax.f32 %v1274_v38, %v1361_v39  ;;  %v1508_v26 = vsel %vm1443_vm3, %v1505_v60, %v13796_v31  ;;  %v933_v59 = vmax.f32 %v804_v61, %v14268_v1 }
  0xd4   : > { %v934_v49 = vmax.f32 %v805_v2, %v14270_v58  ;;  %v1436_v53 = vmax.f32 %v1275_v43, %v1363_v46  ;;  %v680_v3 = vmax.f32 %v552_v8, %v14233_v12  ;;  %v808_v55 = vmax.f32 %v679_v44, %v14268_v1 }
  0xd5   : > { %12380 = vmatprep.subr.bf16.mxu0 %v14283_v9  ;;  %v14292_v4 = vmax.f32 %v1435_v56, %v1506_v21  ;;  %v1059_v57 = vrot.slane %v933_v59, 6  ;;  %v1204_v42 = vrot.slane %v933_v59, 7  ;;  %v1364_v13 = vrot.slane %v933_v59, 1 }
  0xd6   : > { %v14294_v38 = vmax.f32 %v1436_v53, %v1508_v26  ;;  %v1365_v10 = vrot.slane %v934_v49, 1  ;;  %v1509_v60 = vrot.slane %v933_v59, 2  ;;  %v1510_v40 = vrot.slane %v934_v49, 2 }
  0xd7   : > { %10946 = vmatprep.mubr.f32.mxu0 %v14292_v4  ;;  %v1060_v46 = vsel %vm992_vm0, %v13783_v23, %v1059_v57  ;;  %v1205_v39 = vsel %vm1137_vm1, %v13785_v24, %v1204_v42  ;;  %v1061_v47 = vrot.slane %v934_v49, 6  ;;  %v1206_v32 = vrot.slane %v934_v49, 7 }
  0xd8   : > { %16743 = vst [vmem:[#allocation54_spill] sm:$0xff] %v14294_v38  ;;  %10947 = vmatmul.mubr.f32.gmra.mrb[26].mxu0 %v14294_v38  ;;  %v1131_v61 = vmax.f32 %v933_v59, %v1060_v46  ;;  %v1366_v2 = vsel %vm1298_vm2, %v1364_v13, %v1365_v10  ;;  %v809_v43 = vmax.f32 %v680_v3, %v14270_v58  ;;  %v937_v26 = vmax.f32 %v808_v55, -3e+38 }
  0xd9   : > { %v1062_v8 = vsel %vm992_vm0, %v1059_v57, %v1061_v47  ;;  %v1207_v21 = vsel %vm1137_vm1, %v1204_v42, %v1206_v32  ;;  %v1511_v53 = vsel %vm1443_vm3, %v1509_v60, %v1510_v40  ;;  %v1368_v6 = vsel %vm1298_vm2, %v1365_v10, %v13794_v30 }
  0xda   : > { %v1276_v44 = vmax.f32 %v1131_v61, %v1205_v39  ;;  %v1132_v56 = vmax.f32 %v934_v49, %v1062_v8  ;;  %v1513_v41 = vsel %vm1443_vm3, %v1510_v40, %v13796_v31  ;;  %v938_v59 = vmax.f32 %v809_v43, -3e+38 }
  0xdb   : > { %v1064_v36 = vrot.slane %v937_v26, 6  ;;  %v1209_v57 = vrot.slane %v937_v26, 7  ;;  %v1369_v47 = vrot.slane %v937_v26, 1  ;;  %v1514_v32 = vrot.slane %v937_v26, 2 }
  0xdc   : > { %v1437_v46 = vmax.f32 %v1276_v44, %v1366_v2  ;;  %v1277_v13 = vmax.f32 %v1132_v56, %v1207_v21  ;;  %v1370_v42 = vrot.slane %v938_v59, 1  ;;  %v1515_v3 = vrot.slane %v938_v59, 2 }
  0xdd   : > { %v1065_v55 = vsel %vm992_vm0, %v13783_v23, %v1064_v36  ;;  %v1210_v10 = vsel %vm1137_vm1, %v13785_v24, %v1209_v57  ;;  %v1066_v40 = vrot.slane %v938_v59, 6  ;;  %v1211_v8 = vrot.slane %v938_v59, 7  ;;  %v2952_v24 = vld [vmem:[#allocation7 + $0x188] sm:$0xff] }
  0xde   : > { %v14311_v39 = vmax.f32 %v1437_v46, %v1511_v53  ;;  %v1438_v49 = vmax.f32 %v1277_v13, %v1368_v6  ;;  %v1133_v60 = vmax.f32 %v937_v26, %v1065_v55  ;;  %v1371_v2 = vsel %vm1298_vm2, %v1369_v47, %v1370_v42  ;;  %v2457_v55 = vld [vmem:[#allocation7 + $0x118] sm:$0xff] }
  0xdf   : > { %v1067_v43 = vsel %vm992_vm0, %v1064_v36, %v1066_v40  ;;  %v1516_v6 = vsel %vm1443_vm3, %v1514_v32, %v1515_v3  ;;  %v1212_v56 = vsel %vm1137_vm1, %v1209_v57, %v1211_v8  ;;  %v1373_v26 = vsel %vm1298_vm2, %v1370_v42, %v13794_v30  ;;  %v2456_v57 = vld [vmem:[#allocation7 + $0x110] sm:$0xff]  ;;  %v2458_v40 = vld [vmem:[#allocation7 + $0x120] sm:$0xff] }
  0xe0   : > { %16744 = vst [vmem:[#allocation55_spill] sm:$0xff] %v14311_v39  ;;  %10949 = vmatprep.mubr.f32.mxu0 %v14311_v39  ;;  %v14318_v61 = vmax.f32 %v1438_v49, %v1513_v41  ;;  %v1278_v21 = vmax.f32 %v1133_v60, %v1210_v10  ;;  %v1134_v44 = vmax.f32 %v938_v59, %v1067_v43  ;;  %v16747_v49 = vmov 0.0  }
  0xe1   : > { %v1518_v13 = vsel %vm1443_vm3, %v1515_v3, %v13796_v31  ;;  %v14332_v36 = vrot.slane %v16747_v49, 7  ;;  %v1738_v59 = vrot.slane %v13893_v5, 7  ;;  %v1740_v42 = vrot.slane %v13908_v35, 7  ;;  %v2469_v31 = vld [vmem:[#allocation7 + $0x178] sm:$0xff] }
  0xe2   : > { %16745 = vst [vmem:[#allocation56_spill] sm:$0xff] %v14318_v61  ;;  %10950 = vmatmul.mubr.f32.gmra.mrb[28].mxu0 %v14318_v61  ;;  %v1439_v53 = vmax.f32 %v1278_v21, %v1371_v2  ;;  %v1279_v46 = vmax.f32 %v1134_v44, %v1212_v56  ;;  %v1743_v10 = vrot.slane %v13914_v54, 7  ;;  %v12383_v60 = vpack.c.bf16 %v2457_v55, %v2456_v57  ;;  %v2459_v2 = vld [vmem:[#allocation7 + $0x128] sm:$0xff]  ;;  %v2460_v56 = vld [vmem:[#allocation7 + $0x130] sm:$0xff] }
  0xe3   : > { %16748 = vst [vmem:[#allocation58_spill] sm:$0xff] %v14332_v36  ;;  %v14343_v3 = vsel %vm1137_vm1, %v14332_v36, %v1738_v59  ;;  %v14350_v8 = vsel %vm1137_vm1, %v1738_v59, %v1740_v42  ;;  %v1745_v21 = vrot.slane %v13927_v62, 7  ;;  %v12387_v44 = vpack.c.bf16 %v2459_v2, %v2458_v40  ;;  %v2462_v59 = vld [vmem:[#allocation7 + $0x140] sm:$0xff]  ;;  %v2463_v57 = vld [vmem:[#allocation7 + $0x148] sm:$0xff]  ;;  %v2464_v2 = vld [vmem:[#allocation7 + $0x150] sm:$0xff] }
  0xe4   : > { %v14327_v41 = vmax.f32 %v1439_v53, %v1516_v6  ;;  %v1440_v47 = vmax.f32 %v1279_v46, %v1373_v26  ;;  %v14355_v43 = vsel %vm1137_vm1, %v14332_v36, %v1743_v10  ;;  %v1748_v6 = vrot.slane %v13948_v11, 7  ;;  %v2461_v53 = vld [vmem:[#allocation7 + $0x138] sm:$0xff] }
  0xe5   : > { %v1750_v26 = vrot.slane %v13952_v25, 7  ;;  %v1755_v42 = vrot.slane %v13993_v19, 7  ;;  %v12395_v40 = vpack.c.bf16 %v2463_v57, %v2462_v59  ;;  %v2466_v59 = vld [vmem:[#allocation7 + $0x160] sm:$0xff]  ;;  %v2467_v57 = vld [vmem:[#allocation7 + $0x168] sm:$0xff]  ;;  %v1773_v30 = vrot.slane %v14122_v28, 7 }
  0xe6   : > { %16746 = vst [vmem:[#allocation57_spill] sm:$0xff] %v14327_v41  ;;  %10952 = vmatprep.mubr.f32.mxu0 %v14327_v41  ;;  %v14335_v32 = vmax.f32 %v1440_v47, %v1518_v13  ;;  %v14366_v46 = vsel %vm1137_vm1, %v14332_v36, %v1748_v6  ;;  %v1753_v13 = vrot.slane %v13982_v15, 7  ;;  %v12391_v47 = vpack.c.bf16 %v2461_v53, %v2460_v56 }
  0xe7   : > { %v14372_v55 = vsel %vm1137_vm1, %v1748_v6, %v1750_v26  ;;  %v1760_v56 = vrot.slane %v14032_v48, 7  ;;  %v1763_v53 = vrot.slane %v14053_v27, 7  ;;  %v1778_v23 = vrot.slane %v14157_v20, 7 }
  0xe8   : > { %16749 = vst [vmem:[#allocation59_spill] sm:$0xff] %v14335_v32  ;;  %10953 = vmatmul.mubr.f32.gmra.mrb[30].mxu0 %v14335_v32  ;;  %v14383_v6 = vsel %vm1137_vm1, %v1753_v13, %v1755_v42  ;;  %v1765_v42 = vrot.slane %v14058_v33, 7 }
  0xe9   : > { %10987 = vmatprep.mubr.f32.mxu0 %v14332_v36 }
  0xec   : > { %10988 = vmatmul.mubr.f32.vlgmr.msra.gmra.mrb[0].mxu0 %v14332_v36 }
  0xed   : > { %12382 = vmatpush3.bf16.msra.mxu0 %v14283_v9  ;;  %10990 = vmatprep.mubr.f32.mxu0 %v14343_v3  ;;  %v14361_v9 = vsel %vm1137_vm1, %v1743_v10, %v1745_v21  ;;  %v14377_v10 = vsel %vm1137_vm1, %v14332_v36, %v1753_v13  ;;  %v2465_v21 = vld [vmem:[#allocation7 + $0x158] sm:$0xff] }
  0xee   : > { %12384 = vmatprep.subr.bf16.mxu0 %v12383_v60  ;;  %v12399_v26 = vpack.c.bf16 %v2465_v21, %v2464_v2  ;;  %v12403_v2 = vpack.c.bf16 %v2467_v57, %v2466_v59  ;;  %v2468_v21 = vld [vmem:[#allocation7 + $0x170] sm:$0xff]  ;;  %v2951_v57 = vld [vmem:[#allocation7 + $0x180] sm:$0xff] }
  0xef   : > { %v12407_v59 = vpack.c.bf16 %v2469_v31, %v2468_v21  ;;  %v12411_v31 = vpack.c.bf16 %v2952_v24, %v2951_v57 }
  0xf0   : > { %10991 = vmatmul.mubr.f32.gmra.mrb[2].mxu0 %v14350_v8 }
  0xf1   : > { %10993 = vmatprep.mubr.f32.mxu0 %v14355_v43  ;;  %12386 = vmatpush3.bf16.msra.mxu0 %v12383_v60  ;;  %v1758_v60 = vrot.slane %v14027_v29, 7 }
  0xf2   : > { %12388 = vmatprep.subr.bf16.mxu0 %v12387_v44 }
  0xf3   : > { %v14394_v13 = vsel %vm1137_vm1, %v1758_v60, %v1760_v56  ;;  %v1770_v56 = vrot.slane %v14094_v16, 7 }
  0xf4   : > { %10994 = vmatmul.mubr.f32.gmra.mrb[4].mxu0 %v14361_v9  ;;  %16750 = vst [vmem:[#allocation60_spill] sm:$0xff] %v14394_v13 }
  0xf5   : > { %10996 = vmatprep.mubr.f32.mxu0 %v14366_v46  ;;  %12390 = vmatpush3.bf16.msra.mxu0 %v12387_v44  ;;  %v14388_v44 = vsel %vm1137_vm1, %v14332_v36, %v1758_v60  ;;  %v14405_v60 = vsel %vm1137_vm1, %v1763_v53, %v1765_v42  ;;  %v1775_v42 = vrot.slane %v14133_v0, 7 }
  0xf6   : > { %12392 = vmatprep.subr.bf16.mxu0 %v12391_v47  ;;  %16752 = vst [vmem:[#allocation62_spill] sm:$0xff] %v14405_v60 }
  0xf7   : > { %v14427_v21 = vsel %vm1137_vm1, %v1773_v30, %v1775_v42 }
  0xf8   : > { %10997 = vmatmul.mubr.f32.gmra.mrb[6].mxu0 %v14372_v55  ;;  %16756 = vst [vmem:[#allocation66_spill] sm:$0xff] %v14427_v21 }
  0xf9   : > { %10999 = vmatprep.mubr.f32.mxu0 %v14377_v10  ;;  %12394 = vmatpush3.bf16.msra.mxu0 %v12391_v47  ;;  %v14399_v47 = vsel %vm1137_vm1, %v14332_v36, %v1763_v53  ;;  %v14416_v53 = vsel %vm1137_vm1, %v1768_v37, %v1770_v56  ;;  %v1783_v56 = vrot.slane %v14183_v22, 7 }
  0xfa   : > { %12396 = vmatprep.subr.bf16.mxu0 %v12395_v40  ;;  %16751 = vst [vmem:[#allocation61_spill] sm:$0xff] %v14399_v47  ;;  %16754 = vst [vmem:[#allocation64_spill] sm:$0xff] %v14416_v53 }
  0xfb   : > { %v14443_v57 = vsel %vm1137_vm1, %v14332_v36, %v1783_v56 }
  0xfc   : > { %11000 = vmatmul.mubr.f32.gmra.mrb[8].mxu0 %v14383_v6  ;;  %16759 = vst [vmem:[#allocation69_spill] sm:$0xff] %v14443_v57 }
  0xfd   : > { %11002 = vmatprep.mubr.f32.mxu0 %v14388_v44  ;;  %12398 = vmatpush3.bf16.msra.mxu0 %v12395_v40  ;;  %v14410_v40 = vsel %vm1137_vm1, %v14332_v36, %v1768_v37  ;;  %v1780_v37 = vrot.slane %v14162_v14, 7 }
  0xfe   : > { %12400 = vmatprep.subr.bf16.mxu0 %v12399_v26  ;;  %16753 = vst [vmem:[#allocation63_spill] sm:$0xff] %v14410_v40 }
  0xff   : > { %v14438_v24 = vsel %vm1137_vm1, %v1778_v23, %v1780_v37  ;;  %v1793_v37 = vrot.slane %v14252_v45, 7 }
 0x100   : > { %11003 = vmatmul.mubr.f32.gmra.mrb[10].mxu0 %v14394_v13  ;;  %16758 = vst [vmem:[#allocation68_spill] sm:$0xff] %v14438_v24 }
 0x101   : > { %11005 = vmatprep.mubr.f32.mxu0 %v14399_v47  ;;  %12402 = vmatpush3.bf16.msra.mxu0 %v12399_v26  ;;  %v14421_v26 = vsel %vm1137_vm1, %v14332_v36, %v1773_v30  ;;  %v1785_v30 = vrot.slane %v14194_v34, 7 }
 0x102   : > { %12404 = vmatprep.subr.bf16.mxu0 %v12403_v2  ;;  %16755 = vst [vmem:[#allocation65_spill] sm:$0xff] %v14421_v26 }
 0x103   : > { %v14449_v42 = vsel %vm1137_vm1, %v1783_v56, %v1785_v30  ;;  %v14465_v56 = vsel %vm1137_vm1, %v14332_v36, %v1793_v37  ;;  %v1798_v30 = vrot.slane %v14292_v4, 7 }
 0x104   : > { %11006 = vmatmul.mubr.f32.gmra.mrb[12].mxu0 %v14405_v60  ;;  %16760 = vst [vmem:[#allocation70_spill] sm:$0xff] %v14449_v42  ;;  %16763 = vst [vmem:[#allocation73_spill] sm:$0xff] %v14465_v56 }
 0x105   : > { %11008 = vmatprep.mubr.f32.mxu0 %v14410_v40  ;;  %12406 = vmatpush3.bf16.msra.mxu0 %v12403_v2  ;;  %v14432_v2 = vsel %vm1137_vm1, %v14332_v36, %v1778_v23 }
 0x106   : > { %12408 = vmatprep.subr.bf16.mxu0 %v12407_v59  ;;  %16757 = vst [vmem:[#allocation67_spill] sm:$0xff] %v14432_v2 }
 0x108   : > { %11009 = vmatmul.mubr.f32.gmra.mrb[14].mxu0 %v14416_v53 }
 0x109   : > { %11011 = vmatprep.mubr.f32.mxu0 %v14421_v26  ;;  %12410 = vmatpush3.bf16.msra.mxu0 %v12407_v59  ;;  %v1788_v59 = vrot.slane %v14223_v63, 7 }
 0x10a   : > { %12412 = vmatprep.subr.bf16.mxu0 %v12411_v31 }
 0x10b   : > { %v14454_v23 = vsel %vm1137_vm1, %v14332_v36, %v1788_v59 }
 0x10c   : > { %11012 = vmatmul.mubr.f32.gmra.mrb[16].mxu0 %v14427_v21  ;;  %16761 = vst [vmem:[#allocation71_spill] sm:$0xff] %v14454_v23 }
 0x10d   : > { %11014 = vmatprep.mubr.f32.mxu0 %v14432_v2  ;;  %v1790_v2 = vrot.slane %v14229_v50, 7 }
 0x10f   : > { %v14460_v21 = vsel %vm1137_vm1, %v1788_v59, %v1790_v2  ;;  %v14476_v2 = vsel %vm1137_vm1, %v14332_v36, %v1798_v30  ;;  %v1803_v59 = vrot.slane %v14311_v39, 7 }
 0x110   : > { %11015 = vmatmul.mubr.f32.gmra.mrb[18].mxu0 %v14438_v24  ;;  %16762 = vst [vmem:[#allocation72_spill] sm:$0xff] %v14460_v21  ;;  %16765 = vst [vmem:[#allocation75_spill] sm:$0xff] %v14476_v2 }
 0x111   : > { %11017 = vmatprep.mubr.f32.mxu0 %v14443_v57  ;;  %v1795_v57 = vrot.slane %v14261_v7, 7 }
 0x113   : > { %v14471_v24 = vsel %vm1137_vm1, %v1793_v37, %v1795_v57  ;;  %v14487_v57 = vsel %vm1137_vm1, %v14332_v36, %v1803_v59  ;;  %v1808_v37 = vrot.slane %v14327_v41, 7 }
 0x114   : > { %11018 = vmatmul.mubr.f32.gmra.mrb[20].mxu0 %v14449_v42  ;;  %16764 = vst [vmem:[#allocation74_spill] sm:$0xff] %v14471_v24  ;;  %16767 = vst [vmem:[#allocation77_spill] sm:$0xff] %v14487_v57 }
 0x115   : > { %11020 = vmatprep.mubr.f32.mxu0 %v14454_v23  ;;  %v1800_v23 = vrot.slane %v14294_v38, 7 }
 0x117   : > { %v14482_v42 = vsel %vm1137_vm1, %v1798_v30, %v1800_v23  ;;  %v14498_v23 = vsel %vm1137_vm1, %v14332_v36, %v1808_v37  ;;  %v14502_v30 = vrot.slane %v16747_v49, 1  ;;  %v2352_v49 = vrot.slane %v13914_v54, 1  ;;  %v2958_v54 = vld [vmem:[#allocation7 + $0x1b8] sm:$0xff] }
 0x118   : > { %11021 = vmatmul.mubr.f32.gmra.mrb[22].mxu0 %v14460_v21  ;;  %16766 = vst [vmem:[#allocation76_spill] sm:$0xff] %v14482_v42  ;;  %16769 = vst [vmem:[#allocation79_spill] sm:$0xff] %v14498_v23 }
 0x119   : > { %11023 = vmatprep.mubr.f32.mxu0 %v14465_v56  ;;  %v1805_v56 = vrot.slane %v14318_v61, 7  ;;  %16770 = vst [vmem:[#allocation80_spill] sm:$0xff] %v14502_v30 }
 0x11b   : > { %v14493_v21 = vsel %vm1137_vm1, %v1803_v59, %v1805_v56  ;;  %v2348_v56 = vrot.slane %v13908_v35, 1  ;;  %v2953_v59 = vld [vmem:[#allocation7 + $0x190] sm:$0xff] }
 0x11c   : > { %11024 = vmatmul.mubr.f32.gmra.mrb[24].mxu0 %v14471_v24  ;;  %16768 = vst [vmem:[#allocation78_spill] sm:$0xff] %v14493_v21  ;;  %v2954_v24 = vld [vmem:[#allocation7 + $0x198] sm:$0xff] }
 0x11d   : > { %11026 = vmatprep.mubr.f32.mxu0 %v14476_v2  ;;  %v1810_v2 = vrot.slane %v14335_v32, 7  ;;  %v14521_v35 = vsel %vm1298_vm2, %v2348_v56, %v14502_v30 }
 0x11e   : > { %16773 = vst [vmem:[#allocation83_spill] sm:$0xff] %v14521_v35 }
 0x120   : > { %11027 = vmatmul.mubr.f32.gmra.mrb[26].mxu0 %v14482_v42  ;;  %v14506_v42 = vsel %vm1137_vm1, %v1808_v37, %v1810_v2  ;;  %v2955_v2 = vld [vmem:[#allocation7 + $0x1a0] sm:$0xff]  ;;  %v2956_v37 = vld [vmem:[#allocation7 + $0x1a8] sm:$0xff] }
 0x121   : > { %11029 = vmatprep.mubr.f32.mxu0 %v14487_v57  ;;  %16771 = vst [vmem:[#allocation81_spill] sm:$0xff] %v14506_v42  ;;  %v2347_v57 = vrot.slane %v13893_v5, 1 }
 0x123   : > { %v14513_v36 = vsel %vm1298_vm2, %v2347_v57, %v2348_v56  ;;  %v2357_v57 = vrot.slane %v13948_v11, 1  ;;  %v2362_v56 = vrot.slane %v13982_v15, 1 }
 0x124   : > { %11030 = vmatmul.mubr.f32.gmra.mrb[28].mxu0 %v14493_v21  ;;  %16772 = vst [vmem:[#allocation82_spill] sm:$0xff] %v14513_v36  ;;  %v12415_v21 = vpack.c.bf16 %v2954_v24, %v2953_v59  ;;  %v12419_v24 = vpack.c.bf16 %v2956_v37, %v2955_v2  ;;  %v2957_v59 = vld [vmem:[#allocation7 + $0x1b0] sm:$0xff]  ;;  %v2959_v37 = vld [vmem:[#allocation7 + $0x1c0] sm:$0xff] }
 0x125   : > { %11032 = vmatprep.mubr.f32.mxu0 %v14498_v23  ;;  %v2353_v23 = vrot.slane %v13927_v62, 1  ;;  %v2358_v62 = vrot.slane %v13952_v25, 1  ;;  %v12423_v2 = vpack.c.bf16 %v2958_v54, %v2957_v59  ;;  %v2960_v25 = vld [vmem:[#allocation7 + $0x1c8] sm:$0xff]  ;;  %v2961_v59 = vld [vmem:[#allocation7 + $0x1d0] sm:$0xff] }
 0x126   : > { %v12427_v54 = vpack.c.bf16 %v2960_v25, %v2959_v37  ;;  %v2963_v37 = vld [vmem:[#allocation7 + $0x1e0] sm:$0xff] }
 0x127   : > { %v14524_v5 = vsel %vm1298_vm2, %v2352_v49, %v2353_v23  ;;  %v14535_v49 = vsel %vm1298_vm2, %v2357_v57, %v2358_v62  ;;  %v2367_v57 = vrot.slane %v14027_v29, 1 }
 0x128   : > { %11033 = vmatmul.mubr.f32.gmra.mrb[30].mxu0 %v14506_v42  ;;  %16774 = vst [vmem:[#allocation84_spill] sm:$0xff] %v14524_v5  ;;  %16776 = vst [vmem:[#allocation86_spill] sm:$0xff] %v14535_v49 }
 0x129   : > { %11067 = vmatprep.mubr.f32.mxu0 %v14502_v30 }
 0x12c   : > { %11068 = vmatmul.mubr.f32.vlgmr.msra.gmra.mrb[0].mxu0 %v14502_v30 }
 0x12d   : > { %12414 = vmatpush3.bf16.msra.mxu0 %v12411_v31  ;;  %11070 = vmatprep.mubr.f32.mxu0 %v14513_v36  ;;  %v14532_v31 = vsel %vm1298_vm2, %v2353_v23, %v14502_v30  ;;  %v2363_v36 = vrot.slane %v13993_v19, 1  ;;  %v14543_v23 = vsel %vm1298_vm2, %v2358_v62, %v14502_v30 }
 0x12e   : > { %12416 = vmatprep.subr.bf16.mxu0 %v12415_v21  ;;  %16775 = vst [vmem:[#allocation85_spill] sm:$0xff] %v14532_v31  ;;  %16777 = vst [vmem:[#allocation87_spill] sm:$0xff] %v14543_v23 }
 0x12f   : > { %v14554_v62 = vsel %vm1298_vm2, %v2363_v36, %v14502_v30 }
 0x130   : > { %11071 = vmatmul.mubr.f32.gmra.mrb[2].mxu0 %v14521_v35  ;;  %v2962_v35 = vld [vmem:[#allocation7 + $0x1d8] sm:$0xff]  ;;  %16779 = vst [vmem:[#allocation89_spill] sm:$0xff] %v14554_v62 }
 0x131   : > { %11073 = vmatprep.mubr.f32.mxu0 %v14524_v5  ;;  %12418 = vmatpush3.bf16.msra.mxu0 %v12415_v21  ;;  %v14546_v21 = vsel %vm1298_vm2, %v2362_v56, %v2363_v36  ;;  %v2368_v5 = vrot.slane %v14032_v48, 1  ;;  %v2372_v56 = vrot.slane %v14053_v27, 1  ;;  %v12431_v25 = vpack.c.bf16 %v2962_v35, %v2961_v59  ;;  %v2965_v59 = vld [vmem:[#allocation7 + $0x1f0] sm:$0xff] }
 0x132   : > { %12420 = vmatprep.subr.bf16.mxu0 %v12419_v24  ;;  %16778 = vst [vmem:[#allocation88_spill] sm:$0xff] %v14546_v21 }
 0x133   : > { %v14565_v36 = vsel %vm1298_vm2, %v2368_v5, %v14502_v30 }
 0x134   : > { %11074 = vmatmul.mubr.f32.gmra.mrb[4].mxu0 %v14532_v31  ;;  %v2964_v31 = vld [vmem:[#allocation7 + $0x1e8] sm:$0xff] }
 0x135   : > { %11076 = vmatprep.mubr.f32.mxu0 %v14535_v49  ;;  %12422 = vmatpush3.bf16.msra.mxu0 %v12419_v24  ;;  %v14557_v24 = vsel %vm1298_vm2, %v2367_v57, %v2368_v5  ;;  %v2373_v49 = vrot.slane %v14058_v33, 1  ;;  %v2377_v57 = vrot.slane %v14087_v52, 1  ;;  %v12435_v35 = vpack.c.bf16 %v2964_v31, %v2963_v37  ;;  %v3224_v37 = vld [vmem:[#allocation7 + $0x200] sm:$0xff] }
 0x136   : > { %12424 = vmatprep.subr.bf16.mxu0 %v12423_v2  ;;  %16780 = vst [vmem:[#allocation90_spill] sm:$0xff] %v14557_v24 }
 0x137   : > { %v14576_v5 = vsel %vm1298_vm2, %v2373_v49, %v14502_v30 }
 0x138   : > { %11077 = vmatmul.mubr.f32.gmra.mrb[6].mxu0 %v14543_v23  ;;  %v2966_v23 = vld [vmem:[#allocation7 + $0x1f8] sm:$0xff] }
 0x139   : > { %11079 = vmatprep.mubr.f32.mxu0 %v14546_v21  ;;  %12426 = vmatpush3.bf16.msra.mxu0 %v12423_v2  ;;  %v14568_v2 = vsel %vm1298_vm2, %v2372_v56, %v2373_v49  ;;  %v2378_v21 = vrot.slane %v14094_v16, 1  ;;  %v2382_v56 = vrot.slane %v14122_v28, 1  ;;  %v12439_v31 = vpack.c.bf16 %v2966_v23, %v2965_v59 }
 0x13a   : > { %12428 = vmatprep.subr.bf16.mxu0 %v12427_v54  ;;  %16781 = vst [vmem:[#allocation91_spill] sm:$0xff] %v14568_v2 }
 0x13b   : > { %v14587_v49 = vsel %vm1298_vm2, %v2378_v21, %v14502_v30 }
 0x13c   : > { %11080 = vmatmul.mubr.f32.gmra.mrb[8].mxu0 %v14554_v62  ;;  %v3225_v62 = vld [vmem:[#allocation7 + $0x208] sm:$0xff]  ;;  %16782 = vst [vmem:[#allocation92_spill] sm:$0xff] %v14587_v49 }
 0x13d   : > { %11082 = vmatprep.mubr.f32.mxu0 %v14557_v24  ;;  %12430 = vmatpush3.bf16.msra.mxu0 %v12427_v54  ;;  %v14579_v54 = vsel %vm1298_vm2, %v2377_v57, %v2378_v21  ;;  %v2383_v24 = vrot.slane %v14133_v0, 1  ;;  %v2387_v57 = vrot.slane %v14157_v20, 1  ;;  %v12443_v23 = vpack.c.bf16 %v3225_v62, %v3224_v37 }
 0x13e   : > { %12432 = vmatprep.subr.bf16.mxu0 %v12431_v25  ;;  %v2398_v37 = vrot.slane %v14229_v50, 1 }
 0x13f   : > { %v14598_v59 = vsel %vm1298_vm2, %v2383_v24, %v14502_v30 }
 0x140   : > { %11083 = vmatmul.mubr.f32.gmra.mrb[10].mxu0 %v14565_v36  ;;  %16784 = vst [vmem:[#allocation94_spill] sm:$0xff] %v14598_v59 }
 0x141   : > { %11085 = vmatprep.mubr.f32.mxu0 %v14568_v2  ;;  %12434 = vmatpush3.bf16.msra.mxu0 %v12431_v25  ;;  %v14590_v25 = vsel %vm1298_vm2, %v2382_v56, %v2383_v24  ;;  %v2388_v2 = vrot.slane %v14162_v14, 1  ;;  %v2393_v56 = vrot.slane %v14194_v34, 1 }
 0x142   : > { %12436 = vmatprep.subr.bf16.mxu0 %v12435_v35  ;;  %16783 = vst [vmem:[#allocation93_spill] sm:$0xff] %v14590_v25 }
 0x143   : > { %v14601_v21 = vsel %vm1298_vm2, %v2387_v57, %v2388_v2  ;;  %v14609_v62 = vsel %vm1298_vm2, %v2388_v2, %v14502_v30  ;;  %v14620_v57 = vsel %vm1298_vm2, %v2393_v56, %v14502_v30  ;;  %v2402_v2 = vrot.slane %v14252_v45, 1 }
 0x144   : > { %11086 = vmatmul.mubr.f32.gmra.mrb[12].mxu0 %v14576_v5  ;;  %16785 = vst [vmem:[#allocation95_spill] sm:$0xff] %v14601_v21  ;;  %16786 = vst [vmem:[#allocation96_spill] sm:$0xff] %v14609_v62 }
 0x145   : > { %11088 = vmatprep.mubr.f32.mxu0 %v14579_v54  ;;  %12438 = vmatpush3.bf16.msra.mxu0 %v12435_v35  ;;  %v2392_v35 = vrot.slane %v14183_v22, 1  ;;  %16788 = vst [vmem:[#allocation98_spill] sm:$0xff] %v14620_v57 }
 0x146   : > { %12440 = vmatprep.subr.bf16.mxu0 %v12439_v31 }
 0x147   : > { %v14612_v24 = vsel %vm1298_vm2, %v2392_v35, %v2393_v56  ;;  %v2403_v35 = vrot.slane %v14261_v7, 1  ;;  %v2407_v56 = vrot.slane %v14292_v4, 1 }
 0x148   : > { %11089 = vmatmul.mubr.f32.gmra.mrb[14].mxu0 %v14587_v49  ;;  %16787 = vst [vmem:[#allocation97_spill] sm:$0xff] %v14612_v24 }
 0x149   : > { %11091 = vmatprep.mubr.f32.mxu0 %v14590_v25  ;;  %12442 = vmatpush3.bf16.msra.mxu0 %v12439_v31  ;;  %v2397_v31 = vrot.slane %v14223_v63, 1 }
 0x14a   : > { %12444 = vmatprep.subr.bf16.mxu0 %v12443_v23 }
 0x14c   : > { %11092 = vmatmul.mubr.f32.gmra.mrb[16].mxu0 %v14598_v59  ;;  %v3227_v59 = vld [vmem:[#allocation7 + $0x218] sm:$0xff] }
 0x14d   : > { %11094 = vmatprep.mubr.f32.mxu0 %v14601_v21  ;;  %v14623_v21 = vsel %vm1298_vm2, %v2397_v31, %v2398_v37  ;;  %v2408_v31 = vrot.slane %v14294_v38, 1 }
 0x14e   : > { %16789 = vst [vmem:[#allocation99_spill] sm:$0xff] %v14623_v21 }
 0x150   : > { %11095 = vmatmul.mubr.f32.gmra.mrb[18].mxu0 %v14609_v62  ;;  %v14631_v62 = vsel %vm1298_vm2, %v2398_v37, %v14502_v30  ;;  %v2412_v37 = vrot.slane %v14311_v39, 1 }
 0x151   : > { %11097 = vmatprep.mubr.f32.mxu0 %v14612_v24  ;;  %16790 = vst [vmem:[#allocation100_spill] sm:$0xff] %v14631_v62  ;;  %v14634_v24 = vsel %vm1298_vm2, %v2402_v2, %v2403_v35  ;;  %v2413_v2 = vrot.slane %v14318_v61, 1 }
 0x152   : > { %16791 = vst [vmem:[#allocation101_spill] sm:$0xff] %v14634_v24 }
 0x154   : > { %11098 = vmatmul.mubr.f32.gmra.mrb[20].mxu0 %v14620_v57  ;;  %v14642_v57 = vsel %vm1298_vm2, %v2403_v35, %v14502_v30  ;;  %v2417_v35 = vrot.slane %v14327_v41, 1 }
 0x155   : > { %11100 = vmatprep.mubr.f32.mxu0 %v14623_v21  ;;  %16792 = vst [vmem:[#allocation102_spill] sm:$0xff] %v14642_v57  ;;  %v14645_v21 = vsel %vm1298_vm2, %v2407_v56, %v2408_v31  ;;  %v2418_v56 = vrot.slane %v14335_v32, 1 }
 0x156   : > { %16793 = vst [vmem:[#allocation103_spill] sm:$0xff] %v14645_v21 }
 0x158   : > { %11101 = vmatmul.mubr.f32.gmra.mrb[22].mxu0 %v14631_v62  ;;  %v14653_v62 = vsel %vm1298_vm2, %v2408_v31, %v14502_v30  ;;  %v14673_v31 = vsel %vm1298_vm2, %v2418_v56, %v14502_v30 }
 0x159   : > { %11103 = vmatprep.mubr.f32.mxu0 %v14634_v24  ;;  %16794 = vst [vmem:[#allocation104_spill] sm:$0xff] %v14653_v62  ;;  %v14656_v24 = vsel %vm1298_vm2, %v2412_v37, %v2413_v2  ;;  %16798 = vst [vmem:[#allocation108_spill] sm:$0xff] %v14673_v31  ;;  %v3226_v37 = vld [vmem:[#allocation7 + $0x210] sm:$0xff] }
 0x15a   : > { %16795 = vst [vmem:[#allocation105_spill] sm:$0xff] %v14656_v24 }
 0x15c   : > { %11104 = vmatmul.mubr.f32.gmra.mrb[24].mxu0 %v14642_v57  ;;  %v14664_v57 = vsel %vm1298_vm2, %v2413_v2, %v14502_v30  ;;  %v3228_v2 = vld [vmem:[#allocation7 + $0x220] sm:$0xff] }
 0x15d   : > { %11106 = vmatprep.mubr.f32.mxu0 %v14645_v21  ;;  %16796 = vst [vmem:[#allocation106_spill] sm:$0xff] %v14664_v57  ;;  %v14667_v21 = vsel %vm1298_vm2, %v2417_v35, %v2418_v56 }
 0x15e   : > { %16797 = vst [vmem:[#allocation107_spill] sm:$0xff] %v14667_v21 }
 0x160   : > { %11107 = vmatmul.mubr.f32.gmra.mrb[26].mxu0 %v14653_v62  ;;  %v3229_v62 = vld [vmem:[#allocation7 + $0x228] sm:$0xff] }
 0x161   : > { %11109 = vmatprep.mubr.f32.mxu0 %v14656_v24  ;;  %v12447_v24 = vpack.c.bf16 %v3227_v59, %v3226_v37  ;;  %v12451_v35 = vpack.c.bf16 %v3229_v62, %v3228_v2  ;;  %v3233_v59 = vld [vmem:[#allocation7 + $0x248] sm:$0xff]  ;;  %v3235_v62 = vld [vmem:[#allocation7 + $0x258] sm:$0xff]  ;;  %v555_v37 = vmax.f32 %v14186_v51, %v14205_v17  ;;  %v3238_v17 = vld [vmem:[#allocation7 + $0x270] sm:$0xff] }
 0x162   : > { %v3237_v2 = vld [vmem:[#allocation7 + $0x268] sm:$0xff] }
 0x164   : > { %11110 = vmatmul.mubr.f32.gmra.mrb[28].mxu0 %v14664_v57  ;;  %v3231_v57 = vld [vmem:[#allocation7 + $0x238] sm:$0xff] }
 0x165   : > { %11112 = vmatprep.mubr.f32.mxu0 %v14667_v21  ;;  %v3230_v21 = vld [vmem:[#allocation7 + $0x230] sm:$0xff] }
 0x166   : > { %v12455_v56 = vpack.c.bf16 %v3231_v57, %v3230_v21  ;;  %v3236_v57 = vld [vmem:[#allocation7 + $0x260] sm:$0xff] }
 0x168   : > { %11113 = vmatmul.mubr.f32.gmra.mrb[30].mxu0 %v14673_v31 }
 0x169   : > { %11147 = vmatprep.mubr.f32.mxu0 %v14343_v3  ;;  %v3232_v3 = vld [vmem:[#allocation7 + $0x240] sm:$0xff] }
 0x16c   : > { %11148 = vmatmul.mubr.f32.vlgmr.msra.gmra.mrb[0].mxu0 %v14350_v8  ;;  %v12459_v8 = vpack.c.bf16 %v3233_v59, %v3232_v3  ;;  %v12467_v3 = vpack.c.bf16 %v3237_v2, %v3236_v57  ;;  %v16799_v2 = vld [vmem:[#allocation66_spill] sm:$0xff] }
 0x16d   : > { %12446 = vmatpush3.bf16.msra.mxu0 %v12443_v23  ;;  %11150 = vmatprep.mubr.f32.mxu0 %v14355_v43  ;;  %v3234_v23 = vld [vmem:[#allocation7 + $0x250] sm:$0xff] }
 0x16e   : > { %12448 = vmatprep.subr.bf16.mxu0 %v12447_v24  ;;  %v12463_v21 = vpack.c.bf16 %v3235_v62, %v3234_v23 }
 0x170   : > { %11151 = vmatmul.mubr.f32.gmra.mrb[2].mxu0 %v14361_v9 }
 0x171   : > { %11153 = vmatprep.mubr.f32.mxu0 %v14366_v46  ;;  %12450 = vmatpush3.bf16.msra.mxu0 %v12447_v24  ;;  %v556_v24 = vmax.f32 %v14203_v18, %v14233_v12  ;;  %v3626_v12 = vld [vmem:[#allocation7 + $0x288] sm:$0xff] }
 0x172   : > { %12452 = vmatprep.subr.bf16.mxu0 %v12451_v35 }
 0x173   : > { %v684_v59 = vmax.f32 %v556_v24, %v14270_v58  ;;  %v16803_v58 = vld [vmem:[#allocation69_spill] sm:$0xff] }
 0x174   : > { %11154 = vmatmul.mubr.f32.gmra.mrb[4].mxu0 %v14372_v55 }
 0x175   : > { %11156 = vmatprep.mubr.f32.mxu0 %v14377_v10  ;;  %12454 = vmatpush3.bf16.msra.mxu0 %v12451_v35  ;;  %v683_v35 = vmax.f32 %v555_v37, %v14268_v1  ;;  %v813_v62 = vmax.f32 %v684_v59, -3e+38  ;;  %v3625_v1 = vld [vmem:[#allocation7 + $0x280] sm:$0xff] }
 0x176   : > { %12456 = vmatprep.subr.bf16.mxu0 %v12455_v56  ;;  %v12475_v24 = vpack.c.bf16 %v3626_v12, %v3625_v1  ;;  %v16804_v1 = vld [vmem:[#allocation14_spill] sm:$0xff] }
 0x177   : > { %v812_v51 = vmax.f32 %v683_v35, -3e+38  ;;  %v16800_v35 = vld [vmem:[#allocation67_spill] sm:$0xff] }
 0x178   : > { %11157 = vmatmul.mubr.f32.gmra.mrb[6].mxu0 %v14383_v6 }
 0x179   : > { %11159 = vmatprep.mubr.f32.mxu0 %v14388_v44  ;;  %12458 = vmatpush3.bf16.msra.mxu0 %v12455_v56  ;;  %v3239_v56 = vld [vmem:[#allocation7 + $0x278] sm:$0xff]  ;;  %v941_v37 = vmax.f32 %v812_v51, -3e+38 }
 0x17a   : > { %12460 = vmatprep.subr.bf16.mxu0 %v12459_v8  ;;  %v12471_v23 = vpack.c.bf16 %v3239_v56, %v3238_v17  ;;  %v16801_v17 = vld [vmem:[#allocation13_spill] sm:$0xff]  ;;  %v16802_v56 = vld [vmem:[#allocation68_spill] sm:$0xff] }
 0x17b   : > { %v1069_v57 = vrot.slane %v941_v37, 6  ;;  %v1214_v59 = vrot.slane %v941_v37, 7 }
 0x17c   : > { %11160 = vmatmul.mubr.f32.gmra.mrb[8].mxu0 %v14394_v13 }
 0x17d   : > { %11162 = vmatprep.mubr.f32.mxu0 %v14399_v47  ;;  %12462 = vmatpush3.bf16.msra.mxu0 %v12459_v8  ;;  %v942_v8 = vmax.f32 %v813_v62, -3e+38  ;;  %v1070_v51 = vsel %vm992_vm0, %v16801_v17, %v1069_v57  ;;  %v1215_v18 = vsel %vm1137_vm1, %v16804_v1, %v1214_v59  ;;  %v16809_v47 = vld [vmem:[#allocation15_spill] sm:$0xff] }
 0x17e   : > { %12464 = vmatprep.subr.bf16.mxu0 %v12463_v21 }
 0x17f   : > { %v1216_v12 = vrot.slane %v942_v8, 7 }
 0x180   : > { %11163 = vmatmul.mubr.f32.gmra.mrb[10].mxu0 %v14405_v60  ;;  %v16807_v60 = vld [vmem:[#allocation72_spill] sm:$0xff] }
 0x181   : > { %11165 = vmatprep.mubr.f32.mxu0 %v14410_v40  ;;  %12466 = vmatpush3.bf16.msra.mxu0 %v12463_v21  ;;  %v1071_v21 = vrot.slane %v942_v8, 6  ;;  %v1217_v40 = vsel %vm1137_vm1, %v1214_v59, %v1216_v12 }
 0x182   : > { %12468 = vmatprep.subr.bf16.mxu0 %v12467_v3 }
 0x183   : > { %v1072_v62 = vsel %vm992_vm0, %v1069_v57, %v1071_v21  ;;  %v16808_v57 = vld [vmem:[#allocation73_spill] sm:$0xff] }
 0x184   : > { %11166 = vmatmul.mubr.f32.gmra.mrb[12].mxu0 %v14416_v53  ;;  %v1136_v53 = vmax.f32 %v942_v8, %v1072_v62  ;;  %v16814_v62 = vld [vmem:[#allocation77_spill] sm:$0xff] }
 0x185   : > { %11168 = vmatprep.mubr.f32.mxu0 %v14421_v26  ;;  %12470 = vmatpush3.bf16.msra.mxu0 %v12467_v3  ;;  %v1135_v3 = vmax.f32 %v941_v37, %v1070_v51  ;;  %v16806_v26 = vld [vmem:[#allocation71_spill] sm:$0xff]  ;;  %v1520_v51 = vrot.slane %v942_v8, 2 }
 0x186   : > { %12472 = vmatprep.subr.bf16.mxu0 %v12471_v23  ;;  %v1281_v21 = vmax.f32 %v1136_v53, %v1217_v40 }
 0x187   : > { %v1280_v17 = vmax.f32 %v1135_v3, %v1215_v18  ;;  %v16811_v18 = vld [vmem:[#allocation75_spill] sm:$0xff] }
 0x188   : > { %11169 = vmatmul.mubr.f32.gmra.mrb[14].mxu0 %v16799_v2  ;;  %v1374_v2 = vrot.slane %v941_v37, 1 }
 0x189   : > { %11171 = vmatprep.mubr.f32.mxu0 %v16800_v35  ;;  %12474 = vmatpush3.bf16.msra.mxu0 %v12471_v23  ;;  %v1375_v35 = vrot.slane %v942_v8, 1  ;;  %v16805_v23 = vld [vmem:[#allocation70_spill] sm:$0xff] }
 0x18a   : > { %12476 = vmatprep.subr.bf16.mxu0 %v12475_v24 }
 0x18b   : > { %v1378_v13 = vsel %vm1298_vm2, %v1375_v35, %v16809_v47  ;;  %v16821_v47 = vld [vmem:[#allocation31_spill] sm:$0xff] }
 0x18c   : > { %11172 = vmatmul.mubr.f32.gmra.mrb[16].mxu0 %v16802_v56  ;;  %v1376_v56 = vsel %vm1298_vm2, %v1374_v2, %v1375_v35  ;;  %v1442_v59 = vmax.f32 %v1281_v21, %v1378_v13  ;;  %v16813_v2 = vld [vmem:[#allocation76_spill] sm:$0xff]  ;;  %v16815_v35 = vld [vmem:[#allocation78_spill] sm:$0xff] }
 0x18d   : > { %11174 = vmatprep.mubr.f32.mxu0 %v16803_v58  ;;  %v1519_v58 = vrot.slane %v941_v37, 2  ;;  %v1441_v1 = vmax.f32 %v1280_v17, %v1376_v56  ;;  %v16812_v37 = vld [vmem:[#allocation16_spill] sm:$0xff]  ;;  %v16817_v13 = vld [vmem:[#allocation58_spill] sm:$0xff] }
 0x18e   : > { %v1523_v8 = vsel %vm1443_vm3, %v1520_v51, %v16812_v37  ;;  %v16820_v37 = vld [vmem:[#allocation30_spill] sm:$0xff] }
 0x18f   : > { %v14723_v40 = vmax.f32 %v1442_v59, %v1523_v8  ;;  %v3629_v59 = vld [vmem:[#allocation7 + $0x2a0] sm:$0xff]  ;;  %v3630_v8 = vld [vmem:[#allocation7 + $0x2a8] sm:$0xff] }
 0x190   : > { %11175 = vmatmul.mubr.f32.gmra.mrb[18].mxu0 %v16805_v23  ;;  %v1521_v23 = vsel %vm1443_vm3, %v1519_v58, %v1520_v51  ;;  %v16816_v58 = vld [vmem:[#allocation79_spill] sm:$0xff]  ;;  %v16819_v51 = vld [vmem:[#allocation29_spill] sm:$0xff] }
 0x191   : > { %11177 = vmatprep.mubr.f32.mxu0 %v16806_v26  ;;  %v16810_v26 = vld [vmem:[#allocation74_spill] sm:$0xff]  ;;  %v14717_v3 = vmax.f32 %v1441_v1, %v1521_v23  ;;  %v2917_v17 = vrot.slane %v14723_v40, 7  ;;  %v3627_v1 = vld [vmem:[#allocation7 + $0x290] sm:$0xff]  ;;  %v3628_v23 = vld [vmem:[#allocation7 + $0x298] sm:$0xff] }
 0x192   : > { %v12479_v21 = vpack.c.bf16 %v3628_v23, %v3627_v1  ;;  %v3634_v1 = vld [vmem:[#allocation7 + $0x2c8] sm:$0xff] }
 0x193   : > { %v2915_v53 = vrot.slane %v14717_v3, 7  ;;  %v16823_v23 = vld [vmem:[#allocation34_spill] sm:$0xff] }
 0x194   : > { %11178 = vmatmul.mubr.f32.gmra.mrb[20].mxu0 %v16807_v60 }
 0x195   : > { %11180 = vmatprep.mubr.f32.mxu0 %v16808_v57  ;;  %v14731_v56 = vsel %vm1137_vm1, %v16817_v13, %v2915_v53  ;;  %v14736_v12 = vsel %vm1137_vm1, %v2915_v53, %v2917_v17  ;;  %v12483_v13 = vpack.c.bf16 %v3630_v8, %v3629_v59  ;;  %v16822_v53 = vld [vmem:[#allocation32_spill] sm:$0xff]  ;;  %v3637_v8 = vld [vmem:[#allocation7 + $0x2e0] sm:$0xff] }
 0x196   : > { %16818 = vst [vmem:[#allocation72_spill] sm:$0xff] %v14731_v56  ;;  %v3636_v59 = vld [vmem:[#allocation7 + $0x2d8] sm:$0xff] }
 0x198   : > { %11181 = vmatmul.mubr.f32.gmra.mrb[22].mxu0 %v16810_v26 }
 0x199   : > { %11183 = vmatprep.mubr.f32.mxu0 %v16811_v18 }
 0x19c   : > { %11184 = vmatmul.mubr.f32.gmra.mrb[24].mxu0 %v16813_v2 }
 0x19d   : > { %11186 = vmatprep.mubr.f32.mxu0 %v16814_v62 }
 0x1a0   : > { %11187 = vmatmul.mubr.f32.gmra.mrb[26].mxu0 %v16815_v35 }
 0x1a1   : > { %11189 = vmatprep.mubr.f32.mxu0 %v16816_v58 }
 0x1a4   : > { %11190 = vmatmul.mubr.f32.gmra.mrb[28].mxu0 %v14506_v42  ;;  %v3632_v42 = vld [vmem:[#allocation7 + $0x2b8] sm:$0xff] }
 0x1a5   : > { %11192 = vmatprep.mubr.f32.mxu0 %v14731_v56  ;;  %v3631_v56 = vld [vmem:[#allocation7 + $0x2b0] sm:$0xff] }
 0x1a6   : > { %v12487_v17 = vpack.c.bf16 %v3632_v42, %v3631_v56  ;;  %v3638_v42 = vld [vmem:[#allocation7 + $0x2e8] sm:$0xff]  ;;  %v3639_v56 = vld [vmem:[#allocation7 + $0x2f0] sm:$0xff] }
 0x1a8   : > { %11193 = vmatmul.mubr.f32.gmra.mrb[30].mxu0 %v14736_v12 }
 0x1a9   : > { %11227 = vmatprep.mubr.f32.mxu0 %v16819_v51  ;;  %v3633_v51 = vld [vmem:[#allocation7 + $0x2c0] sm:$0xff] }
 0x1ac   : > { %11228 = vmatmul.mubr.f32.vlgmr.msra.gmra.mrb[0].mxu0 %v16820_v37  ;;  %v3635_v37 = vld [vmem:[#allocation7 + $0x2d0] sm:$0xff] }
 0x1ad   : > { %12478 = vmatpush3.bf16.msra.mxu0 %v12475_v24  ;;  %11230 = vmatprep.mubr.f32.mxu0 %v16821_v47  ;;  %v12491_v24 = vpack.c.bf16 %v3634_v1, %v3633_v51  ;;  %v3640_v51 = vld [vmem:[#allocation7 + $0x2f8] sm:$0xff]  ;;  %v4123_v1 = vld [vmem:[#allocation7 + $0x300] sm:$0xff] }
 0x1ae   : > { %12480 = vmatprep.subr.bf16.mxu0 %v12479_v21 }
 0x1b0   : > { %11231 = vmatmul.mubr.f32.gmra.mrb[2].mxu0 %v16822_v53 }
 0x1b1   : > { %11233 = vmatprep.mubr.f32.mxu0 %v13948_v11  ;;  %12482 = vmatpush3.bf16.msra.mxu0 %v12479_v21  ;;  %v12495_v21 = vpack.c.bf16 %v3636_v59, %v3635_v37  ;;  %v4124_v37 = vld [vmem:[#allocation7 + $0x308] sm:$0xff]  ;;  %v4125_v59 = vld [vmem:[#allocation7 + $0x310] sm:$0xff] }
 0x1b2   : > { %12484 = vmatprep.subr.bf16.mxu0 %v12483_v13 }
 0x1b4   : > { %11234 = vmatmul.mubr.f32.gmra.mrb[4].mxu0 %v16823_v23 }
 0x1b5   : > { %11236 = vmatprep.mubr.f32.mxu0 %v13982_v15  ;;  %12486 = vmatpush3.bf16.msra.mxu0 %v12483_v13  ;;  %v12499_v13 = vpack.c.bf16 %v3638_v42, %v3637_v8  ;;  %v16824_v8 = vld [vmem:[#allocation82_spill] sm:$0xff] }
 0x1b6   : > { %12488 = vmatprep.subr.bf16.mxu0 %v12487_v17 }
 0x1b8   : > { %11237 = vmatmul.mubr.f32.gmra.mrb[6].mxu0 %v13993_v19 }
 0x1b9   : > { %11239 = vmatprep.mubr.f32.mxu0 %v14027_v29  ;;  %12490 = vmatpush3.bf16.msra.mxu0 %v12487_v17  ;;  %v12503_v17 = vpack.c.bf16 %v3640_v51, %v3639_v56  ;;  %v4128_v56 = vld [vmem:[#allocation7 + $0x328] sm:$0xff]  ;;  %v16825_v51 = vld [vmem:[#allocation83_spill] sm:$0xff] }
 0x1ba   : > { %12492 = vmatprep.subr.bf16.mxu0 %v12491_v24 }
 0x1bc   : > { %11240 = vmatmul.mubr.f32.gmra.mrb[8].mxu0 %v14032_v48 }
 0x1bd   : > { %11242 = vmatprep.mubr.f32.mxu0 %v14053_v27  ;;  %12494 = vmatpush3.bf16.msra.mxu0 %v12491_v24  ;;  %v12507_v24 = vpack.c.bf16 %v4124_v37, %v4123_v1  ;;  %v4129_v37 = vld [vmem:[#allocation7 + $0x330] sm:$0xff] }
 0x1be   : > { %12496 = vmatprep.subr.bf16.mxu0 %v12495_v21 }
 0x1c0   : > { %11243 = vmatmul.mubr.f32.gmra.mrb[10].mxu0 %v14058_v33 }
 0x1c1   : > { %11245 = vmatprep.mubr.f32.mxu0 %v14087_v52  ;;  %12498 = vmatpush3.bf16.msra.mxu0 %v12495_v21  ;;  %v4126_v21 = vld [vmem:[#allocation7 + $0x318] sm:$0xff] }
 0x1c2   : > { %12500 = vmatprep.subr.bf16.mxu0 %v12499_v13  ;;  %v12511_v42 = vpack.c.bf16 %v4126_v21, %v4125_v59  ;;  %v4132_v59 = vld [vmem:[#allocation7 + $0x348] sm:$0xff]  ;;  %v16829_v21 = vld [vmem:[#allocation87_spill] sm:$0xff] }
 0x1c4   : > { %11246 = vmatmul.mubr.f32.gmra.mrb[12].mxu0 %v14094_v16 }
 0x1c5   : > { %11248 = vmatprep.mubr.f32.mxu0 %v14122_v28  ;;  %12502 = vmatpush3.bf16.msra.mxu0 %v12499_v13  ;;  %v4127_v13 = vld [vmem:[#allocation7 + $0x320] sm:$0xff] }
 0x1c6   : > { %12504 = vmatprep.subr.bf16.mxu0 %v12503_v17  ;;  %v12515_v1 = vpack.c.bf16 %v4128_v56, %v4127_v13  ;;  %v4134_v13 = vld [vmem:[#allocation7 + $0x358] sm:$0xff]  ;;  %v16831_v56 = vld [vmem:[#allocation89_spill] sm:$0xff] }
 0x1c8   : > { %11249 = vmatmul.mubr.f32.gmra.mrb[14].mxu0 %v14133_v0 }
 0x1c9   : > { %11251 = vmatprep.mubr.f32.mxu0 %v14157_v20  ;;  %12506 = vmatpush3.bf16.msra.mxu0 %v12503_v17  ;;  %v16826_v17 = vld [vmem:[#allocation84_spill] sm:$0xff] }
 0x1ca   : > { %12508 = vmatprep.subr.bf16.mxu0 %v12507_v24 }
 0x1cc   : > { %11252 = vmatmul.mubr.f32.gmra.mrb[16].mxu0 %v14162_v14 }
 0x1cd   : > { %11254 = vmatprep.mubr.f32.mxu0 %v14183_v22 }
 0x1d0   : > { %11255 = vmatmul.mubr.f32.gmra.mrb[18].mxu0 %v14194_v34 }
 0x1d1   : > { %11257 = vmatprep.mubr.f32.mxu0 %v14223_v63 }
 0x1d4   : > { %11258 = vmatmul.mubr.f32.gmra.mrb[20].mxu0 %v14229_v50 }
 0x1d5   : > { %11260 = vmatprep.mubr.f32.mxu0 %v14252_v45 }
 0x1d8   : > { %11261 = vmatmul.mubr.f32.gmra.mrb[22].mxu0 %v14261_v7 }
 0x1d9   : > { %11263 = vmatprep.mubr.f32.mxu0 %v14292_v4 }
 0x1dc   : > { %11264 = vmatmul.mubr.f32.gmra.mrb[24].mxu0 %v14294_v38  ;;  %v16830_v38 = vld [vmem:[#allocation88_spill] sm:$0xff] }
 0x1dd   : > { %11266 = vmatprep.mubr.f32.mxu0 %v14311_v39 }
 0x1e0   : > { %11267 = vmatmul.mubr.f32.gmra.mrb[26].mxu0 %v14318_v61  ;;  %v16828_v61 = vld [vmem:[#allocation86_spill] sm:$0xff] }
 0x1e1   : > { %11269 = vmatprep.mubr.f32.mxu0 %v14327_v41  ;;  %v16827_v41 = vld [vmem:[#allocation85_spill] sm:$0xff] }
 0x1e4   : > { %11270 = vmatmul.mubr.f32.gmra.mrb[28].mxu0 %v14335_v32  ;;  %v4130_v32 = vld [vmem:[#allocation7 + $0x338] sm:$0xff] }
 0x1e5   : > { %11272 = vmatprep.mubr.f32.mxu0 %v14717_v3  ;;  %v12519_v39 = vpack.c.bf16 %v4130_v32, %v4129_v37  ;;  %v4136_v32 = vld [vmem:[#allocation7 + $0x368] sm:$0xff]  ;;  %v16833_v37 = vld [vmem:[#allocation91_spill] sm:$0xff] }
 0x1e8   : > { %11273 = vmatmul.mubr.f32.gmra.mrb[30].mxu0 %v14723_v40 }
 0x1e9   : > { %11307 = vmatprep.mubr.f32.mxu0 %v16824_v8  ;;  %v4131_v8 = vld [vmem:[#allocation7 + $0x340] sm:$0xff] }
 0x1ec   : > { %11308 = vmatmul.mubr.f32.vlgmr.msra.gmra.mrb[0].mxu0 %v16825_v51  ;;  %v4133_v51 = vld [vmem:[#allocation7 + $0x350] sm:$0xff] }
 0x1ed   : > { %12510 = vmatpush3.bf16.msra.mxu0 %v12507_v24  ;;  %11310 = vmatprep.mubr.f32.mxu0 %v16826_v17  ;;  %v12523_v24 = vpack.c.bf16 %v4132_v59, %v4131_v8  ;;  %v16832_v17 = vld [vmem:[#allocation90_spill] sm:$0xff]  ;;  %v4138_v8 = vld [vmem:[#allocation7 + $0x378] sm:$0xff]  ;;  %v4396_v59 = vld [vmem:[#allocation7 + $0x380] sm:$0xff] }
 0x1ee   : > { %12512 = vmatprep.subr.bf16.mxu0 %v12511_v42 }
 0x1f0   : > { %11311 = vmatmul.mubr.f32.gmra.mrb[2].mxu0 %v16827_v41 }
 0x1f1   : > { %11313 = vmatprep.mubr.f32.mxu0 %v16828_v61  ;;  %12514 = vmatpush3.bf16.msra.mxu0 %v12511_v42  ;;  %v12527_v42 = vpack.c.bf16 %v4134_v13, %v4133_v51  ;;  %v4135_v61 = vld [vmem:[#allocation7 + $0x360] sm:$0xff]  ;;  %v4397_v51 = vld [vmem:[#allocation7 + $0x388] sm:$0xff] }
 0x1f2   : > { %12516 = vmatprep.subr.bf16.mxu0 %v12515_v1  ;;  %v16834_v13 = vld [vmem:[#allocation94_spill] sm:$0xff] }
 0x1f4   : > { %11314 = vmatmul.mubr.f32.gmra.mrb[4].mxu0 %v16829_v21 }
 0x1f5   : > { %11316 = vmatprep.mubr.f32.mxu0 %v16830_v38  ;;  %12518 = vmatpush3.bf16.msra.mxu0 %v12515_v1  ;;  %v12531_v1 = vpack.c.bf16 %v4136_v32, %v4135_v61  ;;  %v4137_v38 = vld [vmem:[#allocation7 + $0x370] sm:$0xff]  ;;  %v16836_v32 = vld [vmem:[#allocation96_spill] sm:$0xff] }
 0x1f6   : > { %12520 = vmatprep.subr.bf16.mxu0 %v12519_v39  ;;  %v16835_v61 = vld [vmem:[#allocation95_spill] sm:$0xff] }
 0x1f8   : > { %11317 = vmatmul.mubr.f32.gmra.mrb[6].mxu0 %v16831_v56 }
 0x1f9   : > { %11319 = vmatprep.mubr.f32.mxu0 %v16832_v17  ;;  %12522 = vmatpush3.bf16.msra.mxu0 %v12519_v39  ;;  %v12535_v39 = vpack.c.bf16 %v4138_v8, %v4137_v38  ;;  %v16838_v38 = vld [vmem:[#allocation98_spill] sm:$0xff]  ;;  %v16839_v8 = vld [vmem:[#allocation99_spill] sm:$0xff] }
 0x1fa   : > { %12524 = vmatprep.subr.bf16.mxu0 %v12523_v24 }
 0x1fc   : > { %11320 = vmatmul.mubr.f32.gmra.mrb[8].mxu0 %v14565_v36 }
 0x1fd   : > { %11322 = vmatprep.mubr.f32.mxu0 %v16833_v37  ;;  %12526 = vmatpush3.bf16.msra.mxu0 %v12523_v24  ;;  %v12539_v24 = vpack.c.bf16 %v4397_v51, %v4396_v59  ;;  %v16843_v59 = vld [vmem:[#allocation103_spill] sm:$0xff]  ;;  %v16844_v51 = vld [vmem:[#allocation104_spill] sm:$0xff] }
 0x1fe   : > { %12528 = vmatprep.subr.bf16.mxu0 %v12527_v42 }
 0x200   : > { %11323 = vmatmul.mubr.f32.gmra.mrb[10].mxu0 %v14576_v5 }
 0x201   : > { %11325 = vmatprep.mubr.f32.mxu0 %v14579_v54  ;;  %12530 = vmatpush3.bf16.msra.mxu0 %v12527_v42  ;;  %v16837_v42 = vld [vmem:[#allocation97_spill] sm:$0xff] }
 0x202   : > { %12532 = vmatprep.subr.bf16.mxu0 %v12531_v1 }
 0x204   : > { %11326 = vmatmul.mubr.f32.gmra.mrb[12].mxu0 %v14587_v49  ;;  %v16840_v49 = vld [vmem:[#allocation100_spill] sm:$0xff] }
 0x205   : > { %11328 = vmatprep.mubr.f32.mxu0 %v14590_v25  ;;  %12534 = vmatpush3.bf16.msra.mxu0 %v12531_v1  ;;  %v16841_v25 = vld [vmem:[#allocation101_spill] sm:$0xff]  ;;  %v16842_v1 = vld [vmem:[#allocation102_spill] sm:$0xff] }
 0x206   : > { %12536 = vmatprep.subr.bf16.mxu0 %v12535_v39 }
 0x208   : > { %11329 = vmatmul.mubr.f32.gmra.mrb[14].mxu0 %v16834_v13 }
 0x209   : > { %11331 = vmatprep.mubr.f32.mxu0 %v16835_v61  ;;  %12538 = vmatpush3.bf16.msra.mxu0 %v12535_v39  ;;  %v16845_v39 = vld [vmem:[#allocation105_spill] sm:$0xff]  ;;  %v16846_v61 = vld [vmem:[#allocation106_spill] sm:$0xff] }
 0x20a   : > { %12540 = vmatprep.subr.bf16.mxu0 %v12539_v24 }
 0x20c   : > { %11332 = vmatmul.mubr.f32.gmra.mrb[16].mxu0 %v16836_v32  ;;  %v3588_v32 = vrot.slane %v14717_v3, 1 }
 0x20d   : > { %11334 = vmatprep.mubr.f32.mxu0 %v16837_v42  ;;  %v3589_v42 = vrot.slane %v14723_v40, 1 }
 0x210   : > { %11335 = vmatmul.mubr.f32.gmra.mrb[18].mxu0 %v16838_v38  ;;  %v16847_v38 = vld [vmem:[#allocation107_spill] sm:$0xff] }
 0x211   : > { %11337 = vmatprep.mubr.f32.mxu0 %v16839_v8 }
 0x214   : > { %11338 = vmatmul.mubr.f32.gmra.mrb[20].mxu0 %v16840_v49  ;;  %v14803_v49 = vsel %vm1298_vm2, %v3588_v32, %v3589_v42 }
 0x215   : > { %11340 = vmatprep.mubr.f32.mxu0 %v16841_v25  ;;  %16848 = vst [vmem:[#allocation73_spill] sm:$0xff] %v14803_v49 }
 0x218   : > { %11341 = vmatmul.mubr.f32.gmra.mrb[22].mxu0 %v16842_v1  ;;  %v4400_v1 = vld [vmem:[#allocation7 + $0x3a0] sm:$0xff] }
 0x219   : > { %11343 = vmatprep.mubr.f32.mxu0 %v16843_v59  ;;  %v4399_v59 = vld [vmem:[#allocation7 + $0x398] sm:$0xff] }
 0x21c   : > { %11344 = vmatmul.mubr.f32.gmra.mrb[24].mxu0 %v16844_v51  ;;  %v14809_v51 = vsel %vm1298_vm2, %v3589_v42, %v14502_v30 }
 0x21d   : > { %11346 = vmatprep.mubr.f32.mxu0 %v16845_v39  ;;  %v4398_v39 = vld [vmem:[#allocation7 + $0x390] sm:$0xff] }
 0x220   : > { %11347 = vmatmul.mubr.f32.gmra.mrb[26].mxu0 %v16846_v61  ;;  %v12543_v61 = vpack.c.bf16 %v4399_v59, %v4398_v39  ;;  %v4405_v59 = vld [vmem:[#allocation7 + $0x3c8] sm:$0xff]  ;;  %v4411_v39 = vld [vmem:[#allocation7 + $0x3f8] sm:$0xff] }
 0x221   : > { %11349 = vmatprep.mubr.f32.mxu0 %v16847_v38  ;;  %v4401_v38 = vld [vmem:[#allocation7 + $0x3a8] sm:$0xff] }
 0x222   : > { %v12547_v32 = vpack.c.bf16 %v4401_v38, %v4400_v1  ;;  %v16849_v38 = vld [vmem:[#allocation60_spill] sm:$0xff]  ;;  %v16850_v1 = vld [vmem:[#allocation61_spill] sm:$0xff] }
 0x224   : > { %11350 = vmatmul.mubr.f32.gmra.mrb[28].mxu0 %v14673_v31  ;;  %v4403_v31 = vld [vmem:[#allocation7 + $0x3b8] sm:$0xff] }
 0x225   : > { %11352 = vmatprep.mubr.f32.mxu0 %v14803_v49  ;;  %v4402_v49 = vld [vmem:[#allocation7 + $0x3b0] sm:$0xff] }
 0x226   : > { %v12551_v42 = vpack.c.bf16 %v4403_v31, %v4402_v49  ;;  %v4409_v49 = vld [vmem:[#allocation7 + $0x3e8] sm:$0xff] }
 0x227   : > { %v16851_v31 = vld [vmem:[#allocation62_spill] sm:$0xff] }
 0x228   : > { %11353 = vmatmul.mubr.f32.gmra.mrb[30].mxu0 %v14809_v51 }
 0x229   : > { %11387 = vmatprep.mubr.f32.mxu0 %v14355_v43  ;;  %v4404_v43 = vld [vmem:[#allocation7 + $0x3c0] sm:$0xff] }
 0x22c   : > { %11388 = vmatmul.mubr.f32.vlgmr.msra.gmra.mrb[0].mxu0 %v14361_v9  ;;  %v12555_v9 = vpack.c.bf16 %v4405_v59, %v4404_v43  ;;  %v16854_v43 = vld [vmem:[#allocation65_spill] sm:$0xff] }
 0x22d   : > { %12542 = vmatpush3.bf16.msra.mxu0 %v12539_v24  ;;  %11390 = vmatprep.mubr.f32.mxu0 %v14366_v46  ;;  %v4406_v46 = vld [vmem:[#allocation7 + $0x3d0] sm:$0xff]  ;;  %v4407_v24 = vld [vmem:[#allocation7 + $0x3d8] sm:$0xff]  ;;  %v4797_v59 = vld [vmem:[#allocation7 + $0x400] sm:$0xff] }
 0x22e   : > { %12544 = vmatprep.subr.bf16.mxu0 %v12543_v61 }
 0x230   : > { %11391 = vmatmul.mubr.f32.gmra.mrb[2].mxu0 %v14372_v55  ;;  %v12559_v55 = vpack.c.bf16 %v4407_v24, %v4406_v46  ;;  %v4798_v46 = vld [vmem:[#allocation7 + $0x408] sm:$0xff] }
 0x231   : > { %11393 = vmatprep.mubr.f32.mxu0 %v14377_v10  ;;  %12546 = vmatpush3.bf16.msra.mxu0 %v12543_v61  ;;  %v4408_v10 = vld [vmem:[#allocation7 + $0x3e0] sm:$0xff]  ;;  %v16852_v61 = vld [vmem:[#allocation63_spill] sm:$0xff]  ;;  %v16855_v24 = vld [vmem:[#allocation66_spill] sm:$0xff] }
 0x232   : > { %12548 = vmatprep.subr.bf16.mxu0 %v12547_v32 }
 0x234   : > { %11394 = vmatmul.mubr.f32.gmra.mrb[4].mxu0 %v14383_v6  ;;  %v12563_v6 = vpack.c.bf16 %v4409_v49, %v4408_v10  ;;  %v16858_v10 = vld [vmem:[#allocation69_spill] sm:$0xff]  ;;  %v16859_v49 = vld [vmem:[#allocation70_spill] sm:$0xff] }
 0x235   : > { %11396 = vmatprep.mubr.f32.mxu0 %v14388_v44  ;;  %12550 = vmatpush3.bf16.msra.mxu0 %v12547_v32  ;;  %v4410_v44 = vld [vmem:[#allocation7 + $0x3f0] sm:$0xff]  ;;  %v16853_v32 = vld [vmem:[#allocation64_spill] sm:$0xff] }
 0x236   : > { %12552 = vmatprep.subr.bf16.mxu0 %v12551_v42 }
 0x238   : > { %11397 = vmatmul.mubr.f32.gmra.mrb[6].mxu0 %v16849_v38  ;;  %v16856_v38 = vld [vmem:[#allocation67_spill] sm:$0xff] }
 0x239   : > { %11399 = vmatprep.mubr.f32.mxu0 %v16850_v1  ;;  %12554 = vmatpush3.bf16.msra.mxu0 %v12551_v42  ;;  %v12567_v42 = vpack.c.bf16 %v4411_v39, %v4410_v44  ;;  %v16857_v1 = vld [vmem:[#allocation68_spill] sm:$0xff]  ;;  %v4801_v44 = vld [vmem:[#allocation7 + $0x420] sm:$0xff] }
 0x23a   : > { %12556 = vmatprep.subr.bf16.mxu0 %v12555_v9 }
 0x23c   : > { %11400 = vmatmul.mubr.f32.gmra.mrb[8].mxu0 %v16851_v31  ;;  %v16861_v31 = vld [vmem:[#allocation81_spill] sm:$0xff] }
 0x23d   : > { %11402 = vmatprep.mubr.f32.mxu0 %v16852_v61  ;;  %12558 = vmatpush3.bf16.msra.mxu0 %v12555_v9  ;;  %v12571_v9 = vpack.c.bf16 %v4798_v46, %v4797_v59  ;;  %v16862_v61 = vld [vmem:[#allocation72_spill] sm:$0xff] }
 0x23e   : > { %12560 = vmatprep.subr.bf16.mxu0 %v12559_v55  ;;  %v4804_v46 = vld [vmem:[#allocation7 + $0x438] sm:$0xff] }
 0x240   : > { %11403 = vmatmul.mubr.f32.gmra.mrb[10].mxu0 %v16853_v32  ;;  %v4802_v32 = vld [vmem:[#allocation7 + $0x428] sm:$0xff] }
 0x241   : > { %11405 = vmatprep.mubr.f32.mxu0 %v16854_v43  ;;  %12562 = vmatpush3.bf16.msra.mxu0 %v12559_v55  ;;  %v16860_v55 = vld [vmem:[#allocation71_spill] sm:$0xff]  ;;  %v6627_v43 = vld [vmem:[#allocation7 + $0x520] sm:$0xff] }
 0x242   : > { %12564 = vmatprep.subr.bf16.mxu0 %v12563_v6 }
 0x244   : > { %11406 = vmatmul.mubr.f32.gmra.mrb[12].mxu0 %v16855_v24 }
 0x245   : > { %11408 = vmatprep.mubr.f32.mxu0 %v16856_v38  ;;  %12566 = vmatpush3.bf16.msra.mxu0 %v12563_v6  ;;  %v6625_v6 = vld [vmem:[#allocation7 + $0x510] sm:$0xff]  ;;  %v4806_v38 = vld [vmem:[#allocation7 + $0x448] sm:$0xff] }
 0x246   : > { %12568 = vmatprep.subr.bf16.mxu0 %v12567_v42 }
 0x248   : > { %11409 = vmatmul.mubr.f32.gmra.mrb[14].mxu0 %v16857_v1  ;;  %v4808_v1 = vld [vmem:[#allocation7 + $0x458] sm:$0xff] }
 0x249   : > { %11411 = vmatprep.mubr.f32.mxu0 %v16858_v10  ;;  %12570 = vmatpush3.bf16.msra.mxu0 %v12567_v42  ;;  %v12579_v42 = vpack.c.bf16 %v4802_v32, %v4801_v44  ;;  %v4810_v10 = vld [vmem:[#allocation7 + $0x468] sm:$0xff]  ;;  %v6609_v32 = vld [vmem:[#allocation7 + $0x490] sm:$0xff] }
 0x24a   : > { %12572 = vmatprep.subr.bf16.mxu0 %v12571_v9  ;;  %v6608_v44 = vld [vmem:[#allocation7 + $0x488] sm:$0xff] }
 0x24c   : > { %11412 = vmatmul.mubr.f32.gmra.mrb[16].mxu0 %v16859_v49  ;;  %v4812_v49 = vld [vmem:[#allocation7 + $0x478] sm:$0xff] }
 0x24d   : > { %11414 = vmatprep.mubr.f32.mxu0 %v16860_v55  ;;  %v6632_v55 = vld [vmem:[#allocation7 + $0x548] sm:$0xff] }
 0x250   : > { %11415 = vmatmul.mubr.f32.gmra.mrb[18].mxu0 %v16807_v60  ;;  %v16863_v60 = vld [vmem:[#allocation58_spill] sm:$0xff] }
 0x251   : > { %11417 = vmatprep.mubr.f32.mxu0 %v16808_v57  ;;  %v4799_v57 = vld [vmem:[#allocation7 + $0x410] sm:$0xff] }
 0x254   : > { %11418 = vmatmul.mubr.f32.gmra.mrb[20].mxu0 %v16810_v26  ;;  %v4800_v26 = vld [vmem:[#allocation7 + $0x418] sm:$0xff] }
 0x255   : > { %11420 = vmatprep.mubr.f32.mxu0 %v16811_v18  ;;  %v6623_v18 = vld [vmem:[#allocation7 + $0x500] sm:$0xff] }
 0x258   : > { %11421 = vmatmul.mubr.f32.gmra.mrb[22].mxu0 %v16813_v2  ;;  %v6624_v2 = vld [vmem:[#allocation7 + $0x508] sm:$0xff] }
 0x259   : > { %11423 = vmatprep.mubr.f32.mxu0 %v16814_v62  ;;  %v12603_v62 = vpack.c.bf16 %v6624_v2, %v6623_v18  ;;  %v6636_v18 = vld [vmem:[#allocation7 + $0x568] sm:$0xff] }
 0x25b   : > { %12604 = vmatprep.subr.bf16.mxu1 %v12603_v62 }
 0x25c   : > { %11424 = vmatmul.mubr.f32.gmra.mrb[24].mxu0 %v16815_v35  ;;  %v6626_v35 = vld [vmem:[#allocation7 + $0x518] sm:$0xff]  ;;  %12606 = vmatpush3.bf16.msra.mxu1 %v12603_v62 }
 0x25d   : > { %11426 = vmatprep.mubr.f32.mxu0 %v16816_v58  ;;  %v12575_v58 = vpack.c.bf16 %v4800_v26, %v4799_v57  ;;  %v12607_v39 = vpack.c.bf16 %v6626_v35, %v6625_v6  ;;  %v6634_v57 = vld [vmem:[#allocation7 + $0x558] sm:$0xff]  ;;  %v6637_v6 = vld [vmem:[#allocation7 + $0x570] sm:$0xff] }
 0x25e   : > { %v6638_v62 = vld [vmem:[#allocation7 + $0x578] sm:$0xff] }
 0x25f   : > { %12608 = vmatprep.subr.bf16.mxu1 %v12607_v39  ;;  %v12631_v35 = vpack.c.bf16 %v6638_v62, %v6637_v6 }
 0x260   : > { %11427 = vmatmul.mubr.f32.gmra.mrb[26].mxu0 %v16861_v31  ;;  %12610 = vmatpush3.bf16.msra.mxu1 %v12607_v39 }
 0x261   : > { %11429 = vmatprep.mubr.f32.mxu0 %v16862_v61  ;;  %v6633_v61 = vld [vmem:[#allocation7 + $0x550] sm:$0xff] }
 0x262   : > { %v12623_v26 = vpack.c.bf16 %v6634_v57, %v6633_v61 }
 0x264   : > { %11430 = vmatmul.mubr.f32.gmra.mrb[28].mxu0 %v14736_v12  ;;  %v6628_v12 = vld [vmem:[#allocation7 + $0x528] sm:$0xff] }
 0x265   : > { %11432 = vmatprep.mubr.f32.mxu0 %v16863_v60  ;;  %v12611_v59 = vpack.c.bf16 %v6628_v12, %v6627_v43  ;;  %v6610_v43 = vld [vmem:[#allocation7 + $0x498] sm:$0xff] }
 0x266   : > { %v12639_v12 = vpack.c.bf16 %v6610_v43, %v6609_v32 }
 0x267   : > { %12612 = vmatprep.subr.bf16.mxu1 %v12611_v59 }
 0x268   : > { %11433 = vmatmul.mubr.f32.gmra.mrb[30].mxu0 %v16863_v60  ;;  %12614 = vmatpush3.bf16.msra.mxu1 %v12611_v59  ;;  %v6612_v59 = vld [vmem:[#allocation7 + $0x4a8] sm:$0xff] }
 0x269   : > { %11467 = vmatprep.mubr.f32.mxu0 %v16821_v47  ;;  %v4803_v47 = vld [vmem:[#allocation7 + $0x430] sm:$0xff] }
 0x26a   : > { %v12583_v24 = vpack.c.bf16 %v4804_v46, %v4803_v47  ;;  %v6613_v46 = vld [vmem:[#allocation7 + $0x4b0] sm:$0xff] }
 0x26c   : > { %11468 = vmatmul.mubr.f32.vlgmr.msra.gmra.mrb[0].mxu0 %v16822_v53  ;;  %v4805_v53 = vld [vmem:[#allocation7 + $0x440] sm:$0xff] }
 0x26d   : > { %12574 = vmatpush3.bf16.msra.mxu0 %v12571_v9  ;;  %11470 = vmatprep.mubr.f32.mxu0 %v13948_v11  ;;  %v12587_v11 = vpack.c.bf16 %v4806_v38, %v4805_v53  ;;  %v4807_v9 = vld [vmem:[#allocation7 + $0x450] sm:$0xff]  ;;  %v6615_v38 = vld [vmem:[#allocation7 + $0x4c0] sm:$0xff] }
 0x26e   : > { %12576 = vmatprep.subr.bf16.mxu0 %v12575_v58 }
 0x270   : > { %11471 = vmatmul.mubr.f32.gmra.mrb[2].mxu0 %v16823_v23  ;;  %v4809_v23 = vld [vmem:[#allocation7 + $0x460] sm:$0xff] }
 0x271   : > { %11473 = vmatprep.mubr.f32.mxu0 %v13982_v15  ;;  %12578 = vmatpush3.bf16.msra.mxu0 %v12575_v58  ;;  %v12591_v15 = vpack.c.bf16 %v4808_v1, %v4807_v9  ;;  %v6607_v58 = vld [vmem:[#allocation7 + $0x480] sm:$0xff]  ;;  %v6617_v1 = vld [vmem:[#allocation7 + $0x4d0] sm:$0xff] }
 0x272   : > { %12580 = vmatprep.subr.bf16.mxu0 %v12579_v42  ;;  %v12635_v39 = vpack.c.bf16 %v6608_v44, %v6607_v58  ;;  %v16897_v44 = vld [vmem:[#allocation14_spill] sm:$0xff] }
 0x274   : > { %11474 = vmatmul.mubr.f32.gmra.mrb[4].mxu0 %v13993_v19  ;;  %v12595_v19 = vpack.c.bf16 %v4810_v10, %v4809_v23  ;;  %v6619_v10 = vld [vmem:[#allocation7 + $0x4e0] sm:$0xff] }
 0x275   : > { %11476 = vmatprep.mubr.f32.mxu0 %v14027_v29  ;;  %12582 = vmatpush3.bf16.msra.mxu0 %v12579_v42  ;;  %v4811_v29 = vld [vmem:[#allocation7 + $0x470] sm:$0xff]  ;;  %v6611_v42 = vld [vmem:[#allocation7 + $0x4a0] sm:$0xff] }
 0x276   : > { %12584 = vmatprep.subr.bf16.mxu0 %v12583_v24  ;;  %v12643_v47 = vpack.c.bf16 %v6612_v59, %v6611_v42 }
 0x278   : > { %11477 = vmatmul.mubr.f32.gmra.mrb[6].mxu0 %v14032_v48  ;;  %v12599_v48 = vpack.c.bf16 %v4812_v49, %v4811_v29 }
 0x279   : > { %11479 = vmatprep.mubr.f32.mxu0 %v14053_v27  ;;  %12586 = vmatpush3.bf16.msra.mxu0 %v12583_v24  ;;  %v16864_v27 = vld [vmem:[#allocation54_spill] sm:$0xff]  ;;  %v6614_v24 = vld [vmem:[#allocation7 + $0x4b8] sm:$0xff] }
 0x27a   : > { %12588 = vmatprep.subr.bf16.mxu0 %v12587_v11  ;;  %v12647_v53 = vpack.c.bf16 %v6614_v24, %v6613_v46  ;;  %v16899_v46 = vld [vmem:[#allocation15_spill] sm:$0xff] }
 0x27c   : > { %11480 = vmatmul.mubr.f32.gmra.mrb[8].mxu0 %v14058_v33  ;;  %v16865_v33 = vld [vmem:[#allocation55_spill] sm:$0xff] }
 0x27d   : > { %11482 = vmatprep.mubr.f32.mxu0 %v14087_v52  ;;  %12590 = vmatpush3.bf16.msra.mxu0 %v12587_v11  ;;  %v16866_v52 = vld [vmem:[#allocation56_spill] sm:$0xff]  ;;  %v6616_v11 = vld [vmem:[#allocation7 + $0x4c8] sm:$0xff] }
 0x27e   : > { %12592 = vmatprep.subr.bf16.mxu0 %v12591_v15  ;;  %v12651_v9 = vpack.c.bf16 %v6616_v11, %v6615_v38 }
 0x280   : > { %11483 = vmatmul.mubr.f32.gmra.mrb[10].mxu0 %v14094_v16  ;;  %v16867_v16 = vld [vmem:[#allocation57_spill] sm:$0xff] }
 0x281   : > { %11485 = vmatprep.mubr.f32.mxu0 %v14122_v28  ;;  %12594 = vmatpush3.bf16.msra.mxu0 %v12591_v15  ;;  %v16868_v28 = vld [vmem:[#allocation59_spill] sm:$0xff]  ;;  %v6618_v15 = vld [vmem:[#allocation7 + $0x4d8] sm:$0xff] }
 0x282   : > { %12596 = vmatprep.subr.bf16.mxu0 %v12595_v19  ;;  %v12655_v23 = vpack.c.bf16 %v6618_v15, %v6617_v1 }
 0x284   : > { %11486 = vmatmul.mubr.f32.gmra.mrb[12].mxu0 %v14133_v0  ;;  %v16869_v0 = vmov 0.0  }
 0x285   : > { %11488 = vmatprep.mubr.f32.mxu0 %v14157_v20  ;;  %12598 = vmatpush3.bf16.msra.mxu0 %v12595_v19  ;;  %v16870_v20 = vld [vmem:[#allocation84_spill] sm:$0xff]  ;;  %v6620_v19 = vld [vmem:[#allocation7 + $0x4e8] sm:$0xff] }
 0x286   : > { %12600 = vmatprep.subr.bf16.mxu0 %v12599_v48  ;;  %v12659_v29 = vpack.c.bf16 %v6620_v19, %v6619_v10 }
 0x288   : > { %11489 = vmatmul.mubr.f32.gmra.mrb[14].mxu0 %v14162_v14  ;;  %v16871_v14 = vld [vmem:[#allocation86_spill] sm:$0xff] }
 0x289   : > { %11491 = vmatprep.mubr.f32.mxu0 %v14183_v22  ;;  %12602 = vmatpush3.bf16.msra.mxu0 %v12599_v48  ;;  %v16872_v22 = vld [vmem:[#allocation88_spill] sm:$0xff] }
 0x28c   : > { %11492 = vmatmul.mubr.f32.gmra.mrb[16].mxu0 %v14194_v34  ;;  %v16873_v34 = vld [vmem:[#allocation92_spill] sm:$0xff] }
 0x28d   : > { %11494 = vmatprep.mubr.f32.mxu0 %v14223_v63  ;;  %v16874_v63 = vld [vmem:[#allocation93_spill] sm:$0xff] }
 0x290   : > { %11495 = vmatmul.mubr.f32.gmra.mrb[18].mxu0 %v14229_v50  ;;  %v16875_v50 = vld [vmem:[#allocation95_spill] sm:$0xff] }
 0x291   : > { %11497 = vmatprep.mubr.f32.mxu0 %v14252_v45  ;;  %v16876_v45 = vld [vmem:[#allocation96_spill] sm:$0xff] }
 0x294   : > { %11498 = vmatmul.mubr.f32.gmra.mrb[20].mxu0 %v14261_v7  ;;  %v16877_v7 = vld [vmem:[#allocation97_spill] sm:$0xff] }
 0x295   : > { %11500 = vmatprep.mubr.f32.mxu0 %v14292_v4  ;;  %v16878_v4 = vld [vmem:[#allocation98_spill] sm:$0xff] }
 0x298   : > { %11501 = vmatmul.mubr.f32.gmra.mrb[22].mxu0 %v16864_v27 }
 0x299   : > { %11503 = vmatprep.mubr.f32.mxu0 %v16865_v33 }
 0x29c   : > { %11504 = vmatmul.mubr.f32.gmra.mrb[24].mxu0 %v16866_v52 }
 0x29d   : > { %11506 = vmatprep.mubr.f32.mxu0 %v16867_v16  ;;  %v6621_v16 = vld [vmem:[#allocation7 + $0x4f0] sm:$0xff] }
 0x2a0   : > { %11507 = vmatmul.mubr.f32.gmra.mrb[26].mxu0 %v16868_v28  ;;  %v6622_v28 = vld [vmem:[#allocation7 + $0x4f8] sm:$0xff] }
 0x2a1   : > { %11509 = vmatprep.mubr.f32.mxu0 %v14717_v3  ;;  %v16883_v3 = vld [vmem:[#allocation105_spill] sm:$0xff] }
 0x2a4   : > { %11510 = vmatmul.mubr.f32.gmra.mrb[28].mxu0 %v14723_v40  ;;  %v16884_v40 = vld [vmem:[#allocation106_spill] sm:$0xff] }
 0x2a5   : > { %11512 = vmatprep.mubr.f32.mxu0 %v16869_v0 }
 0x2a8   : > { %11513 = vmatmul.mubr.f32.gmra.mrb[30].mxu0 %v16869_v0 }
 0x2a9   : > { %11547 = vmatprep.mubr.f32.mxu0 %v16870_v20 }
 0x2ac   : > { %11548 = vmatmul.mubr.f32.vlgmr.msra.gmra.mrb[0].mxu0 %v16827_v41  ;;  %v16879_v41 = vld [vmem:[#allocation100_spill] sm:$0xff] }
 0x2ad   : > { %11550 = vmatprep.mubr.f32.mxu0 %v16871_v14 }
 0x2b0   : > { %11551 = vmatmul.mubr.f32.gmra.mrb[2].mxu0 %v16829_v21  ;;  %v16886_v21 = vld [vmem:[#allocation108_spill] sm:$0xff] }
 0x2b1   : > { %11553 = vmatprep.mubr.f32.mxu0 %v16872_v22 }
 0x2b4   : > { %11554 = vmatmul.mubr.f32.gmra.mrb[4].mxu0 %v16831_v56  ;;  %v16887_v56 = vld [vmem:[#allocation73_spill] sm:$0xff] }
 0x2b5   : > { %11556 = vmatprep.mubr.f32.mxu0 %v16832_v17  ;;  %v16885_v17 = vld [vmem:[#allocation107_spill] sm:$0xff] }
 0x2b8   : > { %11557 = vmatmul.mubr.f32.gmra.mrb[6].mxu0 %v14565_v36  ;;  %v16880_v36 = vld [vmem:[#allocation102_spill] sm:$0xff] }
 0x2b9   : > { %11559 = vmatprep.mubr.f32.mxu0 %v16833_v37  ;;  %v6630_v37 = vld [vmem:[#allocation7 + $0x538] sm:$0xff] }
 0x2bc   : > { %11560 = vmatmul.mubr.f32.gmra.mrb[8].mxu0 %v14576_v5  ;;  %v16881_v5 = vld [vmem:[#allocation103_spill] sm:$0xff] }
 0x2bd   : > { %11562 = vmatprep.mubr.f32.mxu0 %v14579_v54  ;;  %v16882_v54 = vld [vmem:[#allocation104_spill] sm:$0xff] }
 0x2c0   : > { %11563 = vmatmul.mubr.f32.gmra.mrb[10].mxu0 %v16873_v34  ;;  %v12663_v34 = vpack.c.bf16 %v6622_v28, %v6621_v16 }
 0x2c1   : > { %11565 = vmatprep.mubr.f32.mxu0 %v16874_v63 }
 0x2c4   : > { %11566 = vmatmul.mubr.f32.gmra.mrb[12].mxu0 %v16834_v13 }
 0x2c5   : > { %11568 = vmatprep.mubr.f32.mxu0 %v16875_v50 }
 0x2c8   : > { %11569 = vmatmul.mubr.f32.gmra.mrb[14].mxu0 %v16876_v45 }
 0x2c9   : > { %11571 = vmatprep.mubr.f32.mxu0 %v16877_v7 }
 0x2cc   : > { %11572 = vmatmul.mubr.f32.gmra.mrb[16].mxu0 %v16878_v4 }
 0x2cd   : > { %11574 = vmatprep.mubr.f32.mxu0 %v16839_v8  ;;  %v6631_v8 = vld [vmem:[#allocation7 + $0x540] sm:$0xff] }
 0x2ce   : > { %v12619_v31 = vpack.c.bf16 %v6632_v55, %v6631_v8 }
 0x2d0   : > { %11575 = vmatmul.mubr.f32.gmra.mrb[18].mxu0 %v16879_v41 }
 0x2d1   : > { %11577 = vmatprep.mubr.f32.mxu0 %v16841_v25  ;;  %v6629_v25 = vld [vmem:[#allocation7 + $0x530] sm:$0xff] }
 0x2d2   : > { %v12615_v13 = vpack.c.bf16 %v6630_v37, %v6629_v25 }
 0x2d4   : > { %11578 = vmatmul.mubr.f32.gmra.mrb[20].mxu0 %v16880_v36  ;;  %12616 = vmatprep.subr.bf16.mxu1 %v12615_v13 }
 0x2d5   : > { %11580 = vmatprep.mubr.f32.mxu0 %v16881_v5  ;;  %12618 = vmatpush3.bf16.msra.mxu1 %v12615_v13 }
 0x2d6   : > { %12620 = vmatprep.subr.bf16.mxu1 %v12619_v31 }
 0x2d8   : > { %11581 = vmatmul.mubr.f32.gmra.mrb[22].mxu0 %v16882_v54 }
 0x2d9   : > { %11583 = vmatprep.mubr.f32.mxu0 %v16883_v3  ;;  %12622 = vmatpush3.bf16.msra.mxu1 %v12619_v31 }
 0x2da   : > { %12624 = vmatprep.subr.bf16.mxu1 %v12623_v26 }
 0x2dc   : > { %11584 = vmatmul.mubr.f32.gmra.mrb[24].mxu0 %v16884_v40 }
 0x2dd   : > { %11586 = vmatprep.mubr.f32.mxu0 %v16885_v17  ;;  %12626 = vmatpush3.bf16.msra.mxu1 %v12623_v26 }
 0x2e0   : > { %11587 = vmatmul.mubr.f32.gmra.mrb[26].mxu0 %v16886_v21 }
 0x2e1   : > { %11589 = vmatprep.mubr.f32.mxu0 %v16887_v56 }
 0x2e4   : > { %11590 = vmatmul.mubr.f32.gmra.mrb[28].mxu0 %v14809_v51  ;;  %v6635_v51 = vld [vmem:[#allocation7 + $0x560] sm:$0xff] }
 0x2e5   : > { %11592 = vmatprep.mubr.f32.mxu0 %v14502_v30  ;;  %v12627_v2 = vpack.c.bf16 %v6636_v18, %v6635_v51 }
 0x2e7   : > { %12628 = vmatprep.subr.bf16.mxu1 %v12627_v2 }
 0x2e8   : > { %11593 = vmatmul.mubr.f32.gmra.mrb[30].mxu0 %v14502_v30  ;;  %12630 = vmatpush3.bf16.msra.mxu1 %v12627_v2 }
 0x2e9   : > { %12632 = vmatprep.subr.bf16.mxu1 %v12631_v35 }
 0x2ec   : > { %12634 = vmatpush3.bf16.msra.mxu1 %v12631_v35  ;;  %v16896_v35 = vld [vmem:[#allocation13_spill] sm:$0xff] }
 0x2ed   : > { %12636 = vmatprep.subr.bf16.mxu1 %v12635_v39 }
 0x2ef   : > { %11628 = vmatmul.mubr.f32.vlgmr.msra.gmra.mrb[0].mxu1 %v16869_v0 }
 0x2f0   : > { %12638 = vmatpush3.bf16.msra.mxu1 %v12635_v39 }
 0x2f1   : > { %12640 = vmatprep.subr.bf16.mxu1 %v12639_v12 }
 0x2f4   : > { %12642 = vmatpush3.bf16.msra.mxu1 %v12639_v12 }
 0x2f5   : > { %12644 = vmatprep.subr.bf16.mxu1 %v12643_v47 }
 0x2f8   : > { %12646 = vmatpush3.bf16.msra.mxu1 %v12643_v47 }
 0x2f9   : > { %12648 = vmatprep.subr.bf16.mxu1 %v12647_v53 }
 0x2fc   : > { %12650 = vmatpush3.bf16.msra.mxu1 %v12647_v53 }
 0x2fd   : > { %12652 = vmatprep.subr.bf16.mxu1 %v12651_v9 }
 0x300   : > { %12654 = vmatpush3.bf16.msra.mxu1 %v12651_v9 }
 0x301   : > { %12656 = vmatprep.subr.bf16.mxu1 %v12655_v23 }
 0x304   : > { %12658 = vmatpush3.bf16.msra.mxu1 %v12655_v23 }
 0x305   : > { %12660 = vmatprep.subr.bf16.mxu1 %v12659_v29 }
 0x308   : > { %12662 = vmatpush3.bf16.msra.mxu1 %v12659_v29 }
 0x309   : > { %12664 = vmatprep.subr.bf16.mxu1 %v12663_v34 }
 0x30c   : > { %12666 = vmatpush3.bf16.msra.mxu1 %v12663_v34 }
 0x37f   : > { %v14909_v49 = vpop.f32.mrb[0].mxu0 }
 0x380   : > { %16888 = vst [vmem:[#allocation74_spill] sm:$0xff] %v14909_v49  ;;  %v14911_v48 = vpop.f32.mrb[1].mxu0  ;;  %v5268_v27 = vmax.f32 %v14909_v49, -3e+38 }
 0x381   : > { %16889 = vst [vmem:[#allocation75_spill] sm:$0xff] %v14911_v48  ;;  %v5267_v33 = vmax.f32 %v14911_v48, -3e+38 }
 0x383   : > { %v14915_v52 = vpop.f32.mrb[2].mxu0 }
 0x384   : > { %16890 = vst [vmem:[#allocation76_spill] sm:$0xff] %v14915_v52  ;;  %v5272_v20 = vmax.f32 %v14909_v49, %v14915_v52  ;;  %v5396_v14 = vmax.f32 %v5268_v27, %v14915_v52  ;;  %v14920_v22 = vpop.f32.mrb[3].mxu0 }
 0x385   : > { %16891 = vst [vmem:[#allocation77_spill] sm:$0xff] %v14920_v22  ;;  %v5271_v63 = vmax.f32 %v14911_v48, %v14920_v22  ;;  %v5395_v50 = vmax.f32 %v5267_v33, %v14920_v22  ;;  %v16901_v33 = vld [vmem:[#allocation16_spill] sm:$0xff] }
 0x387   : > { %v14925_v45 = vpop.f32.mrb[4].mxu0 }
 0x388   : > { %16892 = vst [vmem:[#allocation78_spill] sm:$0xff] %v14925_v45  ;;  %v5276_v7 = vmax.f32 %v14915_v52, %v14925_v45  ;;  %v5400_v4 = vmax.f32 %v5272_v20, %v14925_v45  ;;  %v5524_v41 = vmax.f32 %v5396_v14, %v14925_v45  ;;  %v14931_v36 = vpop.f32.mrb[5].mxu0 }
 0x389   : > { %16893 = vst [vmem:[#allocation79_spill] sm:$0xff] %v14931_v36  ;;  %v5275_v5 = vmax.f32 %v14920_v22, %v14931_v36  ;;  %v5399_v54 = vmax.f32 %v5271_v63, %v14931_v36  ;;  %v5523_v3 = vmax.f32 %v5395_v50, %v14931_v36 }
 0x38a   : > { %v6063_v40 = vrot.slane %v5524_v41, 1  ;;  %v6207_v17 = vrot.slane %v5524_v41, 2  ;;  %v5761_v21 = vrot.slane %v5524_v41, 6  ;;  %v5905_v56 = vrot.slane %v5524_v41, 7 }
 0x38b   : > { %v14937_v25 = vpop.f32.mrb[6].mxu0  ;;  %v5759_v37 = vrot.slane %v5523_v3, 6  ;;  %v5903_v13 = vrot.slane %v5523_v3, 7  ;;  %v6062_v8 = vrot.slane %v5523_v3, 1  ;;  %v6206_v55 = vrot.slane %v5523_v3, 2 }
 0x38c   : > { %16894 = vst [vmem:[#allocation29_spill] sm:$0xff] %v14937_v25  ;;  %v5280_v31 = vmax.f32 %v14925_v45, %v14937_v25  ;;  %v5404_v61 = vmax.f32 %v5276_v7, %v14937_v25  ;;  %v5528_v57 = vmax.f32 %v5400_v4, %v14937_v25  ;;  %v14944_v26 = vmax.f32 %v5524_v41, %v14937_v25  ;;  %v14946_v51 = vpop.f32.mrb[7].mxu0 }
 0x38d   : > { %16895 = vst [vmem:[#allocation30_spill] sm:$0xff] %v14946_v51  ;;  %v5279_v18 = vmax.f32 %v14931_v36, %v14946_v51  ;;  %v5403_v2 = vmax.f32 %v5275_v5, %v14946_v51  ;;  %v5527_v6 = vmax.f32 %v5399_v54, %v14946_v51  ;;  %v14953_v62 = vmax.f32 %v5523_v3, %v14946_v51 }
 0x38e   : > { %v5760_v58 = vsel %vm992_vm0, %v16896_v35, %v5759_v37  ;;  %v5904_v39 = vsel %vm1137_vm1, %v16897_v44, %v5903_v13  ;;  %v6064_v32 = vsel %vm1298_vm2, %v6062_v8, %v6063_v40  ;;  %v6208_v43 = vsel %vm1443_vm3, %v6206_v55, %v6207_v17 }
 0x38f   : > { %v14961_v12 = vpop.f32.mrb[8].mxu0  ;;  %v5870_v42 = vmax.f32 %v5523_v3, %v5760_v58  ;;  %v5762_v59 = vsel %vm992_vm0, %v5759_v37, %v5761_v21  ;;  %v5906_v47 = vsel %vm1137_vm1, %v5903_v13, %v5905_v56  ;;  %v6066_v24 = vsel %vm1298_vm2, %v6063_v40, %v16899_v46 }
 0x390   : > { %16898 = vst [vmem:[#allocation31_spill] sm:$0xff] %v14961_v12  ;;  %v5284_v53 = vmax.f32 %v14937_v25, %v14961_v12  ;;  %v5408_v38 = vmax.f32 %v5280_v31, %v14961_v12  ;;  %v5532_v11 = vmax.f32 %v5404_v61, %v14961_v12  ;;  %v14972_v9 = vmax.f32 %v5528_v57, %v14961_v12  ;;  %v14974_v1 = vpop.f32.mrb[9].mxu0 }
 0x391   : > { %16900 = vst [vmem:[#allocation32_spill] sm:$0xff] %v14974_v1  ;;  %v5283_v15 = vmax.f32 %v14946_v51, %v14974_v1  ;;  %v5407_v23 = vmax.f32 %v5279_v18, %v14974_v1  ;;  %v5531_v10 = vmax.f32 %v5403_v2, %v14974_v1  ;;  %v14981_v19 = vmax.f32 %v5527_v6, %v14974_v1 }
 0x392   : > { %v6014_v29 = vmax.f32 %v5870_v42, %v5904_v39  ;;  %v5871_v27 = vmax.f32 %v5524_v41, %v5762_v59  ;;  %v6210_v16 = vsel %vm1443_vm3, %v6207_v17, %v16901_v33  ;;  %v5764_v28 = vrot.slane %v14953_v62, 6 }
 0x393   : > { %v14986_v20 = vpop.f32.mrb[10].mxu0  ;;  %v5908_v14 = vrot.slane %v14953_v62, 7  ;;  %v6067_v34 = vrot.slane %v14953_v62, 1  ;;  %v6068_v63 = vrot.slane %v14944_v26, 1  ;;  %v6211_v50 = vrot.slane %v14953_v62, 2 }
 0x394   : > { %16902 = vst [vmem:[#allocation34_spill] sm:$0xff] %v14986_v20  ;;  %v5288_v7 = vmax.f32 %v14961_v12, %v14986_v20  ;;  %v5412_v4 = vmax.f32 %v5284_v53, %v14986_v20  ;;  %v5536_v41 = vmax.f32 %v5408_v38, %v14986_v20  ;;  %v14997_v5 = vmax.f32 %v5532_v11, %v14986_v20  ;;  %v14999_v54 = vpop.f32.mrb[11].mxu0 }
 0x395   : > { %16903 = vst [vmem:[#allocation82_spill] sm:$0xff] %v14999_v54  ;;  %v5287_v3 = vmax.f32 %v14974_v1, %v14999_v54  ;;  %v5411_v40 = vmax.f32 %v5283_v15, %v14999_v54  ;;  %v5535_v17 = vmax.f32 %v5407_v23, %v14999_v54  ;;  %v15006_v21 = vmax.f32 %v5531_v10, %v14999_v54 }
 0x396   : > { %v6174_v56 = vmax.f32 %v6014_v29, %v6064_v32  ;;  %v6015_v37 = vmax.f32 %v5871_v27, %v5906_v47  ;;  %v5765_v13 = vsel %vm992_vm0, %v16896_v35, %v5764_v28  ;;  %v5909_v8 = vsel %vm1137_vm1, %v16897_v44, %v5908_v14 }
 0x397   : > { %v15012_v55 = vpop.f32.mrb[12].mxu0  ;;  %v5872_v31 = vmax.f32 %v14953_v62, %v5765_v13  ;;  %v6069_v61 = vsel %vm1298_vm2, %v6067_v34, %v6068_v63  ;;  %v6212_v57 = vrot.slane %v14944_v26, 2  ;;  %v5766_v18 = vrot.slane %v14944_v26, 6 }
 0x398   : > { %16904 = vst [vmem:[#allocation83_spill] sm:$0xff] %v15012_v55  ;;  %v15018_v2 = vmax.f32 %v6174_v56, %v6208_v43  ;;  %v5292_v6 = vmax.f32 %v14986_v20, %v15012_v55  ;;  %v5416_v58 = vmax.f32 %v5288_v7, %v15012_v55  ;;  %v5540_v39 = vmax.f32 %v5412_v4, %v15012_v55  ;;  %v15024_v32 = vpop.f32.mrb[13].mxu0 }
 0x399   : > { %16906 = vst [vmem:[#allocation87_spill] sm:$0xff] %v15024_v32  ;;  %v15027_v42 = vmax.f32 %v5536_v41, %v15012_v55  ;;  %v6175_v62 = vmax.f32 %v6015_v37, %v6066_v24  ;;  %v5291_v59 = vmax.f32 %v14999_v54, %v15024_v32  ;;  %v15032_v47 = vmax.f32 %v5287_v3, %v15024_v32 }
 0x39a   : > { %16905 = vst [vmem:[#allocation85_spill] sm:$0xff] %v15018_v2  ;;  %11630 = vmatprep.mubr.f32.mxu1 %v15018_v2  ;;  %v5539_v43 = vmax.f32 %v5411_v40, %v15024_v32  ;;  %v15037_v53 = vmax.f32 %v5535_v17, %v15024_v32  ;;  %v6016_v38 = vmax.f32 %v5872_v31, %v5909_v8  ;;  %v5910_v10 = vrot.slane %v14944_v26, 7 }
 0x39b   : > { %v6213_v11 = vsel %vm1443_vm3, %v6211_v50, %v6212_v57  ;;  %v15040_v15 = vmax.f32 %v6175_v62, %v6210_v16  ;;  %v15042_v23 = vpop.f32.mrb[14].mxu0  ;;  %v5767_v24 = vsel %vm992_vm0, %v5764_v28, %v5766_v18  ;;  %v6071_v29 = vsel %vm1298_vm2, %v6068_v63, %v16899_v46 }
 0x39c   : > { %16908 = vst [vmem:[#allocation90_spill] sm:$0xff] %v15042_v23  ;;  %v6176_v27 = vmax.f32 %v6016_v38, %v6069_v61  ;;  %v5296_v34 = vmax.f32 %v15012_v55, %v15042_v23  ;;  %v15051_v7 = vmax.f32 %v5292_v6, %v15042_v23  ;;  %v5544_v50 = vmax.f32 %v5416_v58, %v15042_v23  ;;  %v15054_v16 = vpop.f32.mrb[15].mxu0 }
 0x39d   : > { %16907 = vst [vmem:[#allocation89_spill] sm:$0xff] %v15040_v15  ;;  %16909 = vst [vmem:[#allocation91_spill] sm:$0xff] %v15054_v16  ;;  %11631 = vmatmul.mubr.f32.gmra.mrb[2].mxu1 %v15040_v15  ;;  %v15058_v28 = vmax.f32 %v5540_v39, %v15042_v23  ;;  %v5873_v4 = vmax.f32 %v14944_v26, %v5767_v24  ;;  %v5911_v63 = vsel %vm1137_vm1, %v5908_v14, %v5910_v10 }
 0x39e   : > { %v6215_v41 = vsel %vm1443_vm3, %v6212_v57, %v16901_v33  ;;  %v15064_v3 = vmax.f32 %v6176_v27, %v6213_v11  ;;  %v5295_v40 = vmax.f32 %v15024_v32, %v15054_v16  ;;  %v15069_v17 = vmax.f32 %v5291_v59, %v15054_v16 }
 0x39f   : > { %v5543_v56 = vmax.f32 %v15032_v47, %v15054_v16  ;;  %v6017_v37 = vmax.f32 %v5873_v4, %v5911_v63  ;;  %v15074_v13 = vmax.f32 %v5539_v43, %v15054_v16  ;;  %v5769_v26 = vrot.slane %v14981_v19, 6  ;;  %v15078_v8 = vpop.f32.mrb[16].mxu0 }
 0x3a0   : > { %16910 = vst [vmem:[#allocation94_spill] sm:$0xff] %v15064_v3  ;;  %v5913_v14 = vrot.slane %v14981_v19, 7  ;;  %16911 = vst [vmem:[#allocation99_spill] sm:$0xff] %v15078_v8  ;;  %11633 = vmatprep.mubr.f32.mxu1 %v15064_v3  ;;  %v6072_v31 = vrot.slane %v14981_v19, 1  ;;  %v6073_v61 = vrot.slane %v14972_v9, 1  ;;  %v6216_v57 = vrot.slane %v14981_v19, 2 }
 0x3a1   : > { %v6217_v18 = vrot.slane %v14972_v9, 2  ;;  %v15085_v6 = vpop.f32.mrb[17].mxu0  ;;  %v6177_v58 = vmax.f32 %v6017_v37, %v6071_v29  ;;  %v5770_v39 = vsel %vm992_vm0, %v16896_v35, %v5769_v26  ;;  %v5300_v59 = vmax.f32 %v15042_v23, %v15078_v8 }
 0x3a2   : > { %16912 = vst [vmem:[#allocation101_spill] sm:$0xff] %v15085_v6  ;;  %v5914_v62 = vsel %vm1137_vm1, %v16897_v44, %v5913_v14  ;;  %v5874_v47 = vmax.f32 %v14981_v19, %v5770_v39  ;;  %v6074_v43 = vsel %vm1298_vm2, %v6072_v31, %v6073_v61  ;;  %v15097_v11 = vmax.f32 %v5296_v34, %v15078_v8 }
 0x3a3   : > { %v6218_v38 = vsel %vm1443_vm3, %v6216_v57, %v6217_v18  ;;  %v15099_v24 = vmax.f32 %v6177_v58, %v6215_v41  ;;  %v5548_v10 = vmax.f32 %v15051_v7, %v15078_v8  ;;  %v15104_v29 = vmax.f32 %v5544_v50, %v15078_v8  ;;  %v15107_v4 = vpop.f32.mrb[18].mxu0 }
 0x3a4   : > { %v5771_v27 = vrot.slane %v14972_v9, 6  ;;  %16914 = vst [vmem:[#allocation61_spill] sm:$0xff] %v15107_v4  ;;  %v6018_v19 = vmax.f32 %v5874_v47, %v5914_v62  ;;  %v5915_v63 = vrot.slane %v14972_v9, 7  ;;  %v6076_v37 = vsel %vm1298_vm2, %v6073_v61, %v16899_v46  ;;  %v15114_v41 = vpop.f32.mrb[19].mxu0 }
 0x3a5   : > { %16913 = vst [vmem:[#allocation60_spill] sm:$0xff] %v15099_v24  ;;  %v6220_v34 = vsel %vm1443_vm3, %v6217_v18, %v16901_v33  ;;  %16915 = vst [vmem:[#allocation62_spill] sm:$0xff] %v15114_v41  ;;  %11634 = vmatmul.mubr.f32.gmra.mrb[4].mxu1 %v15099_v24  ;;  %v5299_v50 = vmax.f32 %v15054_v16, %v15085_v6  ;;  %v15121_v31 = vmax.f32 %v5295_v40, %v15085_v6 }
 0x3a6   : > { %v5772_v7 = vsel %vm992_vm0, %v5769_v26, %v5771_v27  ;;  %v5547_v57 = vmax.f32 %v15069_v17, %v15085_v6  ;;  %v6178_v58 = vmax.f32 %v6018_v19, %v6074_v43  ;;  %v5916_v18 = vsel %vm1137_vm1, %v5913_v14, %v5915_v63 }
 0x3a7   : > { %v5875_v61 = vmax.f32 %v14972_v9, %v5772_v7  ;;  %v15128_v39 = vmax.f32 %v5543_v56, %v15085_v6  ;;  %v5774_v62 = vrot.slane %v15006_v21, 6  ;;  %v5918_v26 = vrot.slane %v15006_v21, 7  ;;  %v15134_v27 = vpop.f32.mrb[20].mxu0 }
 0x3a8   : > { %v6077_v47 = vrot.slane %v15006_v21, 1  ;;  %v6078_v40 = vrot.slane %v14997_v5, 1  ;;  %16916 = vst [vmem:[#allocation63_spill] sm:$0xff] %v15134_v27  ;;  %v15136_v16 = vmax.f32 %v6178_v58, %v6218_v38  ;;  %v6221_v9 = vrot.slane %v15006_v21, 2  ;;  %v15140_v43 = vpop.f32.mrb[21].mxu0 }
 0x3a9   : > { %v6019_v17 = vmax.f32 %v5875_v61, %v5916_v18  ;;  %v6222_v14 = vrot.slane %v14997_v5, 2  ;;  %16917 = vst [vmem:[#allocation64_spill] sm:$0xff] %v15140_v43  ;;  %v5775_v56 = vsel %vm992_vm0, %v16896_v35, %v5774_v62  ;;  %v5919_v19 = vsel %vm1137_vm1, %v16897_v44, %v5918_v26 }
 0x3aa   : > { %v6079_v63 = vsel %vm1298_vm2, %v6077_v47, %v6078_v40  ;;  %v5304_v7 = vmax.f32 %v15078_v8, %v15107_v4  ;;  %11636 = vmatprep.mubr.f32.mxu1 %v15136_v16  ;;  %v5876_v58 = vmax.f32 %v15006_v21, %v5775_v56  ;;  %v15153_v18 = vmax.f32 %v5300_v59, %v15107_v4 }
 0x3ab   : > { %v6179_v38 = vmax.f32 %v6019_v17, %v6076_v37  ;;  %v6223_v61 = vsel %vm1443_vm3, %v6221_v9, %v6222_v14  ;;  %v5552_v23 = vmax.f32 %v15097_v11, %v15107_v4  ;;  %v15158_v32 = vmax.f32 %v5548_v10, %v15107_v4  ;;  %v15162_v55 = vpop.f32.mrb[22].mxu0 }
 0x3ac   : > { %v5776_v47 = vrot.slane %v14997_v5, 6  ;;  %v5920_v8 = vrot.slane %v14997_v5, 7  ;;  %16918 = vst [vmem:[#allocation65_spill] sm:$0xff] %v15162_v55  ;;  %v6020_v21 = vmax.f32 %v5876_v58, %v5919_v19  ;;  %v6081_v17 = vsel %vm1298_vm2, %v6078_v40, %v16899_v46  ;;  %v15170_v9 = vpop.f32.mrb[23].mxu0 }
 0x3ad   : > { %v15164_v37 = vmax.f32 %v6179_v38, %v6220_v34  ;;  %v6225_v59 = vsel %vm1443_vm3, %v6222_v14, %v16901_v33  ;;  %16919 = vst [vmem:[#allocation66_spill] sm:$0xff] %v15170_v9  ;;  %v5303_v56 = vmax.f32 %v15085_v6, %v15114_v41  ;;  %v15177_v54 = vmax.f32 %v5299_v50, %v15114_v41 }
 0x3ae   : > { %v5777_v11 = vsel %vm992_vm0, %v5774_v62, %v5776_v47  ;;  %v5921_v10 = vsel %vm1137_vm1, %v5918_v26, %v5920_v8  ;;  %v6180_v34 = vmax.f32 %v6020_v21, %v6079_v63  ;;  %v5551_v14 = vmax.f32 %v15121_v31, %v15114_v41 }
 0x3af   : > { %11637 = vmatmul.mubr.f32.gmra.mrb[6].mxu1 %v15164_v37  ;;  %v5877_v40 = vmax.f32 %v14997_v5, %v5777_v11  ;;  %v15184_v19 = vmax.f32 %v5547_v57, %v15114_v41  ;;  %v5779_v62 = vrot.slane %v15037_v53, 6  ;;  %v5923_v8 = vrot.slane %v15037_v53, 7  ;;  %v15190_v38 = vpop.f32.mrb[24].mxu0 }
 0x3b0   : > { %v6082_v26 = vrot.slane %v15037_v53, 1  ;;  %v6083_v50 = vrot.slane %v15027_v42, 1  ;;  %16920 = vst [vmem:[#allocation67_spill] sm:$0xff] %v15190_v38  ;;  %v15192_v58 = vmax.f32 %v6180_v34, %v6223_v61  ;;  %v6226_v5 = vrot.slane %v15037_v53, 2  ;;  %v15196_v47 = vpop.f32.mrb[25].mxu0 }
 0x3b1   : > { %v6021_v63 = vmax.f32 %v5877_v40, %v5921_v10  ;;  %v6227_v31 = vrot.slane %v15027_v42, 2  ;;  %16921 = vst [vmem:[#allocation68_spill] sm:$0xff] %v15196_v47  ;;  %v5780_v57 = vsel %vm992_vm0, %v16896_v35, %v5779_v62  ;;  %v5924_v21 = vsel %vm1137_vm1, %v16897_v44, %v5923_v8 }
 0x3b2   : > { %v6084_v11 = vsel %vm1298_vm2, %v6082_v26, %v6083_v50  ;;  %v5308_v6 = vmax.f32 %v15107_v4, %v15134_v27  ;;  %11639 = vmatprep.mubr.f32.mxu1 %v15192_v58  ;;  %v5878_v10 = vmax.f32 %v15037_v53, %v5780_v57  ;;  %v15209_v40 = vmax.f32 %v5304_v7, %v15134_v27 }
 0x3b3   : > { %v6181_v61 = vmax.f32 %v6021_v63, %v6081_v17  ;;  %v6228_v34 = vsel %vm1443_vm3, %v6226_v5, %v6227_v31  ;;  %v5556_v20 = vmax.f32 %v15153_v18, %v15134_v27  ;;  %v15214_v1 = vmax.f32 %v5552_v23, %v15134_v27  ;;  %v15218_v12 = vpop.f32.mrb[26].mxu0 }
 0x3b4   : > { %v5781_v26 = vrot.slane %v15027_v42, 6  ;;  %v5925_v4 = vrot.slane %v15027_v42, 7  ;;  %16922 = vst [vmem:[#allocation69_spill] sm:$0xff] %v15218_v12  ;;  %v6022_v53 = vmax.f32 %v5878_v10, %v5924_v21  ;;  %v6086_v63 = vsel %vm1298_vm2, %v6083_v50, %v16899_v46  ;;  %v15226_v5 = vpop.f32.mrb[27].mxu0 }
 0x3b5   : > { %v15220_v17 = vmax.f32 %v6181_v61, %v6225_v59  ;;  %v6230_v7 = vsel %vm1443_vm3, %v6227_v31, %v16901_v33  ;;  %16923 = vst [vmem:[#allocation70_spill] sm:$0xff] %v15226_v5  ;;  %v5307_v57 = vmax.f32 %v15114_v41, %v15140_v43  ;;  %v15233_v51 = vmax.f32 %v5303_v56, %v15140_v43 }
 0x3b6   : > { %v5782_v23 = vsel %vm992_vm0, %v5779_v62, %v5781_v26  ;;  %v5926_v18 = vsel %vm1137_vm1, %v5923_v8, %v5925_v4  ;;  %v6182_v59 = vmax.f32 %v6022_v53, %v6084_v11  ;;  %v5555_v31 = vmax.f32 %v15177_v54, %v15140_v43 }
 0x3b7   : > { %11640 = vmatmul.mubr.f32.gmra.mrb[8].mxu1 %v15220_v17  ;;  %v5879_v50 = vmax.f32 %v15027_v42, %v5782_v23  ;;  %v15240_v21 = vmax.f32 %v5551_v14, %v15140_v43  ;;  %v5784_v62 = vrot.slane %v15074_v13, 6  ;;  %v5928_v4 = vrot.slane %v15074_v13, 7  ;;  %v15246_v61 = vpop.f32.mrb[28].mxu0 }
 0x3b8   : > { %v6087_v8 = vrot.slane %v15074_v13, 1  ;;  %v6088_v56 = vrot.slane %v15058_v28, 1  ;;  %16924 = vst [vmem:[#allocation71_spill] sm:$0xff] %v15246_v61  ;;  %v15248_v10 = vmax.f32 %v6182_v59, %v6228_v34  ;;  %v6231_v42 = vrot.slane %v15074_v13, 2  ;;  %v15252_v26 = vpop.f32.mrb[29].mxu0 }
 0x3b9   : > { %v6023_v11 = vmax.f32 %v5879_v50, %v5926_v18  ;;  %v6232_v54 = vrot.slane %v15058_v28, 2  ;;  %16925 = vst [vmem:[#allocation81_spill] sm:$0xff] %v15252_v26  ;;  %v5785_v14 = vsel %vm992_vm0, %v16896_v35, %v5784_v62  ;;  %v5929_v53 = vsel %vm1137_vm1, %v16897_v44, %v5928_v4 }
 0x3ba   : > { %v6089_v23 = vsel %vm1298_vm2, %v6087_v8, %v6088_v56  ;;  %v5312_v41 = vmax.f32 %v15134_v27, %v15162_v55  ;;  %11642 = vmatprep.mubr.f32.mxu1 %v15248_v10  ;;  %v5880_v18 = vmax.f32 %v15074_v13, %v5785_v14  ;;  %v15265_v50 = vmax.f32 %v5308_v6, %v15162_v55 }
 0x3bb   : > { %v6183_v34 = vmax.f32 %v6023_v11, %v6086_v63  ;;  %v6233_v59 = vsel %vm1443_vm3, %v6231_v42, %v6232_v54  ;;  %v5560_v25 = vmax.f32 %v15209_v40, %v15162_v55  ;;  %v15270_v36 = vmax.f32 %v5556_v20, %v15162_v55  ;;  %v15274_v45 = vpop.f32.mrb[30].mxu0 }
 0x3bc   : > { %v5786_v8 = vrot.slane %v15058_v28, 6  ;;  %v5930_v27 = vrot.slane %v15058_v28, 7  ;;  %16926 = vst [vmem:[#allocation72_spill] sm:$0xff] %v15274_v45  ;;  %v6024_v13 = vmax.f32 %v5880_v18, %v5929_v53  ;;  %v6091_v11 = vsel %vm1298_vm2, %v6088_v56, %v16899_v46  ;;  %v15280_v6 = vpop.f32.mrb[31].mxu0 }
 0x3bd   : > { %v15276_v63 = vmax.f32 %v6183_v34, %v6230_v7  ;;  %16927 = vst [vmem:[#allocation54_spill] sm:$0xff] %v15280_v6  ;;  %v5311_v20 = vmax.f32 %v15140_v43, %v15170_v9  ;;  %v5435_v14 = vmax.f32 %v5307_v57, %v15170_v9  ;;  %v5559_v53 = vmax.f32 %v15233_v51, %v15170_v9 }
 0x3be   : > { %v5787_v42 = vsel %vm992_vm0, %v5784_v62, %v5786_v8  ;;  %v5931_v40 = vsel %vm1137_vm1, %v5928_v4, %v5930_v27  ;;  %v6184_v22 = vmax.f32 %v6024_v13, %v6089_v23  ;;  %v15292_v56 = vmax.f32 %v5555_v31, %v15170_v9 }
 0x3bf   : > { %11643 = vmatmul.mubr.f32.gmra.mrb[10].mxu1 %v15276_v63  ;;  %v5881_v7 = vmax.f32 %v15058_v28, %v5787_v42  ;;  %v5789_v62 = vrot.slane %v15128_v39, 6  ;;  %v5933_v27 = vrot.slane %v15128_v39, 7  ;;  %v6092_v4 = vrot.slane %v15128_v39, 1 }
 0x3c0   : > { %v6093_v34 = vrot.slane %v15104_v29, 1  ;;  %v15298_v57 = vmax.f32 %v6184_v22, %v6233_v59  ;;  %v6236_v23 = vrot.slane %v15128_v39, 2  ;;  %v6237_v28 = vrot.slane %v15104_v29, 2 }
 0x3c1   : > { %v6025_v18 = vmax.f32 %v5881_v7, %v5931_v40  ;;  %v6235_v51 = vsel %vm1443_vm3, %v6232_v54, %v16901_v33  ;;  %v5790_v31 = vsel %vm992_vm0, %v16896_v35, %v5789_v62  ;;  %v15308_v13 = vmax.f32 %v5312_v41, %v15190_v38 }
 0x3c2   : > { %v6094_v8 = vsel %vm1298_vm2, %v6092_v4, %v6093_v34  ;;  %11645 = vmatprep.mubr.f32.mxu1 %v15298_v57  ;;  %v5882_v59 = vmax.f32 %v15128_v39, %v5790_v31  ;;  %v6238_v42 = vsel %vm1443_vm3, %v6236_v23, %v6237_v28  ;;  %v5564_v40 = vmax.f32 %v15265_v50, %v15190_v38 }
 0x3c3   : > { %v6185_v22 = vmax.f32 %v6025_v18, %v6091_v11  ;;  %v5934_v54 = vsel %vm1137_vm1, %v16897_v44, %v5933_v27  ;;  %v15318_v7 = vmax.f32 %v5560_v25, %v15190_v38  ;;  %v5791_v4 = vrot.slane %v15104_v29, 6 }
 0x3c4   : > { %v5935_v41 = vrot.slane %v15104_v29, 7  ;;  %v6026_v11 = vmax.f32 %v5882_v59, %v5934_v54  ;;  %v6096_v39 = vsel %vm1298_vm2, %v6093_v34, %v16899_v46  ;;  %v15327_v18 = vmax.f32 %v5311_v20, %v15196_v47 }
 0x3c5   : > { %v15322_v43 = vmax.f32 %v6185_v22, %v6235_v51  ;;  %v5792_v50 = vsel %vm992_vm0, %v5789_v62, %v5791_v4  ;;  %v5563_v25 = vmax.f32 %v5435_v14, %v15196_v47  ;;  %v15333_v31 = vmax.f32 %v5559_v53, %v15196_v47 }
 0x3c6   : > { %v5936_v23 = vsel %vm1137_vm1, %v5933_v27, %v5935_v41  ;;  %v6186_v51 = vmax.f32 %v6026_v11, %v6094_v8  ;;  %v5883_v22 = vmax.f32 %v15104_v29, %v5792_v50  ;;  %v5794_v59 = vrot.slane %v15184_v19, 6 }
 0x3c7   : > { %11646 = vmatmul.mubr.f32.gmra.mrb[12].mxu1 %v15322_v43  ;;  %v5938_v34 = vrot.slane %v15184_v19, 7  ;;  %v6097_v20 = vrot.slane %v15184_v19, 1  ;;  %v6098_v62 = vrot.slane %v15158_v32, 1  ;;  %v6241_v27 = vrot.slane %v15184_v19, 2 }
 0x3c8   : > { %v6242_v14 = vrot.slane %v15158_v32, 2  ;;  %v15343_v54 = vmax.f32 %v6186_v51, %v6238_v42  ;;  %v6027_v53 = vmax.f32 %v5883_v22, %v5936_v23  ;;  %v6240_v8 = vsel %vm1443_vm3, %v6237_v28, %v16901_v33 }
 0x3c9   : > { %v5795_v29 = vsel %vm992_vm0, %v16896_v35, %v5794_v59  ;;  %v6099_v41 = vsel %vm1298_vm2, %v6097_v20, %v6098_v62  ;;  %v15353_v50 = vmax.f32 %v5564_v40, %v15218_v12  ;;  %v5939_v23 = vsel %vm1137_vm1, %v16897_v44, %v5938_v34 }
 0x3ca   : > { %v5884_v4 = vmax.f32 %v15184_v19, %v5795_v29  ;;  %v6243_v11 = vsel %vm1443_vm3, %v6241_v27, %v6242_v14  ;;  %11648 = vmatprep.mubr.f32.mxu1 %v15343_v54  ;;  %v6187_v42 = vmax.f32 %v6027_v53, %v6096_v39  ;;  %v5796_v28 = vrot.slane %v15158_v32, 6 }
 0x3cb   : > { %v5940_v51 = vrot.slane %v15158_v32, 7  ;;  %v6101_v19 = vsel %vm1298_vm2, %v6098_v62, %v16899_v46  ;;  %v15363_v20 = vmax.f32 %v5563_v25, %v15226_v5  ;;  %v5799_v40 = vrot.slane %v15240_v21, 6 }
 0x3cc   : > { %v6028_v22 = vmax.f32 %v5884_v4, %v5939_v23  ;;  %v15366_v27 = vmax.f32 %v6187_v42, %v6240_v8  ;;  %v5797_v39 = vsel %vm992_vm0, %v5794_v59, %v5796_v28  ;;  %v5943_v29 = vrot.slane %v15240_v21, 7 }
 0x3cd   : > { %v5941_v53 = vsel %vm1137_vm1, %v5938_v34, %v5940_v51  ;;  %v5885_v48 = vmax.f32 %v15158_v32, %v5797_v39  ;;  %v5800_v4 = vsel %vm992_vm0, %v16896_v35, %v5799_v40  ;;  %v6102_v62 = vrot.slane %v15240_v21, 1 }
 0x3ce   : > { %v6188_v52 = vmax.f32 %v6028_v22, %v6099_v41  ;;  %11649 = vmatmul.mubr.f32.gmra.mrb[14].mxu1 %v15366_v27  ;;  %v5886_v25 = vmax.f32 %v15240_v21, %v5800_v4  ;;  %v5944_v8 = vsel %vm1137_vm1, %v16897_v44, %v5943_v29  ;;  %v6103_v59 = vrot.slane %v15214_v1, 1 }
 0x3cf   : > { %v6246_v34 = vrot.slane %v15240_v21, 2  ;;  %v6029_v41 = vmax.f32 %v5885_v48, %v5941_v53  ;;  %v6247_v32 = vrot.slane %v15214_v1, 2  ;;  %v5568_v23 = vmax.f32 %v15308_v13, %v15218_v12 }
 0x3d0   : > { %v15381_v42 = vmax.f32 %v6188_v52, %v6243_v11  ;;  %v6030_v28 = vmax.f32 %v5886_v25, %v5944_v8  ;;  %v6104_v51 = vsel %vm1298_vm2, %v6102_v62, %v6103_v59  ;;  %v5801_v22 = vrot.slane %v15214_v1, 6 }
 0x3d1   : > { %v5945_v39 = vrot.slane %v15214_v1, 7  ;;  %v6189_v4 = vmax.f32 %v6029_v41, %v6101_v19  ;;  %v6248_v21 = vsel %vm1443_vm3, %v6246_v34, %v6247_v32  ;;  %v15392_v52 = vmax.f32 %v5568_v23, %v15246_v61 }
 0x3d2   : > { %11651 = vmatprep.mubr.f32.mxu1 %v15381_v42  ;;  %v6245_v48 = vsel %vm1443_vm3, %v6242_v14, %v16901_v33  ;;  %v6190_v11 = vmax.f32 %v6030_v28, %v6104_v51  ;;  %v5802_v13 = vsel %vm992_vm0, %v5799_v40, %v5801_v22  ;;  %v5567_v19 = vmax.f32 %v15327_v18, %v15226_v5 }
 0x3d3   : > { %v5946_v53 = vsel %vm1137_vm1, %v5943_v29, %v5945_v39  ;;  %v15398_v62 = vmax.f32 %v6189_v4, %v6245_v48  ;;  %v5887_v25 = vmax.f32 %v15214_v1, %v5802_v13  ;;  %v5804_v34 = vrot.slane %v15292_v56, 6 }
 0x3d4   : > { %v15401_v8 = vmax.f32 %v6190_v11, %v6248_v21  ;;  %v5948_v41 = vrot.slane %v15292_v56, 7  ;;  %v6107_v40 = vrot.slane %v15292_v56, 1  ;;  %v6108_v29 = vrot.slane %v15270_v36, 1 }
 0x3d5   : > { %11652 = vmatmul.mubr.f32.gmra.mrb[16].mxu1 %v15398_v62  ;;  %v6031_v14 = vmax.f32 %v5887_v25, %v5946_v53  ;;  %v6251_v23 = vrot.slane %v15292_v56, 2  ;;  %v6106_v1 = vsel %vm1298_vm2, %v6103_v59, %v16899_v46  ;;  %v15415_v18 = vmax.f32 %v5567_v19, %v15252_v26 }
 0x3d6   : > { %11654 = vmatprep.mubr.f32.mxu1 %v15401_v8  ;;  %v5805_v28 = vsel %vm992_vm0, %v16896_v35, %v5804_v34  ;;  %v6252_v51 = vrot.slane %v15270_v36, 2  ;;  %v6109_v4 = vsel %vm1298_vm2, %v6107_v40, %v6108_v29  ;;  %v5316_v21 = vmax.f32 %v15162_v55, %v15190_v38 }
 0x3d7   : > { %v6191_v22 = vmax.f32 %v6031_v14, %v6106_v1  ;;  %v5888_v39 = vmax.f32 %v15292_v56, %v5805_v28  ;;  %v6250_v48 = vsel %vm1443_vm3, %v6247_v32, %v16901_v33  ;;  %v5949_v59 = vsel %vm1137_vm1, %v16897_v44, %v5948_v41 }
 0x3d8   : > { %v6253_v11 = vsel %vm1443_vm3, %v6251_v23, %v6252_v51  ;;  %v5320_v13 = vmax.f32 %v15190_v38, %v15218_v12  ;;  %v5324_v56 = vmax.f32 %v15218_v12, %v15246_v61  ;;  %v5444_v19 = vmax.f32 %v5316_v21, %v15218_v12 }
 0x3d9   : > { %v15431_v53 = vmax.f32 %v6191_v22, %v6250_v48  ;;  %v6032_v25 = vmax.f32 %v5888_v39, %v5949_v59  ;;  %v5806_v32 = vrot.slane %v15270_v36, 6  ;;  %v5950_v40 = vrot.slane %v15270_v36, 7 }
 0x3da   : > { %v5448_v14 = vmax.f32 %v5320_v13, %v15246_v61  ;;  %v15441_v1 = vmax.f32 %v5324_v56, %v15274_v45  ;;  %v5572_v28 = vmax.f32 %v5444_v19, %v15246_v61  ;;  %v5315_v48 = vmax.f32 %v15170_v9, %v15196_v47 }
 0x3db   : > { %11655 = vmatmul.mubr.f32.gmra.mrb[18].mxu1 %v15431_v53  ;;  %v6192_v23 = vmax.f32 %v6032_v25, %v6109_v4  ;;  %v5807_v39 = vsel %vm992_vm0, %v5804_v34, %v5806_v32  ;;  %v5951_v21 = vsel %vm1137_vm1, %v5948_v41, %v5950_v40  ;;  %v5319_v25 = vmax.f32 %v15196_v47, %v15226_v5 }
 0x3dc   : > { %v5576_v22 = vmax.f32 %v5448_v14, %v15274_v45  ;;  %v15452_v13 = vmax.f32 %v5572_v28, %v15274_v45  ;;  %v5889_v4 = vmax.f32 %v15270_v36, %v5807_v39  ;;  %v5323_v56 = vmax.f32 %v15226_v5, %v15252_v26 }
 0x3dd   : > { %v15449_v59 = vmax.f32 %v6192_v23, %v6253_v11  ;;  %v5443_v34 = vmax.f32 %v5315_v48, %v15226_v5  ;;  %v6111_v14 = vsel %vm1298_vm2, %v6108_v29, %v16899_v46  ;;  %v5447_v36 = vmax.f32 %v5319_v25, %v15252_v26 }
 0x3de   : > { %v6033_v41 = vmax.f32 %v5889_v4, %v5951_v21  ;;  %v15467_v40 = vmax.f32 %v5323_v56, %v15280_v6  ;;  %v6255_v28 = vsel %vm1443_vm3, %v6252_v51, %v16901_v33  ;;  %v5809_v39 = vrot.slane %v15333_v31, 6 }
 0x3df   : > { %11657 = vmatprep.mubr.f32.mxu1 %v15449_v59  ;;  %v5571_v23 = vmax.f32 %v5443_v34, %v15252_v26  ;;  %v6112_v21 = vrot.slane %v15333_v31, 1  ;;  %v6113_v48 = vrot.slane %v15318_v7, 1  ;;  %v15475_v4 = vmax.f32 %v5576_v22, -3e+38 }
 0x3e0   : > { %v6193_v32 = vmax.f32 %v6033_v41, %v6111_v14  ;;  %v5575_v25 = vmax.f32 %v5447_v36, %v15280_v6  ;;  %v5810_v51 = vsel %vm992_vm0, %v16896_v35, %v5809_v39  ;;  %v5953_v41 = vrot.slane %v15333_v31, 7 }
 0x3e1   : > { %v15481_v56 = vmax.f32 %v5571_v23, %v15280_v6  ;;  %v6114_v14 = vsel %vm1298_vm2, %v6112_v21, %v6113_v48  ;;  %v6256_v19 = vrot.slane %v15333_v31, 2  ;;  %v6257_v34 = vrot.slane %v15318_v7, 2 }
 0x3e2   : > { %v15477_v29 = vmax.f32 %v6193_v32, %v6255_v28  ;;  %v15491_v32 = vmax.f32 %v5575_v25, -3e+38  ;;  %v5890_v28 = vmax.f32 %v15333_v31, %v5810_v51  ;;  %v5954_v6 = vsel %vm1137_vm1, %v16897_v44, %v5953_v41 }
 0x3e3   : > { %v16583_v36 = vrot.slane %v15481_v56, 6  ;;  %v6258_v26 = vsel %vm1443_vm3, %v6256_v19, %v6257_v34  ;;  %v5955_v5 = vrot.slane %v15318_v7, 7  ;;  %v5814_v45 = vrot.slane %v15363_v20, 6 }
 0x3e4   : > { %11658 = vmatmul.mubr.f32.gmra.mrb[20].mxu1 %v15477_v29  ;;  %v16587_v22 = vrot.slane %v15491_v32, 6  ;;  %v6034_v31 = vmax.f32 %v5890_v28, %v5954_v6  ;;  %v6117_v51 = vrot.slane %v15363_v20, 1  ;;  %v6118_v28 = vrot.slane %v15353_v50, 1 }
 0x3e5   : > { %v15504_v25 = vsel %vm992_vm0, %v16896_v35, %v16583_v36  ;;  %v6116_v36 = vsel %vm1298_vm2, %v6113_v48, %v16899_v46  ;;  %v5956_v19 = vsel %vm1137_vm1, %v5953_v41, %v5955_v5  ;;  %v6261_v61 = vrot.slane %v15363_v20, 2 }
 0x3e6   : > { %v15516_v21 = vsel %vm992_vm0, %v16896_v35, %v16587_v22  ;;  %v5896_v23 = vmax.f32 %v15481_v56, %v15504_v25  ;;  %v5811_v22 = vrot.slane %v15318_v7, 6  ;;  %v6194_v11 = vmax.f32 %v6034_v31, %v6114_v14 }
 0x3e7   : > { %v5958_v25 = vrot.slane %v15363_v20, 7  ;;  %v6260_v48 = vsel %vm1443_vm3, %v6257_v34, %v16901_v33  ;;  %v5815_v14 = vsel %vm992_vm0, %v16896_v35, %v5814_v45  ;;  %v6262_v5 = vrot.slane %v15353_v50, 2 }
 0x3e8   : > { %v5812_v6 = vsel %vm992_vm0, %v5809_v39, %v5811_v22  ;;  %v15538_v12 = vmax.f32 %v6194_v11, %v6258_v26  ;;  %v5892_v31 = vmax.f32 %v15363_v20, %v5815_v14  ;;  %v6119_v39 = vsel %vm1298_vm2, %v6117_v51, %v6118_v28 }
 0x3e9   : > { %v5891_v47 = vmax.f32 %v15318_v7, %v5812_v6  ;;  %v5816_v41 = vrot.slane %v15353_v50, 6  ;;  %v5959_v7 = vsel %vm1137_vm1, %v16897_v44, %v5958_v25  ;;  %v5960_v11 = vrot.slane %v15353_v50, 7 }
 0x3ea   : > { %11660 = vmatprep.mubr.f32.mxu1 %v15538_v12  ;;  %v16928_v34 = vrot.slane %v15415_v18, 6  ;;  %v6036_v20 = vmax.f32 %v5892_v31, %v5959_v7  ;;  %v6263_v51 = vsel %vm1443_vm3, %v6261_v61, %v6262_v5  ;;  %v6121_v14 = vsel %vm1298_vm2, %v6118_v28, %v16899_v46 }
 0x3eb   : > { %v6035_v26 = vmax.f32 %v5891_v47, %v5956_v19  ;;  %v5817_v6 = vsel %vm992_vm0, %v5814_v45, %v5816_v41  ;;  %v5961_v19 = vsel %vm1137_vm1, %v5958_v25, %v5960_v11  ;;  %v16929_v49 = vrot.slane %v15415_v18, 7 }
 0x3ec   : > { %v5820_v22 = vsel %vm992_vm0, %v16896_v35, %v16928_v34  ;;  %v5893_v47 = vmax.f32 %v15353_v50, %v5817_v6  ;;  %v6196_v55 = vmax.f32 %v6036_v20, %v6119_v39  ;;  %v6122_v61 = vrot.slane %v15415_v18, 1 }
 0x3ed   : > { %v6195_v38 = vmax.f32 %v6035_v26, %v6116_v36  ;;  %v5894_v9 = vmax.f32 %v15415_v18, %v5820_v22  ;;  %v5964_v31 = vsel %vm1137_vm1, %v16897_v44, %v16929_v49  ;;  %v6123_v45 = vrot.slane %v15392_v52, 1 }
 0x3ee   : > { %v6037_v28 = vmax.f32 %v5893_v47, %v5961_v19  ;;  %v6266_v50 = vrot.slane %v15415_v18, 2  ;;  %v15573_v26 = vmax.f32 %v6196_v55, %v6263_v51  ;;  %v6267_v39 = vrot.slane %v15392_v52, 2 }
 0x3ef   : > { %v15570_v41 = vmax.f32 %v6195_v38, %v6260_v48  ;;  %v6038_v36 = vmax.f32 %v5894_v9, %v5964_v31  ;;  %v6124_v25 = vsel %vm1298_vm2, %v6122_v61, %v6123_v45  ;;  %v16930_v7 = vrot.slane %v15392_v52, 6 }
 0x3f0   : > { %v16931_v49 = vmov %v16928_v34  ;;  %v6197_v38 = vmax.f32 %v6037_v28, %v6121_v14  ;;  %v16932_v34 = vrot.slane %v15392_v52, 7  ;;  %v16933_v55 = vrot.slane %v15415_v18, 7 }
 0x3f1   : > { %v5822_v11 = vsel %vm992_vm0, %v16931_v49, %v16930_v7  ;;  %11661 = vmatmul.mubr.f32.gmra.mrb[22].mxu1 %v15570_v41  ;;  %v6198_v48 = vmax.f32 %v6038_v36, %v6124_v25  ;;  %v6265_v20 = vsel %vm1443_vm3, %v6262_v5, %v16901_v33  ;;  %v6268_v51 = vsel %vm1443_vm3, %v6266_v50, %v6267_v39 }
 0x3f2   : > { %v5895_v9 = vmax.f32 %v15392_v52, %v5822_v11  ;;  %v5966_v22 = vsel %vm1137_vm1, %v16933_v55, %v16932_v34  ;;  %11663 = vmatprep.mubr.f32.mxu1 %v15573_v26  ;;  %v6126_v6 = vsel %vm1298_vm2, %v6123_v45, %v16899_v46  ;;  %v16934_v14 = vrot.slane %v15481_v56, 7 }
 0x3f3   : > { %v15599_v52 = vmax.f32 %v6197_v38, %v6265_v20  ;;  %v15601_v18 = vmax.f32 %v6198_v48, %v6268_v51  ;;  %v16935_v61 = vrot.slane %v15452_v13, 1  ;;  %v16936_v5 = vrot.slane %v15481_v56, 1 }
 0x3f4   : > { %v5969_v47 = vsel %vm1137_vm1, %v16897_v44, %v16934_v14  ;;  %v6039_v19 = vmax.f32 %v5895_v9, %v5966_v22  ;;  %v6272_v36 = vrot.slane %v15452_v13, 2  ;;  %v16937_v45 = vrot.slane %v15452_v13, 6 }
 0x3f5   : > { %v6040_v31 = vmax.f32 %v5896_v23, %v5969_v47  ;;  %v6129_v28 = vsel %vm1298_vm2, %v16936_v5, %v16935_v61  ;;  %v16938_v50 = vrot.slane %v15481_v56, 6  ;;  %v16939_v7 = vrot.slane %v15452_v13, 7  ;;  %11664 = vmatmul.mubr.f32.gmra.mrb[24].mxu1 %v15599_v52 }
 0x3f6   : > { %v16940_v49 = vmov %v16934_v14  ;;  %v6276_v11 = vrot.slane %v15491_v32, 2  ;;  %v6199_v38 = vmax.f32 %v6039_v19, %v6126_v6  ;;  %11666 = vmatprep.mubr.f32.mxu1 %v15601_v18  ;;  %v6270_v34 = vsel %vm1443_vm3, %v6267_v39, %v16901_v33  ;;  %v7217_v19 = vld [vmem:[#allocation7 + $0x580] sm:$0xff] }
 0x3f7   : > { %v5827_v25 = vsel %vm992_vm0, %v16938_v50, %v16937_v45  ;;  %v5971_v23 = vsel %vm1137_vm1, %v16940_v49, %v16939_v7  ;;  %v6200_v48 = vmax.f32 %v6040_v31, %v6129_v28  ;;  %v16941_v55 = vrot.slane %v15481_v56, 2  ;;  %v7218_v31 = vld [vmem:[#allocation7 + $0x588] sm:$0xff] }
 0x3f8   : > { %v5897_v9 = vmax.f32 %v15452_v13, %v5827_v25  ;;  %v16942_v20 = vrot.slane %v15491_v32, 7  ;;  %v16943_v14 = vrot.slane %v15475_v4, 1  ;;  %v16944_v6 = vrot.slane %v15491_v32, 1 }
 0x3f9   : > { %v6273_v22 = vsel %vm1443_vm3, %v16941_v55, %v6272_v36  ;;  %v15637_v61 = vmax.f32 %v6199_v38, %v6270_v34  ;;  %v16946_v5 = vmax.f32 %v15491_v32, %v15516_v21  ;;  %v16947_v45 = vrot.slane %v15452_v13, 1 }
 0x3fa   : > { %v5974_v51 = vsel %vm1137_vm1, %v16897_v44, %v16942_v20  ;;  %v6134_v47 = vsel %vm1298_vm2, %v16944_v6, %v16943_v14  ;;  %v15639_v39 = vmax.f32 %v6200_v48, %v6273_v22  ;;  %v6041_v56 = vmax.f32 %v5897_v9, %v5971_v23 }
 0x3fb   : > { %v6042_v28 = vmax.f32 %v16946_v5, %v5974_v51  ;;  %v6131_v50 = vsel %vm1298_vm2, %v16947_v45, %v16899_v46  ;;  %v6277_v25 = vrot.slane %v15475_v4, 2  ;;  %v16948_v7 = vrot.slane %v15475_v4, 6  ;;  %11667 = vmatmul.mubr.f32.gmra.mrb[26].mxu1 %v15637_v61  ;;  %v7221_v45 = vld [vmem:[#allocation7 + $0x5a0] sm:$0xff] }
 0x3fc   : > { %16945 = vst [vmem:[#allocation55_spill] sm:$0xff] %v15639_v39  ;;  %v16949_v49 = vrot.slane %v15491_v32, 6  ;;  %v16950_v48 = vrot.slane %v15475_v4, 7  ;;  %v16951_v23 = vmov %v16942_v20  ;;  %v6201_v9 = vmax.f32 %v6041_v56, %v6131_v50  ;;  %11669 = vmatprep.mubr.f32.mxu1 %v15639_v39  ;;  %v7220_v56 = vld [vmem:[#allocation7 + $0x598] sm:$0xff]  ;;  %v7222_v50 = vld [vmem:[#allocation7 + $0x5a8] sm:$0xff] }
 0x3fd   : > { %v6202_v13 = vmax.f32 %v6042_v28, %v6134_v47  ;;  %v12667_v55 = vpack.c.bf16 %v7218_v31, %v7217_v19  ;;  %v6275_v22 = vsel %vm1443_vm3, %v6272_v36, %v16901_v33  ;;  %v6278_v20 = vsel %vm1443_vm3, %v6276_v11, %v6277_v25  ;;  %v7219_v31 = vld [vmem:[#allocation7 + $0x590] sm:$0xff] }
 0x3fe   : > { %v5832_v38 = vsel %vm992_vm0, %v16949_v49, %v16948_v7  ;;  %v5976_v21 = vsel %vm1137_vm1, %v16951_v23, %v16950_v48  ;;  %v15665_v51 = vmax.f32 %v6201_v9, %v6275_v22  ;;  %v16954_v6 = vrot.slane %v15475_v4, 1  ;;  %v7223_v23 = vld [vmem:[#allocation7 + $0x5b0] sm:$0xff] }
 0x3ff   : > { %v5899_v34 = vmax.f32 %v15475_v4, %v5832_v38  ;;  %v15667_v14 = vmax.f32 %v6202_v13, %v6278_v20  ;;  %12668 = vmatprep.subr.bf16.mxu1 %v12667_v55  ;;  %v6280_v36 = vsel %vm1443_vm3, %v6277_v25, %v16901_v33  ;;  %v6500_v5 = vrot.slane %v15018_v2, 7 }
 0x400   : > { %16952 = vst [vmem:[#allocation56_spill] sm:$0xff] %v15665_v51  ;;  %v6136_v47 = vsel %vm1298_vm2, %v16954_v6, %v16899_v46  ;;  %11670 = vmatmul.mubr.f32.gmra.mrb[28].mxu1 %v15665_v51  ;;  %v12671_v4 = vpack.c.bf16 %v7220_v56, %v7219_v31  ;;  %v6502_v28 = vrot.slane %v15040_v15, 7  ;;  %v6505_v7 = vrot.slane %v15064_v3, 7  ;;  %v7226_v6 = vld [vmem:[#allocation7 + $0x5c8] sm:$0xff] }
 0x401   : > { %16953 = vst [vmem:[#allocation57_spill] sm:$0xff] %v15667_v14  ;;  %v6043_v32 = vmax.f32 %v5899_v34, %v5976_v21  ;;  %11672 = vmatprep.mubr.f32.mxu1 %v15667_v14  ;;  %v15686_v25 = vsel %vm1137_vm1, %v16863_v60, %v6500_v5  ;;  %v12675_v49 = vpack.c.bf16 %v7222_v50, %v7221_v45  ;;  %v6507_v48 = vrot.slane %v15099_v24, 7  ;;  %v7224_v21 = vld [vmem:[#allocation7 + $0x5b8] sm:$0xff] }
 0x402   : > { %v15691_v38 = vsel %vm1137_vm1, %v6500_v5, %v6502_v28  ;;  %v15697_v9 = vsel %vm1137_vm1, %v16863_v60, %v6505_v7  ;;  %v6510_v13 = vrot.slane %v15136_v16, 7  ;;  %v12679_v34 = vpack.c.bf16 %v7224_v21, %v7223_v23  ;;  %v7227_v5 = vld [vmem:[#allocation7 + $0x5d0] sm:$0xff]  ;;  %v7229_v21 = vld [vmem:[#allocation7 + $0x5e0] sm:$0xff] }
 0x403   : > { %v6203_v19 = vmax.f32 %v6043_v32, %v6136_v47  ;;  %16956 = vst [vmem:[#allocation84_spill] sm:$0xff] %v15697_v9  ;;  %v15703_v22 = vsel %vm1137_vm1, %v6505_v7, %v6507_v48  ;;  %v6512_v20 = vrot.slane %v15164_v37, 7  ;;  %v7225_v32 = vld [vmem:[#allocation7 + $0x5c0] sm:$0xff]  ;;  %v6517_v56 = vrot.slane %v15220_v17, 7 }
 0x404   : > { %16957 = vst [vmem:[#allocation86_spill] sm:$0xff] %v15703_v22  ;;  %v15709_v47 = vsel %vm1137_vm1, %v16863_v60, %v6510_v13  ;;  %v6520_v45 = vrot.slane %v15248_v10, 7  ;;  %v5580_v50 = vmax.f32 %v15441_v1, -3e+38  ;;  %v6522_v23 = vrot.slane %v15276_v63, 7 }
 0x405   : > { %v15677_v11 = vmax.f32 %v6203_v19, %v6280_v36  ;;  %16958 = vst [vmem:[#allocation88_spill] sm:$0xff] %v15709_v47  ;;  %v6515_v19 = vrot.slane %v15192_v58, 7  ;;  %v15716_v31 = vsel %vm1137_vm1, %v6510_v13, %v6512_v20  ;;  %v7230_v13 = vld [vmem:[#allocation7 + $0x5e8] sm:$0xff]  ;;  %v6525_v1 = vrot.slane %v15298_v57, 7 }
 0x406   : > { %16959 = vst [vmem:[#allocation92_spill] sm:$0xff] %v15716_v31  ;;  %v12691_v20 = vpack.c.bf16 %v7230_v13, %v7229_v21 }
 0x407   : > { %16955 = vst [vmem:[#allocation59_spill] sm:$0xff] %v15677_v11  ;;  %11673 = vmatmul.mubr.f32.gmra.mrb[30].mxu1 %v15677_v11  ;;  %v15722_v28 = vsel %vm1137_vm1, %v16863_v60, %v6515_v19  ;;  %v15729_v48 = vsel %vm1137_vm1, %v6515_v19, %v6517_v56  ;;  %v6527_v19 = vrot.slane %v15322_v43, 7  ;;  %v7231_v56 = vld [vmem:[#allocation7 + $0x5f0] sm:$0xff] }
 0x408   : > { %11707 = vmatprep.mubr.f32.mxu1 %v16863_v60  ;;  %16960 = vst [vmem:[#allocation93_spill] sm:$0xff] %v15722_v28  ;;  %16961 = vst [vmem:[#allocation95_spill] sm:$0xff] %v15729_v48 }
 0x40b   : > { %11708 = vmatmul.mubr.f32.vlgmr.msra.gmra.mrb[0].mxu1 %v16863_v60 }
 0x40c   : > { %11710 = vmatprep.mubr.f32.mxu1 %v15686_v25  ;;  %12670 = vmatpush3.bf16.msra.mxu1 %v12667_v55  ;;  %v5579_v55 = vmax.f32 %v15467_v40, -3e+38  ;;  %v12683_v40 = vpack.c.bf16 %v7226_v6, %v7225_v32  ;;  %v15744_v6 = vsel %vm1137_vm1, %v6520_v45, %v6522_v23 }
 0x40d   : > { %12672 = vmatprep.subr.bf16.mxu1 %v12671_v4  ;;  %16963 = vst [vmem:[#allocation97_spill] sm:$0xff] %v15744_v6 }
 0x40e   : > { %v15713_v36 = vmax.f32 %v5579_v55, -3e+38  ;;  %v15735_v55 = vsel %vm1137_vm1, %v16863_v60, %v6520_v45 }
 0x40f   : > { %11711 = vmatmul.mubr.f32.gmra.mrb[2].mxu1 %v15691_v38  ;;  %16962 = vst [vmem:[#allocation96_spill] sm:$0xff] %v15735_v55 }
 0x410   : > { %11713 = vmatprep.mubr.f32.mxu1 %v15697_v9  ;;  %12674 = vmatpush3.bf16.msra.mxu1 %v12671_v4  ;;  %v7228_v4 = vld [vmem:[#allocation7 + $0x5d8] sm:$0xff]  ;;  %v5978_v45 = vrot.slane %v15713_v36, 7  ;;  %v6137_v13 = vrot.slane %v15713_v36, 1  ;;  %v6281_v0 = vrot.slane %v15713_v36, 2 }
 0x411   : > { %12676 = vmatprep.subr.bf16.mxu1 %v12675_v49  ;;  %v12687_v7 = vpack.c.bf16 %v7228_v4, %v7227_v5  ;;  %v7232_v5 = vld [vmem:[#allocation7 + $0x5f8] sm:$0xff]  ;;  %v15750_v4 = vsel %vm1137_vm1, %v16863_v60, %v6525_v1 }
 0x412   : > { %16964 = vst [vmem:[#allocation98_spill] sm:$0xff] %v15750_v4 }
 0x413   : > { %11714 = vmatmul.mubr.f32.gmra.mrb[4].mxu1 %v15703_v22  ;;  %v6537_v22 = vrot.slane %v15398_v62, 7 }
 0x414   : > { %11716 = vmatprep.mubr.f32.mxu1 %v15709_v47  ;;  %12678 = vmatpush3.bf16.msra.mxu1 %v12675_v49  ;;  %v5834_v49 = vrot.slane %v15713_v36, 6  ;;  %v6532_v47 = vrot.slane %v15366_v27, 7 }
 0x415   : > { %12680 = vmatprep.subr.bf16.mxu1 %v12679_v34 }
 0x416   : > { %v5835_v32 = vsel %vm992_vm0, %v16896_v35, %v5834_v49 }
 0x417   : > { %11717 = vmatmul.mubr.f32.gmra.mrb[6].mxu1 %v15716_v31  ;;  %v5900_v23 = vmax.f32 %v15713_v36, %v5835_v32  ;;  %v15763_v31 = vsel %vm1137_vm1, %v6525_v1, %v6527_v19  ;;  %v6535_v32 = vrot.slane %v15381_v42, 7 }
 0x418   : > { %11719 = vmatprep.mubr.f32.mxu1 %v15722_v28  ;;  %12682 = vmatpush3.bf16.msra.mxu1 %v12679_v34  ;;  %v15738_v34 = vmax.f32 %v5580_v50, -3e+38  ;;  %16965 = vst [vmem:[#allocation100_spill] sm:$0xff] %v15763_v31 }
 0x419   : > { %12684 = vmatprep.subr.bf16.mxu1 %v12683_v40 }
 0x41a   : > { %v5836_v50 = vrot.slane %v15738_v34, 6  ;;  %v6138_v21 = vrot.slane %v15738_v34, 1  ;;  %v6282_v35 = vrot.slane %v15738_v34, 2  ;;  %v5980_v28 = vrot.slane %v15738_v34, 7 }
 0x41b   : > { %11720 = vmatmul.mubr.f32.gmra.mrb[8].mxu1 %v15729_v48  ;;  %v7715_v48 = vld [vmem:[#allocation7 + $0x608] sm:$0xff] }
 0x41c   : > { %11722 = vmatprep.mubr.f32.mxu1 %v15735_v55  ;;  %12686 = vmatpush3.bf16.msra.mxu1 %v12683_v40  ;;  %v6530_v40 = vrot.slane %v15343_v54, 7  ;;  %v7714_v55 = vld [vmem:[#allocation7 + $0x600] sm:$0xff]  ;;  %v6139_v19 = vsel %vm1298_vm2, %v6137_v13, %v6138_v21  ;;  %v6550_v13 = vrot.slane %v15538_v12, 7 }
 0x41d   : > { %12688 = vmatprep.subr.bf16.mxu1 %v12687_v7  ;;  %v15773_v36 = vpack.c.bf16 %v7715_v48, %v7714_v55  ;;  %v5981_v48 = vsel %vm1137_vm1, %v5978_v45, %v5980_v28  ;;  %v6540_v55 = vrot.slane %v15401_v8, 7  ;;  %v15799_v28 = vsel %vm1137_vm1, %v6535_v32, %v6537_v22 }
 0x41f   : > { %11723 = vmatmul.mubr.f32.gmra.mrb[10].mxu1 %v15744_v6  ;;  %v12695_v6 = vpack.c.bf16 %v7232_v5, %v7231_v56  ;;  %v5979_v56 = vsel %vm1137_vm1, %v16897_v44, %v5978_v45  ;;  %v6283_v5 = vsel %vm1443_vm3, %v6281_v0, %v6282_v35  ;;  %v15789_v44 = vsel %vm1137_vm1, %v16863_v60, %v6535_v32 }
 0x420   : > { %11725 = vmatprep.mubr.f32.mxu1 %v15750_v4  ;;  %12690 = vmatpush3.bf16.msra.mxu1 %v12687_v7  ;;  %v15769_v7 = vsel %vm1137_vm1, %v16863_v60, %v6530_v40  ;;  %v6044_v1 = vmax.f32 %v5900_v23, %v5979_v56  ;;  %v15781_v4 = vsel %vm1137_vm1, %v6530_v40, %v6532_v47  ;;  %v6555_v56 = vrot.slane %v15573_v26, 7 }
 0x421   : > { %12692 = vmatprep.subr.bf16.mxu1 %v12691_v20  ;;  %v6285_v45 = vsel %vm1443_vm3, %v6282_v35, %v16901_v33  ;;  %v6552_v35 = vrot.slane %v15570_v41, 7  ;;  %v15831_v32 = vsel %vm1137_vm1, %v16863_v60, %v6550_v13 }
 0x422   : > { %v6204_v0 = vmax.f32 %v6044_v1, %v6139_v19  ;;  %v6557_v19 = vrot.slane %v15599_v52, 7 }
 0x423   : > { %11726 = vmatmul.mubr.f32.gmra.mrb[12].mxu1 %v15763_v31  ;;  %v5837_v31 = vsel %vm992_vm0, %v5834_v49, %v5836_v50  ;;  %v15805_v50 = vsel %vm1137_vm1, %v16863_v60, %v6540_v55  ;;  %v15836_v1 = vsel %vm1137_vm1, %v6550_v13, %v6552_v35 }
 0x424   : > { %11728 = vmatprep.mubr.f32.mxu1 %v15769_v7  ;;  %12694 = vmatpush3.bf16.msra.mxu1 %v12691_v20  ;;  %v5901_v20 = vmax.f32 %v15738_v34, %v5837_v31  ;;  %v15794_v49 = vmax.f32 %v6204_v0, %v6283_v5  ;;  %v6141_v31 = vsel %vm1298_vm2, %v6138_v21, %v16899_v46  ;;  %v6542_v34 = vrot.slane %v15431_v53, 7 }
 0x425   : > { %12696 = vmatprep.subr.bf16.mxu1 %v12695_v6  ;;  %v6547_v21 = vrot.slane %v15477_v29, 7  ;;  %v15842_v5 = vsel %vm1137_vm1, %v16863_v60, %v6555_v56 }
 0x426   : > { %v6045_v47 = vmax.f32 %v5901_v20, %v5981_v48  ;;  %v15814_v22 = vsel %vm1137_vm1, %v6540_v55, %v6542_v34  ;;  %v6560_v20 = vrot.slane %v15601_v18, 7  ;;  %v15847_v48 = vsel %vm1137_vm1, %v6555_v56, %v6557_v19  ;;  %v7716_v56 = vld [vmem:[#allocation7 + $0x610] sm:$0xff]  ;;  %v7717_v19 = vld [vmem:[#allocation7 + $0x618] sm:$0xff] }
 0x427   : > { %11729 = vmatmul.mubr.f32.gmra.mrb[14].mxu1 %v15781_v4  ;;  %v6562_v55 = vrot.slane %v15637_v61, 7  ;;  %v6567_v34 = vrot.slane %v15665_v51, 7 }
 0x428   : > { %11731 = vmatprep.mubr.f32.mxu1 %v15789_v44  ;;  %12698 = vmatpush3.bf16.msra.mxu1 %v12695_v6  ;;  %v6205_v40 = vmax.f32 %v6045_v47, %v6141_v31  ;;  %v6545_v6 = vrot.slane %v15449_v59, 7  ;;  %v15853_v0 = vsel %vm1137_vm1, %v16863_v60, %v6560_v20  ;;  %v6565_v47 = vrot.slane %v15639_v39, 7 }
 0x429   : > { %12700 = vmatprep.subr.bf16.mxu1 %v15773_v36  ;;  %v15858_v31 = vsel %vm1137_vm1, %v6560_v20, %v6562_v55  ;;  %v7110_v20 = vrot.slane %v15018_v2, 1  ;;  %v7111_v55 = vrot.slane %v15040_v15, 1  ;;  %v7721_v2 = vld [vmem:[#allocation7 + $0x638] sm:$0xff] }
 0x42a   : > { %v15811_v46 = vmax.f32 %v6205_v40, %v6285_v45  ;;  %v15820_v23 = vsel %vm1137_vm1, %v16863_v60, %v6545_v6  ;;  %v15825_v33 = vsel %vm1137_vm1, %v6545_v6, %v6547_v21  ;;  %16967 = vst [vmem:[#allocation103_spill] sm:$0xff] %v15858_v31  ;;  %v15864_v40 = vsel %vm1137_vm1, %v16863_v60, %v6565_v47 }
 0x42b   : > { %11732 = vmatmul.mubr.f32.gmra.mrb[16].mxu1 %v15799_v28  ;;  %16968 = vst [vmem:[#allocation104_spill] sm:$0xff] %v15864_v40  ;;  %v6570_v6 = vrot.slane %v15667_v14, 7  ;;  %v15869_v45 = vsel %vm1137_vm1, %v6565_v47, %v6567_v34  ;;  %v6572_v21 = vrot.slane %v15677_v11, 7  ;;  %v12703_v47 = vpack.c.bf16 %v7717_v19, %v7716_v56  ;;  %v7718_v34 = vld [vmem:[#allocation7 + $0x620] sm:$0xff]  ;;  %v7720_v19 = vld [vmem:[#allocation7 + $0x630] sm:$0xff] }
 0x42c   : > { %11734 = vmatprep.mubr.f32.mxu1 %v15805_v50  ;;  %16966 = vst [vmem:[#allocation102_spill] sm:$0xff] %v15811_v46  ;;  %16969 = vst [vmem:[#allocation105_spill] sm:$0xff] %v15869_v45  ;;  %v7719_v46 = vld [vmem:[#allocation7 + $0x628] sm:$0xff]  ;;  %v15895_v56 = vsel %vm1298_vm2, %v7111_v55, %v14502_v30 }
 0x42d   : > { %v15875_v13 = vsel %vm1137_vm1, %v16863_v60, %v6570_v6  ;;  %v15879_v35 = vsel %vm1137_vm1, %v6570_v6, %v6572_v21  ;;  %v15887_v60 = vsel %vm1298_vm2, %v7110_v20, %v7111_v55  ;;  %v7115_v6 = vrot.slane %v15064_v3, 1  ;;  %16973 = vst [vmem:[#allocation73_spill] sm:$0xff] %v15895_v56  ;;  %v7722_v55 = vld [vmem:[#allocation7 + $0x640] sm:$0xff] }
 0x42e   : > { %16970 = vst [vmem:[#allocation106_spill] sm:$0xff] %v15875_v13  ;;  %16971 = vst [vmem:[#allocation107_spill] sm:$0xff] %v15879_v35  ;;  %v7116_v21 = vrot.slane %v15099_v24, 1  ;;  %v12707_v15 = vpack.c.bf16 %v7719_v46, %v7718_v34  ;;  %v7120_v3 = vrot.slane %v15136_v16, 1  ;;  %v7121_v24 = vrot.slane %v15164_v37, 1  ;;  %v7723_v34 = vld [vmem:[#allocation7 + $0x648] sm:$0xff] }
 0x42f   : > { %11735 = vmatmul.mubr.f32.gmra.mrb[18].mxu1 %v15814_v22  ;;  %16972 = vst [vmem:[#allocation108_spill] sm:$0xff] %v15887_v60 }
 0x430   : > { %11737 = vmatprep.mubr.f32.mxu1 %v15820_v23  ;;  %v15899_v20 = vsel %vm1298_vm2, %v7115_v6, %v7116_v21  ;;  %v15906_v46 = vsel %vm1298_vm2, %v7116_v21, %v14502_v30  ;;  %v15910_v6 = vsel %vm1298_vm2, %v7120_v3, %v7121_v24  ;;  %v7724_v21 = vld [vmem:[#allocation7 + $0x650] sm:$0xff] }
 0x431   : > { %16974 = vst [vmem:[#allocation13_spill] sm:$0xff] %v15899_v20  ;;  %16975 = vst [vmem:[#allocation14_spill] sm:$0xff] %v15906_v46 }
 0x432   : > { %16976 = vst [vmem:[#allocation15_spill] sm:$0xff] %v15910_v6 }
 0x433   : > { %11738 = vmatmul.mubr.f32.gmra.mrb[20].mxu1 %v15825_v33 }
 0x434   : > { %11740 = vmatprep.mubr.f32.mxu1 %v15831_v32 }
 0x437   : > { %11741 = vmatmul.mubr.f32.gmra.mrb[22].mxu1 %v15836_v1 }
 0x438   : > { %11743 = vmatprep.mubr.f32.mxu1 %v15842_v5 }
 0x43b   : > { %11744 = vmatmul.mubr.f32.gmra.mrb[24].mxu1 %v15847_v48 }
 0x43c   : > { %11746 = vmatprep.mubr.f32.mxu1 %v15853_v0 }
 0x43f   : > { %11747 = vmatmul.mubr.f32.gmra.mrb[26].mxu1 %v15858_v31 }
 0x440   : > { %11749 = vmatprep.mubr.f32.mxu1 %v15864_v40 }
 0x443   : > { %11750 = vmatmul.mubr.f32.gmra.mrb[28].mxu1 %v15869_v45 }
 0x444   : > { %11752 = vmatprep.mubr.f32.mxu1 %v15875_v13 }
 0x447   : > { %11753 = vmatmul.mubr.f32.gmra.mrb[30].mxu1 %v15879_v35 }
 0x448   : > { %11787 = vmatprep.mubr.f32.mxu1 %v14502_v30 }
 0x44b   : > { %11788 = vmatmul.mubr.f32.vlgmr.msra.gmra.mrb[0].mxu1 %v14502_v30 }
 0x44c   : > { %11790 = vmatprep.mubr.f32.mxu1 %v15887_v60  ;;  %12702 = vmatpush3.bf16.msra.mxu1 %v15773_v36  ;;  %v12711_v36 = vpack.c.bf16 %v7721_v2, %v7720_v19  ;;  %v7126_v60 = vrot.slane %v15220_v17, 1  ;;  %v12715_v2 = vpack.c.bf16 %v7723_v34, %v7722_v55  ;;  %v7725_v19 = vld [vmem:[#allocation7 + $0x658] sm:$0xff]  ;;  %v7726_v55 = vld [vmem:[#allocation7 + $0x660] sm:$0xff]  ;;  %v7727_v34 = vld [vmem:[#allocation7 + $0x668] sm:$0xff] }
 0x44d   : > { %12704 = vmatprep.subr.bf16.mxu1 %v12703_v47 }
 0x44f   : > { %11791 = vmatmul.mubr.f32.gmra.mrb[2].mxu1 %v15895_v56  ;;  %v7125_v56 = vrot.slane %v15192_v58, 1 }
 0x450   : > { %11793 = vmatprep.mubr.f32.mxu1 %v15899_v20  ;;  %12706 = vmatpush3.bf16.msra.mxu1 %v12703_v47  ;;  %v15917_v47 = vsel %vm1298_vm2, %v7121_v24, %v14502_v30  ;;  %v7131_v20 = vrot.slane %v15276_v63, 1  ;;  %v15928_v24 = vsel %vm1298_vm2, %v7126_v60, %v14502_v30 }
 0x451   : > { %12708 = vmatprep.subr.bf16.mxu1 %v12707_v15  ;;  %16977 = vst [vmem:[#allocation16_spill] sm:$0xff] %v15917_v47  ;;  %v15921_v3 = vsel %vm1298_vm2, %v7125_v56, %v7126_v60  ;;  %16979 = vst [vmem:[#allocation110_spill] sm:$0xff] %v15928_v24 }
 0x452   : > { %16978 = vst [vmem:[#allocation109_spill] sm:$0xff] %v15921_v3  ;;  %v15939_v60 = vsel %vm1298_vm2, %v7131_v20, %v14502_v30 }
 0x453   : > { %11794 = vmatmul.mubr.f32.gmra.mrb[4].mxu1 %v15906_v46  ;;  %v7130_v46 = vrot.slane %v15248_v10, 1  ;;  %16981 = vst [vmem:[#allocation112_spill] sm:$0xff] %v15939_v60 }
 0x454   : > { %11796 = vmatprep.mubr.f32.mxu1 %v15910_v6  ;;  %12710 = vmatpush3.bf16.msra.mxu1 %v12707_v15  ;;  %v12719_v15 = vpack.c.bf16 %v7725_v19, %v7724_v21  ;;  %v7136_v6 = vrot.slane %v15322_v43, 1  ;;  %v7728_v21 = vld [vmem:[#allocation7 + $0x670] sm:$0xff]  ;;  %v7729_v19 = vld [vmem:[#allocation7 + $0x678] sm:$0xff] }
 0x455   : > { %12712 = vmatprep.subr.bf16.mxu1 %v12711_v36  ;;  %v15932_v56 = vsel %vm1298_vm2, %v7130_v46, %v7131_v20 }
 0x456   : > { %16980 = vst [vmem:[#allocation111_spill] sm:$0xff] %v15932_v56  ;;  %v15950_v20 = vsel %vm1298_vm2, %v7136_v6, %v14502_v30 }
 0x457   : > { %11797 = vmatmul.mubr.f32.gmra.mrb[6].mxu1 %v15917_v47  ;;  %v7135_v47 = vrot.slane %v15298_v57, 1  ;;  %16983 = vst [vmem:[#allocation114_spill] sm:$0xff] %v15950_v20 }
 0x458   : > { %11799 = vmatprep.mubr.f32.mxu1 %v15921_v3  ;;  %12714 = vmatpush3.bf16.msra.mxu1 %v12711_v36  ;;  %v12723_v36 = vpack.c.bf16 %v7727_v34, %v7726_v55  ;;  %v7141_v3 = vrot.slane %v15366_v27, 1  ;;  %v7987_v55 = vld [vmem:[#allocation7 + $0x680] sm:$0xff]  ;;  %v7988_v34 = vld [vmem:[#allocation7 + $0x688] sm:$0xff] }
 0x459   : > { %12716 = vmatprep.subr.bf16.mxu1 %v12715_v2  ;;  %v15943_v46 = vsel %vm1298_vm2, %v7135_v47, %v7136_v6 }
 0x45a   : > { %16982 = vst [vmem:[#allocation113_spill] sm:$0xff] %v15943_v46  ;;  %v15961_v6 = vsel %vm1298_vm2, %v7141_v3, %v14502_v30 }
 0x45b   : > { %11800 = vmatmul.mubr.f32.gmra.mrb[8].mxu1 %v15928_v24  ;;  %v7140_v24 = vrot.slane %v15343_v54, 1  ;;  %16985 = vst [vmem:[#allocation116_spill] sm:$0xff] %v15961_v6 }
 0x45c   : > { %11802 = vmatprep.mubr.f32.mxu1 %v15932_v56  ;;  %12718 = vmatpush3.bf16.msra.mxu1 %v12715_v2  ;;  %v12727_v2 = vpack.c.bf16 %v7729_v19, %v7728_v21  ;;  %v7146_v56 = vrot.slane %v15398_v62, 1  ;;  %v7151_v19 = vrot.slane %v15431_v53, 1 }
 0x45d   : > { %12720 = vmatprep.subr.bf16.mxu1 %v12719_v15  ;;  %v15954_v47 = vsel %vm1298_vm2, %v7140_v24, %v7141_v3  ;;  %v7150_v24 = vrot.slane %v15401_v8, 1 }
 0x45e   : > { %16984 = vst [vmem:[#allocation115_spill] sm:$0xff] %v15954_v47 }
 0x45f   : > { %11803 = vmatmul.mubr.f32.gmra.mrb[10].mxu1 %v15939_v60  ;;  %v7145_v60 = vrot.slane %v15381_v42, 1  ;;  %v15976_v3 = vsel %vm1298_vm2, %v7150_v24, %v7151_v19  ;;  %v7161_v24 = vrot.slane %v15570_v41, 1 }
 0x460   : > { %11805 = vmatprep.mubr.f32.mxu1 %v15943_v46  ;;  %12722 = vmatpush3.bf16.msra.mxu1 %v12719_v15  ;;  %v12731_v15 = vpack.c.bf16 %v7988_v34, %v7987_v55  ;;  %16988 = vst [vmem:[#allocation119_spill] sm:$0xff] %v15976_v3  ;;  %v7156_v55 = vrot.slane %v15477_v29, 1  ;;  %v15983_v34 = vsel %vm1298_vm2, %v7151_v19, %v14502_v30 }
 0x461   : > { %12724 = vmatprep.subr.bf16.mxu1 %v12723_v36  ;;  %v15965_v21 = vsel %vm1298_vm2, %v7145_v60, %v7146_v56  ;;  %v7155_v60 = vrot.slane %v15449_v59, 1  ;;  %16989 = vst [vmem:[#allocation120_spill] sm:$0xff] %v15983_v34 }
 0x462   : > { %16986 = vst [vmem:[#allocation117_spill] sm:$0xff] %v15965_v21 }
 0x463   : > { %11806 = vmatmul.mubr.f32.gmra.mrb[12].mxu1 %v15950_v20 }
 0x464   : > { %11808 = vmatprep.mubr.f32.mxu1 %v15954_v47  ;;  %12726 = vmatpush3.bf16.msra.mxu1 %v12723_v36  ;;  %v15972_v36 = vsel %vm1298_vm2, %v7146_v56, %v14502_v30  ;;  %v15987_v56 = vsel %vm1298_vm2, %v7155_v60, %v7156_v55  ;;  %v7166_v60 = vrot.slane %v15599_v52, 1 }
 0x465   : > { %12728 = vmatprep.subr.bf16.mxu1 %v12727_v2  ;;  %16987 = vst [vmem:[#allocation118_spill] sm:$0xff] %v15972_v36  ;;  %16990 = vst [vmem:[#allocation121_spill] sm:$0xff] %v15987_v56 }
 0x467   : > { %11809 = vmatmul.mubr.f32.gmra.mrb[14].mxu1 %v15961_v6  ;;  %v17005_v6 = vld [vmem:[#allocation93_spill] sm:$0xff] }
 0x468   : > { %11811 = vmatprep.mubr.f32.mxu1 %v15965_v21  ;;  %12730 = vmatpush3.bf16.msra.mxu1 %v12727_v2  ;;  %v7160_v2 = vrot.slane %v15538_v12, 1  ;;  %v7992_v21 = vld [vmem:[#allocation7 + $0x6a8] sm:$0xff] }
 0x469   : > { %12732 = vmatprep.subr.bf16.mxu1 %v12731_v15 }
 0x46a   : > { %v15998_v19 = vsel %vm1298_vm2, %v7160_v2, %v7161_v24  ;;  %v7171_v2 = vrot.slane %v15637_v61, 1 }
 0x46b   : > { %11812 = vmatmul.mubr.f32.gmra.mrb[16].mxu1 %v15972_v36  ;;  %v15994_v36 = vsel %vm1298_vm2, %v7156_v55, %v14502_v30  ;;  %16992 = vst [vmem:[#allocation123_spill] sm:$0xff] %v15998_v19 }
 0x46c   : > { %11814 = vmatprep.mubr.f32.mxu1 %v15976_v3  ;;  %16991 = vst [vmem:[#allocation122_spill] sm:$0xff] %v15994_v36  ;;  %v16005_v3 = vsel %vm1298_vm2, %v7161_v24, %v14502_v30 }
 0x46d   : > { %16993 = vst [vmem:[#allocation124_spill] sm:$0xff] %v16005_v3 }
 0x46f   : > { %11815 = vmatmul.mubr.f32.gmra.mrb[18].mxu1 %v15983_v34  ;;  %v7165_v34 = vrot.slane %v15573_v26, 1 }
 0x470   : > { %11817 = vmatprep.mubr.f32.mxu1 %v15987_v56  ;;  %v16016_v56 = vsel %vm1298_vm2, %v7166_v60, %v14502_v30 }
 0x471   : > { %v16009_v55 = vsel %vm1298_vm2, %v7165_v34, %v7166_v60  ;;  %16995 = vst [vmem:[#allocation126_spill] sm:$0xff] %v16016_v56  ;;  %v7176_v34 = vrot.slane %v15665_v51, 1 }
 0x472   : > { %16994 = vst [vmem:[#allocation125_spill] sm:$0xff] %v16009_v55 }
 0x473   : > { %11818 = vmatmul.mubr.f32.gmra.mrb[20].mxu1 %v15994_v36  ;;  %v7170_v36 = vrot.slane %v15601_v18, 1 }
 0x474   : > { %11820 = vmatprep.mubr.f32.mxu1 %v15998_v19  ;;  %v16027_v19 = vsel %vm1298_vm2, %v7171_v2, %v14502_v30 }
 0x475   : > { %v16020_v24 = vsel %vm1298_vm2, %v7170_v36, %v7171_v2  ;;  %16997 = vst [vmem:[#allocation128_spill] sm:$0xff] %v16027_v19  ;;  %v7181_v36 = vrot.slane %v15677_v11, 1 }
 0x476   : > { %16996 = vst [vmem:[#allocation127_spill] sm:$0xff] %v16020_v24 }
 0x477   : > { %11821 = vmatmul.mubr.f32.gmra.mrb[22].mxu1 %v16005_v3  ;;  %v7175_v3 = vrot.slane %v15639_v39, 1 }
 0x478   : > { %11823 = vmatprep.mubr.f32.mxu1 %v16009_v55  ;;  %v16038_v55 = vsel %vm1298_vm2, %v7176_v34, %v14502_v30 }
 0x479   : > { %v16031_v60 = vsel %vm1298_vm2, %v7175_v3, %v7176_v34  ;;  %16999 = vst [vmem:[#allocation130_spill] sm:$0xff] %v16038_v55  ;;  %v16047_v3 = vsel %vm1298_vm2, %v7181_v36, %v14502_v30  ;;  %v7991_v34 = vld [vmem:[#allocation7 + $0x6a0] sm:$0xff]  ;;  %v17003_v30 = vld [vmem:[#allocation88_spill] sm:$0xff] }
 0x47a   : > { %16998 = vst [vmem:[#allocation129_spill] sm:$0xff] %v16031_v60  ;;  %17001 = vst [vmem:[#allocation132_spill] sm:$0xff] %v16047_v3 }
 0x47b   : > { %11824 = vmatmul.mubr.f32.gmra.mrb[24].mxu1 %v16016_v56  ;;  %v7180_v56 = vrot.slane %v15667_v14, 1 }
 0x47c   : > { %11826 = vmatprep.mubr.f32.mxu1 %v16020_v24  ;;  %v7990_v24 = vld [vmem:[#allocation7 + $0x698] sm:$0xff] }
 0x47d   : > { %v16042_v2 = vsel %vm1298_vm2, %v7180_v56, %v7181_v36  ;;  %v12739_v56 = vpack.c.bf16 %v7992_v21, %v7991_v34  ;;  %v17002_v36 = vld [vmem:[#allocation86_spill] sm:$0xff]  ;;  %v7998_v21 = vld [vmem:[#allocation7 + $0x6d8] sm:$0xff]  ;;  %v17006_v34 = vld [vmem:[#allocation95_spill] sm:$0xff] }
 0x47e   : > { %17000 = vst [vmem:[#allocation131_spill] sm:$0xff] %v16042_v2 }
 0x47f   : > { %11827 = vmatmul.mubr.f32.gmra.mrb[26].mxu1 %v16027_v19  ;;  %v7989_v19 = vld [vmem:[#allocation7 + $0x690] sm:$0xff] }
 0x480   : > { %11829 = vmatprep.mubr.f32.mxu1 %v16031_v60  ;;  %v12735_v60 = vpack.c.bf16 %v7990_v24, %v7989_v19  ;;  %v7996_v19 = vld [vmem:[#allocation7 + $0x6c8] sm:$0xff]  ;;  %v17004_v24 = vld [vmem:[#allocation92_spill] sm:$0xff] }
 0x483   : > { %11830 = vmatmul.mubr.f32.gmra.mrb[28].mxu1 %v16038_v55  ;;  %v7994_v55 = vld [vmem:[#allocation7 + $0x6b8] sm:$0xff] }
 0x484   : > { %11832 = vmatprep.mubr.f32.mxu1 %v16042_v2  ;;  %v7993_v2 = vld [vmem:[#allocation7 + $0x6b0] sm:$0xff] }
 0x487   : > { %11833 = vmatmul.mubr.f32.gmra.mrb[30].mxu1 %v16047_v3  ;;  %v12743_v3 = vpack.c.bf16 %v7994_v55, %v7993_v2  ;;  %v8000_v55 = vld [vmem:[#allocation7 + $0x6e8] sm:$0xff]  ;;  %v17008_v2 = vld [vmem:[#allocation97_spill] sm:$0xff] }
 0x488   : > { %11867 = vmatprep.mubr.f32.mxu1 %v15686_v25  ;;  %v7995_v25 = vld [vmem:[#allocation7 + $0x6c0] sm:$0xff] }
 0x48b   : > { %11868 = vmatmul.mubr.f32.vlgmr.msra.gmra.mrb[0].mxu1 %v15691_v38  ;;  %v12747_v38 = vpack.c.bf16 %v7996_v19, %v7995_v25  ;;  %v8002_v25 = vld [vmem:[#allocation7 + $0x6f8] sm:$0xff] }
 0x48c   : > { %11870 = vmatprep.mubr.f32.mxu1 %v15697_v9  ;;  %12734 = vmatpush3.bf16.msra.mxu1 %v12731_v15  ;;  %v7997_v15 = vld [vmem:[#allocation7 + $0x6d0] sm:$0xff]  ;;  %v17007_v9 = vld [vmem:[#allocation96_spill] sm:$0xff] }
 0x48d   : > { %12736 = vmatprep.subr.bf16.mxu1 %v12735_v60  ;;  %v17010_v19 = vld [vmem:[#allocation100_spill] sm:$0xff] }
 0x48f   : > { %11871 = vmatmul.mubr.f32.gmra.mrb[2].mxu1 %v17002_v36  ;;  %v17009_v36 = vld [vmem:[#allocation98_spill] sm:$0xff] }
 0x490   : > { %11873 = vmatprep.mubr.f32.mxu1 %v17003_v30  ;;  %12738 = vmatpush3.bf16.msra.mxu1 %v12735_v60  ;;  %v12751_v60 = vpack.c.bf16 %v7998_v21, %v7997_v15  ;;  %v7999_v30 = vld [vmem:[#allocation7 + $0x6e0] sm:$0xff]  ;;  %v8389_v15 = vld [vmem:[#allocation7 + $0x708] sm:$0xff] }
 0x491   : > { %12740 = vmatprep.subr.bf16.mxu1 %v12739_v56  ;;  %v17012_v21 = vld [vmem:[#allocation58_spill] sm:$0xff] }
 0x493   : > { %11874 = vmatmul.mubr.f32.gmra.mrb[4].mxu1 %v17004_v24 }
 0x494   : > { %11876 = vmatprep.mubr.f32.mxu1 %v17005_v6  ;;  %12742 = vmatpush3.bf16.msra.mxu1 %v12739_v56  ;;  %v12755_v56 = vpack.c.bf16 %v8000_v55, %v7999_v30  ;;  %v8001_v6 = vld [vmem:[#allocation7 + $0x6f0] sm:$0xff]  ;;  %v7678_v30 = vrot.slane %v15794_v49, 7 }
 0x495   : > { %12744 = vmatprep.subr.bf16.mxu1 %v12743_v3 }
 0x497   : > { %11877 = vmatmul.mubr.f32.gmra.mrb[6].mxu1 %v17006_v34 }
 0x498   : > { %11879 = vmatprep.mubr.f32.mxu1 %v17007_v9  ;;  %12746 = vmatpush3.bf16.msra.mxu1 %v12743_v3  ;;  %v12759_v3 = vpack.c.bf16 %v8002_v25, %v8001_v6  ;;  %v8388_v9 = vld [vmem:[#allocation7 + $0x700] sm:$0xff]  ;;  %v8391_v25 = vld [vmem:[#allocation7 + $0x718] sm:$0xff] }
 0x499   : > { %12748 = vmatprep.subr.bf16.mxu1 %v12747_v38 }
 0x49b   : > { %11880 = vmatmul.mubr.f32.gmra.mrb[8].mxu1 %v17008_v2 }
 0x49c   : > { %11882 = vmatprep.mubr.f32.mxu1 %v17009_v36  ;;  %12750 = vmatpush3.bf16.msra.mxu1 %v12747_v38  ;;  %v12763_v38 = vpack.c.bf16 %v8389_v15, %v8388_v9  ;;  %v17011_v9 = vld [vmem:[#allocation102_spill] sm:$0xff] }
 0x49d   : > { %12752 = vmatprep.subr.bf16.mxu1 %v12751_v60  ;;  %v7680_v6 = vrot.slane %v17011_v9, 7 }
 0x49f   : > { %11883 = vmatmul.mubr.f32.gmra.mrb[10].mxu1 %v17010_v19  ;;  %v16088_v55 = vsel %vm1137_vm1, %v7678_v30, %v7680_v6 }
 0x4a0   : > { %11885 = vmatprep.mubr.f32.mxu1 %v15769_v7  ;;  %12754 = vmatpush3.bf16.msra.mxu1 %v12751_v60  ;;  %v16084_v60 = vsel %vm1137_vm1, %v17012_v21, %v7678_v30  ;;  %v17017_v30 = vld [vmem:[#allocation60_spill] sm:$0xff] }
 0x4a1   : > { %12756 = vmatprep.subr.bf16.mxu1 %v12755_v56  ;;  %17013 = vst [vmem:[#allocation92_spill] sm:$0xff] %v16084_v60 }
 0x4a3   : > { %11886 = vmatmul.mubr.f32.gmra.mrb[12].mxu1 %v15781_v4 }
 0x4a4   : > { %11888 = vmatprep.mubr.f32.mxu1 %v15789_v44  ;;  %12758 = vmatpush3.bf16.msra.mxu1 %v12755_v56  ;;  %v8390_v56 = vld [vmem:[#allocation7 + $0x710] sm:$0xff] }
 0x4a5   : > { %12760 = vmatprep.subr.bf16.mxu1 %v12759_v3  ;;  %v12767_v15 = vpack.c.bf16 %v8391_v25, %v8390_v56  ;;  %v8397_v56 = vld [vmem:[#allocation7 + $0x748] sm:$0xff]  ;;  %v8400_v25 = vld [vmem:[#allocation7 + $0x760] sm:$0xff] }
 0x4a7   : > { %11889 = vmatmul.mubr.f32.gmra.mrb[14].mxu1 %v15799_v28 }
 0x4a8   : > { %11891 = vmatprep.mubr.f32.mxu1 %v15805_v50  ;;  %12762 = vmatpush3.bf16.msra.mxu1 %v12759_v3  ;;  %v17014_v3 = vld [vmem:[#allocation85_spill] sm:$0xff] }
 0x4a9   : > { %12764 = vmatprep.subr.bf16.mxu1 %v12763_v38 }
 0x4ab   : > { %11892 = vmatmul.mubr.f32.gmra.mrb[16].mxu1 %v15814_v22 }
 0x4ac   : > { %11894 = vmatprep.mubr.f32.mxu1 %v15820_v23 }
 0x4af   : > { %11895 = vmatmul.mubr.f32.gmra.mrb[18].mxu1 %v15825_v33 }
 0x4b0   : > { %11897 = vmatprep.mubr.f32.mxu1 %v15831_v32 }
 0x4b3   : > { %11898 = vmatmul.mubr.f32.gmra.mrb[20].mxu1 %v15836_v1 }
 0x4b4   : > { %11900 = vmatprep.mubr.f32.mxu1 %v15842_v5 }
 0x4b7   : > { %11901 = vmatmul.mubr.f32.gmra.mrb[22].mxu1 %v15847_v48 }
 0x4b8   : > { %11903 = vmatprep.mubr.f32.mxu1 %v15853_v0 }
 0x4bb   : > { %11904 = vmatmul.mubr.f32.gmra.mrb[24].mxu1 %v15858_v31  ;;  %v8395_v31 = vld [vmem:[#allocation7 + $0x738] sm:$0xff] }
 0x4bc   : > { %11906 = vmatprep.mubr.f32.mxu1 %v15864_v40  ;;  %v17015_v40 = vld [vmem:[#allocation89_spill] sm:$0xff] }
 0x4bf   : > { %11907 = vmatmul.mubr.f32.gmra.mrb[26].mxu1 %v15869_v45  ;;  %v8393_v45 = vld [vmem:[#allocation7 + $0x728] sm:$0xff] }
 0x4c0   : > { %11909 = vmatprep.mubr.f32.mxu1 %v15875_v13  ;;  %v8392_v13 = vld [vmem:[#allocation7 + $0x720] sm:$0xff] }
 0x4c1   : > { %v12771_v21 = vpack.c.bf16 %v8393_v45, %v8392_v13  ;;  %v8399_v45 = vld [vmem:[#allocation7 + $0x758] sm:$0xff] }
 0x4c3   : > { %11910 = vmatmul.mubr.f32.gmra.mrb[28].mxu1 %v15879_v35  ;;  %v17016_v35 = vld [vmem:[#allocation94_spill] sm:$0xff] }
 0x4c4   : > { %11912 = vmatprep.mubr.f32.mxu1 %v16084_v60  ;;  %v8394_v60 = vld [vmem:[#allocation7 + $0x730] sm:$0xff] }
 0x4c5   : > { %v12775_v6 = vpack.c.bf16 %v8395_v31, %v8394_v60  ;;  %v8401_v31 = vld [vmem:[#allocation7 + $0x768] sm:$0xff]  ;;  %v8402_v60 = vld [vmem:[#allocation7 + $0x770] sm:$0xff] }
 0x4c7   : > { %11913 = vmatmul.mubr.f32.gmra.mrb[30].mxu1 %v16088_v55 }
 0x4c8   : > { %11947 = vmatprep.mubr.f32.mxu1 %v17014_v3  ;;  %v8396_v3 = vld [vmem:[#allocation7 + $0x740] sm:$0xff] }
 0x4cb   : > { %11948 = vmatmul.mubr.f32.vlgmr.msra.gmra.mrb[0].mxu1 %v17015_v40  ;;  %v12779_v40 = vpack.c.bf16 %v8397_v56, %v8396_v3  ;;  %v8885_v3 = vld [vmem:[#allocation7 + $0x780] sm:$0xff]  ;;  %v8886_v56 = vld [vmem:[#allocation7 + $0x788] sm:$0xff] }
 0x4cc   : > { %11950 = vmatprep.mubr.f32.mxu1 %v17016_v35  ;;  %12766 = vmatpush3.bf16.msra.mxu1 %v12763_v38  ;;  %v8398_v38 = vld [vmem:[#allocation7 + $0x750] sm:$0xff] }
 0x4cd   : > { %12768 = vmatprep.subr.bf16.mxu1 %v12767_v15  ;;  %v12783_v13 = vpack.c.bf16 %v8399_v45, %v8398_v38  ;;  %v8887_v38 = vld [vmem:[#allocation7 + $0x790] sm:$0xff]  ;;  %v8888_v45 = vld [vmem:[#allocation7 + $0x798] sm:$0xff] }
 0x4cf   : > { %11951 = vmatmul.mubr.f32.gmra.mrb[2].mxu1 %v17017_v30 }
 0x4d0   : > { %11953 = vmatprep.mubr.f32.mxu1 %v15136_v16  ;;  %12770 = vmatpush3.bf16.msra.mxu1 %v12767_v15  ;;  %v8403_v15 = vld [vmem:[#allocation7 + $0x778] sm:$0xff] }
 0x4d1   : > { %12772 = vmatprep.subr.bf16.mxu1 %v12771_v21 }
 0x4d3   : > { %11954 = vmatmul.mubr.f32.gmra.mrb[4].mxu1 %v15164_v37 }
 0x4d4   : > { %11956 = vmatprep.mubr.f32.mxu1 %v15192_v58  ;;  %12774 = vmatpush3.bf16.msra.mxu1 %v12771_v21  ;;  %v12787_v21 = vpack.c.bf16 %v8401_v31, %v8400_v25  ;;  %v12799_v25 = vpack.c.bf16 %v8888_v45, %v8887_v38  ;;  %v8889_v31 = vld [vmem:[#allocation7 + $0x7a0] sm:$0xff]  ;;  %v8894_v38 = vld [vmem:[#allocation7 + $0x7c8] sm:$0xff]  ;;  %v17023_v45 = vld [vmem:[#allocation16_spill] sm:$0xff] }
 0x4d5   : > { %12776 = vmatprep.subr.bf16.mxu1 %v12775_v6 }
 0x4d7   : > { %11957 = vmatmul.mubr.f32.gmra.mrb[6].mxu1 %v15220_v17 }
 0x4d8   : > { %11959 = vmatprep.mubr.f32.mxu1 %v15248_v10  ;;  %12778 = vmatpush3.bf16.msra.mxu1 %v12775_v6  ;;  %v12791_v6 = vpack.c.bf16 %v8403_v15, %v8402_v60  ;;  %v17019_v60 = vld [vmem:[#allocation73_spill] sm:$0xff] }
 0x4d9   : > { %12780 = vmatprep.subr.bf16.mxu1 %v12779_v40  ;;  %v17020_v15 = vld [vmem:[#allocation13_spill] sm:$0xff] }
 0x4db   : > { %11960 = vmatmul.mubr.f32.gmra.mrb[8].mxu1 %v15276_v63 }
 0x4dc   : > { %11962 = vmatprep.mubr.f32.mxu1 %v15298_v57  ;;  %12782 = vmatpush3.bf16.msra.mxu1 %v12779_v40  ;;  %v12795_v40 = vpack.c.bf16 %v8886_v56, %v8885_v3  ;;  %v8891_v3 = vld [vmem:[#allocation7 + $0x7b0] sm:$0xff]  ;;  %v8892_v56 = vld [vmem:[#allocation7 + $0x7b8] sm:$0xff] }
 0x4dd   : > { %12784 = vmatprep.subr.bf16.mxu1 %v12783_v13 }
 0x4df   : > { %11963 = vmatmul.mubr.f32.gmra.mrb[10].mxu1 %v15322_v43 }
 0x4e0   : > { %11965 = vmatprep.mubr.f32.mxu1 %v15343_v54  ;;  %12786 = vmatpush3.bf16.msra.mxu1 %v12783_v13  ;;  %v17018_v13 = vld [vmem:[#allocation108_spill] sm:$0xff] }
 0x4e1   : > { %12788 = vmatprep.subr.bf16.mxu1 %v12787_v21 }
 0x4e3   : > { %11966 = vmatmul.mubr.f32.gmra.mrb[12].mxu1 %v15366_v27 }
 0x4e4   : > { %11968 = vmatprep.mubr.f32.mxu1 %v15381_v42  ;;  %12790 = vmatpush3.bf16.msra.mxu1 %v12787_v21  ;;  %v8890_v21 = vld [vmem:[#allocation7 + $0x7a8] sm:$0xff] }
 0x4e5   : > { %12792 = vmatprep.subr.bf16.mxu1 %v12791_v6 }
 0x4e7   : > { %11969 = vmatmul.mubr.f32.gmra.mrb[14].mxu1 %v15398_v62 }
 0x4e8   : > { %11971 = vmatprep.mubr.f32.mxu1 %v15401_v8  ;;  %12794 = vmatpush3.bf16.msra.mxu1 %v12791_v6  ;;  %v12803_v6 = vpack.c.bf16 %v8890_v21, %v8889_v31  ;;  %v8896_v31 = vld [vmem:[#allocation7 + $0x7d8] sm:$0xff]  ;;  %v17025_v21 = vld [vmem:[#allocation110_spill] sm:$0xff] }
 0x4e9   : > { %12796 = vmatprep.subr.bf16.mxu1 %v12795_v40 }
 0x4eb   : > { %11972 = vmatmul.mubr.f32.gmra.mrb[16].mxu1 %v15431_v53 }
 0x4ec   : > { %11974 = vmatprep.mubr.f32.mxu1 %v15449_v59 }
 0x4ef   : > { %11975 = vmatmul.mubr.f32.gmra.mrb[18].mxu1 %v15477_v29 }
 0x4f0   : > { %11977 = vmatprep.mubr.f32.mxu1 %v15538_v12 }
 0x4f3   : > { %11978 = vmatmul.mubr.f32.gmra.mrb[20].mxu1 %v15570_v41 }
 0x4f4   : > { %11980 = vmatprep.mubr.f32.mxu1 %v15573_v26 }
 0x4f7   : > { %11981 = vmatmul.mubr.f32.gmra.mrb[22].mxu1 %v15599_v52 }
 0x4f8   : > { %11983 = vmatprep.mubr.f32.mxu1 %v15601_v18 }
 0x4fb   : > { %11984 = vmatmul.mubr.f32.gmra.mrb[24].mxu1 %v15637_v61 }
 0x4fc   : > { %11986 = vmatprep.mubr.f32.mxu1 %v15639_v39  ;;  %v17024_v39 = vld [vmem:[#allocation109_spill] sm:$0xff] }
 0x4ff   : > { %11987 = vmatmul.mubr.f32.gmra.mrb[26].mxu1 %v15665_v51  ;;  %v12807_v51 = vpack.c.bf16 %v8892_v56, %v8891_v3  ;;  %v8898_v3 = vld [vmem:[#allocation7 + $0x7e8] sm:$0xff]  ;;  %v17027_v56 = vld [vmem:[#allocation112_spill] sm:$0xff] }
 0x500   : > { %11989 = vmatprep.mubr.f32.mxu1 %v15667_v14  ;;  %v17022_v14 = vld [vmem:[#allocation15_spill] sm:$0xff] }
 0x503   : > { %11990 = vmatmul.mubr.f32.gmra.mrb[28].mxu1 %v15677_v11  ;;  %v17021_v11 = vld [vmem:[#allocation14_spill] sm:$0xff] }
 0x504   : > { %11992 = vmatprep.mubr.f32.mxu1 %v15794_v49 }
 0x507   : > { %11993 = vmatmul.mubr.f32.gmra.mrb[30].mxu1 %v17011_v9 }
 0x508   : > { %12027 = vmatprep.mubr.f32.mxu1 %v17018_v13  ;;  %v8893_v13 = vld [vmem:[#allocation7 + $0x7c0] sm:$0xff] }
 0x50b   : > { %12028 = vmatmul.mubr.f32.vlgmr.msra.gmra.mrb[0].mxu1 %v17019_v60  ;;  %v8895_v60 = vld [vmem:[#allocation7 + $0x7d0] sm:$0xff] }
 0x50c   : > { %12030 = vmatprep.mubr.f32.mxu1 %v17020_v15  ;;  %12798 = vmatpush3.bf16.msra.mxu1 %v12795_v40  ;;  %v12811_v40 = vpack.c.bf16 %v8894_v38, %v8893_v13  ;;  %v17026_v15 = vld [vmem:[#allocation111_spill] sm:$0xff]  ;;  %v8900_v13 = vld [vmem:[#allocation7 + $0x7f8] sm:$0xff]  ;;  %v9158_v38 = vld [vmem:[#allocation7 + $0x800] sm:$0xff] }
 0x50d   : > { %12800 = vmatprep.subr.bf16.mxu1 %v12799_v25 }
 0x50f   : > { %12031 = vmatmul.mubr.f32.gmra.mrb[2].mxu1 %v17021_v11 }
 0x510   : > { %12033 = vmatprep.mubr.f32.mxu1 %v17022_v14  ;;  %12802 = vmatpush3.bf16.msra.mxu1 %v12799_v25  ;;  %v12815_v25 = vpack.c.bf16 %v8896_v31, %v8895_v60  ;;  %v8897_v14 = vld [vmem:[#allocation7 + $0x7e0] sm:$0xff]  ;;  %v9159_v60 = vld [vmem:[#allocation7 + $0x808] sm:$0xff]  ;;  %v17028_v31 = vld [vmem:[#allocation116_spill] sm:$0xff] }
 0x511   : > { %12804 = vmatprep.subr.bf16.mxu1 %v12803_v6 }
 0x513   : > { %12034 = vmatmul.mubr.f32.gmra.mrb[4].mxu1 %v17023_v45 }
 0x514   : > { %12036 = vmatprep.mubr.f32.mxu1 %v17024_v39  ;;  %12806 = vmatpush3.bf16.msra.mxu1 %v12803_v6  ;;  %v12819_v6 = vpack.c.bf16 %v8898_v3, %v8897_v14  ;;  %v8899_v39 = vld [vmem:[#allocation7 + $0x7f0] sm:$0xff]  ;;  %v17032_v3 = vld [vmem:[#allocation120_spill] sm:$0xff] }
 0x515   : > { %12808 = vmatprep.subr.bf16.mxu1 %v12807_v51  ;;  %v17031_v14 = vld [vmem:[#allocation119_spill] sm:$0xff] }
 0x517   : > { %12037 = vmatmul.mubr.f32.gmra.mrb[6].mxu1 %v17025_v21 }
 0x518   : > { %12039 = vmatprep.mubr.f32.mxu1 %v17026_v15  ;;  %12810 = vmatpush3.bf16.msra.mxu1 %v12807_v51  ;;  %v12823_v51 = vpack.c.bf16 %v8900_v13, %v8899_v39  ;;  %v17029_v15 = vld [vmem:[#allocation117_spill] sm:$0xff]  ;;  %v17034_v39 = vld [vmem:[#allocation122_spill] sm:$0xff]  ;;  %v17035_v13 = vld [vmem:[#allocation123_spill] sm:$0xff] }
 0x519   : > { %12812 = vmatprep.subr.bf16.mxu1 %v12811_v40 }
 0x51b   : > { %12040 = vmatmul.mubr.f32.gmra.mrb[8].mxu1 %v17027_v56 }
 0x51c   : > { %12042 = vmatprep.mubr.f32.mxu1 %v15943_v46  ;;  %12814 = vmatpush3.bf16.msra.mxu1 %v12811_v40  ;;  %v12827_v40 = vpack.c.bf16 %v9159_v60, %v9158_v38  ;;  %v17030_v46 = vld [vmem:[#allocation118_spill] sm:$0xff]  ;;  %v17039_v38 = vld [vmem:[#allocation127_spill] sm:$0xff]  ;;  %v17040_v60 = vld [vmem:[#allocation128_spill] sm:$0xff] }
 0x51d   : > { %12816 = vmatprep.subr.bf16.mxu1 %v12815_v25 }
 0x51f   : > { %12043 = vmatmul.mubr.f32.gmra.mrb[10].mxu1 %v15950_v20  ;;  %v9165_v20 = vld [vmem:[#allocation7 + $0x838] sm:$0xff] }
 0x520   : > { %12045 = vmatprep.mubr.f32.mxu1 %v15954_v47  ;;  %12818 = vmatpush3.bf16.msra.mxu1 %v12815_v25  ;;  %v17033_v25 = vld [vmem:[#allocation121_spill] sm:$0xff]  ;;  %v17048_v47 = vld [vmem:[#allocation86_spill] sm:$0xff] }
 0x521   : > { %12820 = vmatprep.subr.bf16.mxu1 %v12819_v6 }
 0x523   : > { %12046 = vmatmul.mubr.f32.gmra.mrb[12].mxu1 %v17028_v31  ;;  %v17036_v31 = vld [vmem:[#allocation124_spill] sm:$0xff] }
 0x524   : > { %12048 = vmatprep.mubr.f32.mxu1 %v17029_v15  ;;  %12822 = vmatpush3.bf16.msra.mxu1 %v12819_v6  ;;  %v17037_v15 = vld [vmem:[#allocation125_spill] sm:$0xff]  ;;  %v17038_v6 = vld [vmem:[#allocation126_spill] sm:$0xff] }
 0x525   : > { %12824 = vmatprep.subr.bf16.mxu1 %v12823_v51 }
 0x527   : > { %12049 = vmatmul.mubr.f32.gmra.mrb[14].mxu1 %v17030_v46  ;;  %v9162_v46 = vld [vmem:[#allocation7 + $0x820] sm:$0xff] }
 0x528   : > { %12051 = vmatprep.mubr.f32.mxu1 %v17031_v14  ;;  %12826 = vmatpush3.bf16.msra.mxu1 %v12823_v51  ;;  %v17041_v51 = vld [vmem:[#allocation129_spill] sm:$0xff]  ;;  %v17042_v14 = vld [vmem:[#allocation130_spill] sm:$0xff] }
 0x529   : > { %12828 = vmatprep.subr.bf16.mxu1 %v12827_v40 }
 0x52b   : > { %12052 = vmatmul.mubr.f32.gmra.mrb[16].mxu1 %v17032_v3  ;;  %v17043_v3 = vld [vmem:[#allocation131_spill] sm:$0xff] }
 0x52c   : > { %12054 = vmatprep.mubr.f32.mxu1 %v17033_v25  ;;  %v8351_v25 = vrot.slane %v15794_v49, 1 }
 0x52f   : > { %12055 = vmatmul.mubr.f32.gmra.mrb[18].mxu1 %v17034_v39  ;;  %v8352_v39 = vrot.slane %v17011_v9, 1 }
 0x530   : > { %12057 = vmatprep.mubr.f32.mxu1 %v17035_v13  ;;  %v17044_v13 = vld [vmem:[#allocation132_spill] sm:$0xff] }
 0x533   : > { %12058 = vmatmul.mubr.f32.gmra.mrb[20].mxu1 %v17036_v31 }
 0x534   : > { %12060 = vmatprep.mubr.f32.mxu1 %v17037_v15  ;;  %v16156_v15 = vsel %vm1298_vm2, %v8351_v25, %v8352_v39 }
 0x535   : > { %17045 = vst [vmem:[#allocation95_spill] sm:$0xff] %v16156_v15 }
 0x537   : > { %12061 = vmatmul.mubr.f32.gmra.mrb[22].mxu1 %v17038_v6  ;;  %v9161_v6 = vld [vmem:[#allocation7 + $0x818] sm:$0xff] }
 0x538   : > { %12063 = vmatprep.mubr.f32.mxu1 %v17039_v38  ;;  %v17046_v38 = vld [vmem:[#allocation80_spill] sm:$0xff] }
 0x53b   : > { %12064 = vmatmul.mubr.f32.gmra.mrb[24].mxu1 %v17040_v60  ;;  %v16161_v60 = vsel %vm1298_vm2, %v8352_v39, %v17046_v38  ;;  %v17050_v39 = vld [vmem:[#allocation93_spill] sm:$0xff] }
 0x53c   : > { %12066 = vmatprep.mubr.f32.mxu1 %v17041_v51  ;;  %v9160_v51 = vld [vmem:[#allocation7 + $0x810] sm:$0xff] }
 0x53d   : > { %v12831_v31 = vpack.c.bf16 %v9161_v6, %v9160_v51  ;;  %v9167_v6 = vld [vmem:[#allocation7 + $0x848] sm:$0xff]  ;;  %v17051_v51 = vld [vmem:[#allocation96_spill] sm:$0xff] }
 0x53f   : > { %12067 = vmatmul.mubr.f32.gmra.mrb[26].mxu1 %v17042_v14  ;;  %v17047_v14 = vld [vmem:[#allocation84_spill] sm:$0xff] }
 0x540   : > { %12069 = vmatprep.mubr.f32.mxu1 %v17043_v3  ;;  %v9163_v3 = vld [vmem:[#allocation7 + $0x828] sm:$0xff] }
 0x541   : > { %v12835_v25 = vpack.c.bf16 %v9163_v3, %v9162_v46  ;;  %v9169_v46 = vld [vmem:[#allocation7 + $0x858] sm:$0xff] }
 0x542   : > { %v9173_v3 = vld [vmem:[#allocation7 + $0x878] sm:$0xff] }
 0x543   : > { %12070 = vmatmul.mubr.f32.gmra.mrb[28].mxu1 %v17044_v13  ;;  %v17049_v13 = vld [vmem:[#allocation88_spill] sm:$0xff] }
 0x544   : > { %12072 = vmatprep.mubr.f32.mxu1 %v16156_v15  ;;  %v9164_v15 = vld [vmem:[#allocation7 + $0x830] sm:$0xff] }
 0x545   : > { %v12839_v38 = vpack.c.bf16 %v9165_v20, %v9164_v15  ;;  %v9171_v20 = vld [vmem:[#allocation7 + $0x868] sm:$0xff]  ;;  %v9172_v15 = vld [vmem:[#allocation7 + $0x870] sm:$0xff] }
 0x547   : > { %12073 = vmatmul.mubr.f32.gmra.mrb[30].mxu1 %v16161_v60 }
 0x548   : > { %12107 = vmatprep.mubr.f32.mxu1 %v17047_v14  ;;  %v9166_v14 = vld [vmem:[#allocation7 + $0x840] sm:$0xff] }
 0x54b   : > { %12108 = vmatmul.mubr.f32.vlgmr.msra.gmra.mrb[0].mxu1 %v17048_v47  ;;  %v12843_v47 = vpack.c.bf16 %v9167_v6, %v9166_v14  ;;  %v9570_v14 = vld [vmem:[#allocation7 + $0x8d8] sm:$0xff]  ;;  %v9572_v6 = vld [vmem:[#allocation7 + $0x8e8] sm:$0xff] }
 0x54c   : > { %12110 = vmatprep.mubr.f32.mxu1 %v17049_v13  ;;  %12830 = vmatpush3.bf16.msra.mxu1 %v12827_v40  ;;  %v9168_v40 = vld [vmem:[#allocation7 + $0x850] sm:$0xff]  ;;  %v9560_v13 = vld [vmem:[#allocation7 + $0x888] sm:$0xff] }
 0x54d   : > { %12832 = vmatprep.subr.bf16.mxu1 %v12831_v31 }
 0x54f   : > { %12111 = vmatmul.mubr.f32.gmra.mrb[2].mxu1 %v17004_v24  ;;  %v12847_v24 = vpack.c.bf16 %v9169_v46, %v9168_v40  ;;  %v17082_v40 = vld [vmem:[#allocation127_spill] sm:$0xff]  ;;  %v17083_v46 = vld [vmem:[#allocation128_spill] sm:$0xff] }
 0x550   : > { %12113 = vmatprep.mubr.f32.mxu1 %v17050_v39  ;;  %12834 = vmatpush3.bf16.msra.mxu1 %v12831_v31  ;;  %v9170_v31 = vld [vmem:[#allocation7 + $0x860] sm:$0xff]  ;;  %v9568_v39 = vld [vmem:[#allocation7 + $0x8c8] sm:$0xff] }
 0x551   : > { %12836 = vmatprep.subr.bf16.mxu1 %v12835_v25 }
 0x553   : > { %12114 = vmatmul.mubr.f32.gmra.mrb[4].mxu1 %v17006_v34  ;;  %v12851_v34 = vpack.c.bf16 %v9171_v20, %v9170_v31  ;;  %v17085_v31 = vld [vmem:[#allocation130_spill] sm:$0xff]  ;;  %v17086_v20 = vld [vmem:[#allocation131_spill] sm:$0xff] }
 0x554   : > { %12116 = vmatprep.mubr.f32.mxu1 %v17051_v51  ;;  %12838 = vmatpush3.bf16.msra.mxu1 %v12835_v25  ;;  %v9574_v51 = vld [vmem:[#allocation7 + $0x8f8] sm:$0xff] }
 0x555   : > { %12840 = vmatprep.subr.bf16.mxu1 %v12839_v38 }
 0x557   : > { %12117 = vmatmul.mubr.f32.gmra.mrb[6].mxu1 %v17008_v2  ;;  %v9559_v2 = vld [vmem:[#allocation7 + $0x880] sm:$0xff] }
 0x558   : > { %12119 = vmatprep.mubr.f32.mxu1 %v17009_v36  ;;  %12842 = vmatpush3.bf16.msra.mxu1 %v12839_v38  ;;  %v12855_v36 = vpack.c.bf16 %v9173_v3, %v9172_v15  ;;  %v9565_v38 = vld [vmem:[#allocation7 + $0x8b0] sm:$0xff]  ;;  %v17089_v3 = vld [vmem:[#allocation80_spill] sm:$0xff] }
 0x559   : > { %12844 = vmatprep.subr.bf16.mxu1 %v12843_v47  ;;  %v17088_v15 = vld [vmem:[#allocation95_spill] sm:$0xff] }
 0x55b   : > { %12120 = vmatmul.mubr.f32.gmra.mrb[8].mxu1 %v17010_v19 }
 0x55c   : > { %12122 = vmatprep.mubr.f32.mxu1 %v15769_v7  ;;  %12846 = vmatpush3.bf16.msra.mxu1 %v12843_v47  ;;  %v12859_v7 = vpack.c.bf16 %v9560_v13, %v9559_v2  ;;  %v17081_v47 = vld [vmem:[#allocation126_spill] sm:$0xff] }
 0x55d   : > { %12848 = vmatprep.subr.bf16.mxu1 %v12847_v24  ;;  %v17091_v2 = vld [vmem:[#allocation74_spill] sm:$0xff] }
 0x55f   : > { %12123 = vmatmul.mubr.f32.gmra.mrb[10].mxu1 %v15781_v4  ;;  %v17052_v4 = vld [vmem:[#allocation103_spill] sm:$0xff] }
 0x560   : > { %12125 = vmatprep.mubr.f32.mxu1 %v15789_v44  ;;  %12850 = vmatpush3.bf16.msra.mxu1 %v12847_v24  ;;  %v17053_v44 = vld [vmem:[#allocation104_spill] sm:$0xff]  ;;  %v17084_v24 = vld [vmem:[#allocation129_spill] sm:$0xff] }
 0x561   : > { %12852 = vmatprep.subr.bf16.mxu1 %v12851_v34 }
 0x563   : > { %12126 = vmatmul.mubr.f32.gmra.mrb[12].mxu1 %v15799_v28  ;;  %v17054_v28 = vld [vmem:[#allocation105_spill] sm:$0xff] }
 0x564   : > { %12128 = vmatprep.mubr.f32.mxu1 %v15805_v50  ;;  %12854 = vmatpush3.bf16.msra.mxu1 %v12851_v34  ;;  %v17055_v50 = vld [vmem:[#allocation106_spill] sm:$0xff]  ;;  %v17087_v34 = vld [vmem:[#allocation132_spill] sm:$0xff] }
 0x565   : > { %12856 = vmatprep.subr.bf16.mxu1 %v12855_v36 }
 0x567   : > { %12129 = vmatmul.mubr.f32.gmra.mrb[14].mxu1 %v15814_v22  ;;  %v17056_v22 = vld [vmem:[#allocation107_spill] sm:$0xff] }
 0x568   : > { %12131 = vmatprep.mubr.f32.mxu1 %v15820_v23  ;;  %12858 = vmatpush3.bf16.msra.mxu1 %v12855_v36  ;;  %v17057_v23 = vld [vmem:[#allocation92_spill] sm:$0xff]  ;;  %v17090_v36 = vld [vmem:[#allocation18_spill] sm:$0xff] }
 0x569   : > { %12860 = vmatprep.subr.bf16.mxu1 %v12859_v7  ;;  %v5071_v13 = vadd.f32 %v17091_v2, %v17090_v36  ;;  %v17116_v36 = vld [vmem:[#allocation33_spill] sm:$0xff]  ;;  %v17117_v2 = vld [vmem:[#allocation87_spill] sm:$0xff] }
 0x56b   : > { %12132 = vmatmul.mubr.f32.gmra.mrb[16].mxu1 %v15825_v33  ;;  %v17058_v33 = vld [vmem:[#allocation58_spill] sm:$0xff] }
 0x56c   : > { %12134 = vmatprep.mubr.f32.mxu1 %v15831_v32  ;;  %v9561_v32 = vld [vmem:[#allocation7 + $0x890] sm:$0xff] }
 0x56f   : > { %12135 = vmatmul.mubr.f32.gmra.mrb[18].mxu1 %v15836_v1  ;;  %v9562_v1 = vld [vmem:[#allocation7 + $0x898] sm:$0xff] }
 0x570   : > { %12137 = vmatprep.mubr.f32.mxu1 %v15842_v5  ;;  %v12863_v5 = vpack.c.bf16 %v9562_v1, %v9561_v32 }
 0x573   : > { %12138 = vmatmul.mubr.f32.gmra.mrb[20].mxu1 %v15847_v48  ;;  %v9563_v48 = vld [vmem:[#allocation7 + $0x8a0] sm:$0xff] }
 0x574   : > { %12140 = vmatprep.mubr.f32.mxu1 %v15853_v0  ;;  %v9564_v0 = vld [vmem:[#allocation7 + $0x8a8] sm:$0xff] }
 0x575   : > { %v12867_v19 = vpack.c.bf16 %v9564_v0, %v9563_v48  ;;  %v17097_v48 = vld [vmem:[#allocation77_spill] sm:$0xff] }
 0x577   : > { %12141 = vmatmul.mubr.f32.gmra.mrb[22].mxu1 %v17052_v4  ;;  %v17092_v4 = vld [vmem:[#allocation17_spill] sm:$0xff] }
 0x578   : > { %12143 = vmatprep.mubr.f32.mxu1 %v17053_v44  ;;  %v17093_v44 = vld [vmem:[#allocation75_spill] sm:$0xff] }
 0x57b   : > { %12144 = vmatmul.mubr.f32.gmra.mrb[24].mxu1 %v17054_v28  ;;  %v5070_v28 = vadd.f32 %v17093_v44, %v17092_v4 }
 0x57c   : > { %12146 = vmatprep.mubr.f32.mxu1 %v17055_v50 }
 0x57f   : > { %12147 = vmatmul.mubr.f32.gmra.mrb[26].mxu1 %v17056_v22 }
 0x580   : > { %12149 = vmatprep.mubr.f32.mxu1 %v17057_v23 }
 0x583   : > { %12150 = vmatmul.mubr.f32.gmra.mrb[28].mxu1 %v16088_v55  ;;  %v9566_v55 = vld [vmem:[#allocation7 + $0x8b8] sm:$0xff] }
 0x584   : > { %12152 = vmatprep.mubr.f32.mxu1 %v17058_v33  ;;  %v12871_v25 = vpack.c.bf16 %v9566_v55, %v9565_v38 }
 0x587   : > { %12153 = vmatmul.mubr.f32.gmra.mrb[30].mxu1 %v17058_v33  ;;  %v17095_v33 = vld [vmem:[#allocation76_spill] sm:$0xff] }
 0x588   : > { %12187 = vmatprep.mubr.f32.mxu1 %v17016_v35  ;;  %v9567_v35 = vld [vmem:[#allocation7 + $0x8c0] sm:$0xff] }
 0x58b   : > { %12188 = vmatmul.mubr.f32.vlgmr.msra.gmra.mrb[0].mxu1 %v17017_v30  ;;  %v9569_v30 = vld [vmem:[#allocation7 + $0x8d0] sm:$0xff] }
 0x58c   : > { %12190 = vmatprep.mubr.f32.mxu1 %v15136_v16  ;;  %12862 = vmatpush3.bf16.msra.mxu1 %v12859_v7  ;;  %v12875_v16 = vpack.c.bf16 %v9568_v39, %v9567_v35  ;;  %v17099_v35 = vld [vmem:[#allocation78_spill] sm:$0xff] }
 0x58d   : > { %12864 = vmatprep.subr.bf16.mxu1 %v12863_v5 }
 0x58f   : > { %12191 = vmatmul.mubr.f32.gmra.mrb[2].mxu1 %v15164_v37  ;;  %v12879_v37 = vpack.c.bf16 %v9570_v14, %v9569_v30  ;;  %v17100_v30 = vld [vmem:[#allocation21_spill] sm:$0xff]  ;;  %v17101_v14 = vld [vmem:[#allocation79_spill] sm:$0xff] }
 0x590   : > { %12193 = vmatprep.mubr.f32.mxu1 %v15192_v58  ;;  %12866 = vmatpush3.bf16.msra.mxu1 %v12863_v5  ;;  %v9571_v58 = vld [vmem:[#allocation7 + $0x8e0] sm:$0xff]  ;;  %v17096_v5 = vld [vmem:[#allocation19_spill] sm:$0xff] }
 0x591   : > { %12868 = vmatprep.subr.bf16.mxu1 %v12867_v19  ;;  %v5072_v0 = vadd.f32 %v17097_v48, %v17096_v5 }
 0x593   : > { %12194 = vmatmul.mubr.f32.gmra.mrb[4].mxu1 %v15220_v17  ;;  %v12883_v17 = vpack.c.bf16 %v9572_v6, %v9571_v58 }
 0x594   : > { %12196 = vmatprep.mubr.f32.mxu1 %v15248_v10  ;;  %12870 = vmatpush3.bf16.msra.mxu1 %v12867_v19  ;;  %v9573_v10 = vld [vmem:[#allocation7 + $0x8f0] sm:$0xff] }
 0x595   : > { %12872 = vmatprep.subr.bf16.mxu1 %v12871_v25 }
 0x597   : > { %12197 = vmatmul.mubr.f32.gmra.mrb[6].mxu1 %v15276_v63  ;;  %v12887_v63 = vpack.c.bf16 %v9574_v51, %v9573_v10  ;;  %v17102_v10 = vld [vmem:[#allocation24_spill] sm:$0xff]  ;;  %v17103_v51 = vld [vmem:[#allocation29_spill] sm:$0xff] }
 0x598   : > { %12199 = vmatprep.mubr.f32.mxu1 %v15298_v57  ;;  %12874 = vmatpush3.bf16.msra.mxu1 %v12871_v25  ;;  %v17060_v57 = vld [vmem:[#allocation56_spill] sm:$0xff]  ;;  %v17098_v25 = vld [vmem:[#allocation22_spill] sm:$0xff] }
 0x599   : > { %12876 = vmatprep.subr.bf16.mxu1 %v12875_v16  ;;  %v5075_v39 = vadd.f32 %v17099_v35, %v17098_v25  ;;  %v17124_v25 = vld [vmem:[#allocation38_spill] sm:$0xff]  ;;  %v17125_v35 = vld [vmem:[#allocation101_spill] sm:$0xff] }
 0x59b   : > { %12200 = vmatmul.mubr.f32.gmra.mrb[8].mxu1 %v15322_v43  ;;  %v17059_v43 = vld [vmem:[#allocation55_spill] sm:$0xff] }
 0x59c   : > { %12202 = vmatprep.mubr.f32.mxu1 %v15343_v54  ;;  %12878 = vmatpush3.bf16.msra.mxu1 %v12875_v16  ;;  %v17061_v54 = vld [vmem:[#allocation57_spill] sm:$0xff] }
 0x59d   : > { %12880 = vmatprep.subr.bf16.mxu1 %v12879_v37 }
 0x59f   : > { %12203 = vmatmul.mubr.f32.gmra.mrb[10].mxu1 %v15366_v27  ;;  %v17062_v27 = vld [vmem:[#allocation59_spill] sm:$0xff] }
 0x5a0   : > { %12205 = vmatprep.mubr.f32.mxu1 %v15381_v42  ;;  %12882 = vmatpush3.bf16.msra.mxu1 %v12879_v37  ;;  %v17064_v42 = vld [vmem:[#allocation13_spill] sm:$0xff]  ;;  %v5074_v37 = vadd.f32 %v17101_v14, %v17100_v30 }
 0x5a1   : > { %12884 = vmatprep.subr.bf16.mxu1 %v12883_v17 }
 0x5a3   : > { %12206 = vmatmul.mubr.f32.gmra.mrb[12].mxu1 %v15398_v62  ;;  %v17065_v62 = vld [vmem:[#allocation15_spill] sm:$0xff] }
 0x5a4   : > { %12208 = vmatprep.mubr.f32.mxu1 %v15401_v8  ;;  %12886 = vmatpush3.bf16.msra.mxu1 %v12883_v17  ;;  %v17066_v8 = vld [vmem:[#allocation109_spill] sm:$0xff] }
 0x5a5   : > { %12888 = vmatprep.subr.bf16.mxu1 %v12887_v63 }
 0x5a7   : > { %12209 = vmatmul.mubr.f32.gmra.mrb[14].mxu1 %v15431_v53  ;;  %v17067_v53 = vld [vmem:[#allocation111_spill] sm:$0xff] }
 0x5a8   : > { %12211 = vmatprep.mubr.f32.mxu1 %v15449_v59  ;;  %12890 = vmatpush3.bf16.msra.mxu1 %v12887_v63  ;;  %v17068_v59 = vld [vmem:[#allocation113_spill] sm:$0xff]  ;;  %v5077_v63 = vadd.f32 %v17103_v51, %v17102_v10  ;;  %v17128_v10 = vld [vmem:[#allocation40_spill] sm:$0xff]  ;;  %v17129_v51 = vld [vmem:[#allocation62_spill] sm:$0xff] }
 0x5ab   : > { %12212 = vmatmul.mubr.f32.gmra.mrb[16].mxu1 %v15477_v29  ;;  %v17069_v29 = vld [vmem:[#allocation114_spill] sm:$0xff] }
 0x5ac   : > { %12214 = vmatprep.mubr.f32.mxu1 %v15538_v12  ;;  %v17063_v12 = vmov 0.0  }
 0x5af   : > { %12215 = vmatmul.mubr.f32.gmra.mrb[18].mxu1 %v15570_v41  ;;  %v17070_v41 = vld [vmem:[#allocation115_spill] sm:$0xff] }
 0x5b0   : > { %12217 = vmatprep.mubr.f32.mxu1 %v15573_v26  ;;  %v17071_v26 = vld [vmem:[#allocation116_spill] sm:$0xff] }
 0x5b3   : > { %12218 = vmatmul.mubr.f32.gmra.mrb[20].mxu1 %v15599_v52  ;;  %v17072_v52 = vld [vmem:[#allocation117_spill] sm:$0xff] }
 0x5b4   : > { %12220 = vmatprep.mubr.f32.mxu1 %v15601_v18  ;;  %v17073_v18 = vld [vmem:[#allocation118_spill] sm:$0xff] }
 0x5b7   : > { %12221 = vmatmul.mubr.f32.gmra.mrb[22].mxu1 %v15637_v61  ;;  %v17074_v61 = vld [vmem:[#allocation119_spill] sm:$0xff] }
 0x5b8   : > { %12223 = vmatprep.mubr.f32.mxu1 %v17059_v43 }
 0x5bb   : > { %12224 = vmatmul.mubr.f32.gmra.mrb[24].mxu1 %v17060_v57  ;;  %v17104_v57 = vld [vmem:[#allocation23_spill] sm:$0xff] }
 0x5bc   : > { %12226 = vmatprep.mubr.f32.mxu1 %v17061_v54  ;;  %v17105_v54 = vld [vmem:[#allocation30_spill] sm:$0xff] }
 0x5bf   : > { %12227 = vmatmul.mubr.f32.gmra.mrb[26].mxu1 %v17062_v27  ;;  %v5076_v27 = vadd.f32 %v17105_v54, %v17104_v57 }
 0x5c0   : > { %12229 = vmatprep.mubr.f32.mxu1 %v15794_v49  ;;  %v17076_v49 = vld [vmem:[#allocation121_spill] sm:$0xff] }
 0x5c3   : > { %12230 = vmatmul.mubr.f32.gmra.mrb[28].mxu1 %v17011_v9  ;;  %v17077_v9 = vld [vmem:[#allocation122_spill] sm:$0xff] }
 0x5c4   : > { %12232 = vmatprep.mubr.f32.mxu1 %v17063_v12 }
 0x5c7   : > { %12233 = vmatmul.mubr.f32.gmra.mrb[30].mxu1 %v17063_v12 }
 0x5c8   : > { %12267 = vmatprep.mubr.f32.mxu1 %v17064_v42 }
 0x5cb   : > { %12268 = vmatmul.mubr.f32.vlgmr.msra.gmra.mrb[0].mxu1 %v17021_v11  ;;  %v17075_v11 = vld [vmem:[#allocation120_spill] sm:$0xff] }
 0x5cc   : > { %12270 = vmatprep.mubr.f32.mxu1 %v17065_v62 }
 0x5cf   : > { %12271 = vmatmul.mubr.f32.gmra.mrb[2].mxu1 %v17023_v45  ;;  %v17078_v45 = vld [vmem:[#allocation123_spill] sm:$0xff] }
 0x5d0   : > { %12273 = vmatprep.mubr.f32.mxu1 %v17066_v8  ;;  %v17106_v8 = vld [vmem:[#allocation26_spill] sm:$0xff] }
 0x5d3   : > { %12274 = vmatmul.mubr.f32.gmra.mrb[4].mxu1 %v17025_v21  ;;  %v17079_v21 = vld [vmem:[#allocation124_spill] sm:$0xff] }
 0x5d4   : > { %12276 = vmatprep.mubr.f32.mxu1 %v17067_v53  ;;  %v17107_v53 = vld [vmem:[#allocation31_spill] sm:$0xff] }
 0x5d7   : > { %12277 = vmatmul.mubr.f32.gmra.mrb[6].mxu1 %v17027_v56  ;;  %v17080_v56 = vld [vmem:[#allocation125_spill] sm:$0xff] }
 0x5d8   : > { %12279 = vmatprep.mubr.f32.mxu1 %v17068_v59  ;;  %v5079_v59 = vadd.f32 %v17107_v53, %v17106_v8  ;;  %v17132_v8 = vld [vmem:[#allocation42_spill] sm:$0xff]  ;;  %v17133_v53 = vld [vmem:[#allocation64_spill] sm:$0xff] }
 0x5db   : > { %12280 = vmatmul.mubr.f32.gmra.mrb[8].mxu1 %v17069_v29 }
 0x5dc   : > { %12282 = vmatprep.mubr.f32.mxu1 %v17070_v41  ;;  %v17108_v41 = vld [vmem:[#allocation25_spill] sm:$0xff] }
 0x5df   : > { %12283 = vmatmul.mubr.f32.gmra.mrb[10].mxu1 %v17071_v26  ;;  %v17109_v26 = vld [vmem:[#allocation32_spill] sm:$0xff] }
 0x5e0   : > { %12285 = vmatprep.mubr.f32.mxu1 %v17072_v52  ;;  %v5078_v52 = vadd.f32 %v17109_v26, %v17108_v41 }
 0x5e3   : > { %12286 = vmatmul.mubr.f32.gmra.mrb[12].mxu1 %v17073_v18 }
 0x5e4   : > { %12288 = vmatprep.mubr.f32.mxu1 %v17074_v61 }
 0x5e7   : > { %12289 = vmatmul.mubr.f32.gmra.mrb[14].mxu1 %v17075_v11 }
 0x5e8   : > { %12291 = vmatprep.mubr.f32.mxu1 %v17076_v49  ;;  %v17110_v49 = vld [vmem:[#allocation28_spill] sm:$0xff] }
 0x5eb   : > { %12292 = vmatmul.mubr.f32.gmra.mrb[16].mxu1 %v17077_v9  ;;  %v17111_v9 = vld [vmem:[#allocation34_spill] sm:$0xff] }
 0x5ec   : > { %12294 = vmatprep.mubr.f32.mxu1 %v17078_v45  ;;  %v5081_v45 = vadd.f32 %v17111_v9, %v17110_v49  ;;  %v17136_v49 = vld [vmem:[#allocation44_spill] sm:$0xff]  ;;  %v17137_v9 = vld [vmem:[#allocation66_spill] sm:$0xff] }
 0x5ef   : > { %12295 = vmatmul.mubr.f32.gmra.mrb[18].mxu1 %v17079_v21 }
 0x5f0   : > { %12297 = vmatprep.mubr.f32.mxu1 %v17080_v56  ;;  %v17112_v56 = vld [vmem:[#allocation27_spill] sm:$0xff] }
 0x5f3   : > { %12298 = vmatmul.mubr.f32.gmra.mrb[20].mxu1 %v17081_v47  ;;  %v17113_v47 = vld [vmem:[#allocation82_spill] sm:$0xff] }
 0x5f4   : > { %12300 = vmatprep.mubr.f32.mxu1 %v17082_v40  ;;  %v5080_v40 = vadd.f32 %v17113_v47, %v17112_v56 }
 0x5f7   : > { %12301 = vmatmul.mubr.f32.gmra.mrb[22].mxu1 %v17083_v46 }
 0x5f8   : > { %12303 = vmatprep.mubr.f32.mxu1 %v17084_v24 }
 0x5fb   : > { %12304 = vmatmul.mubr.f32.gmra.mrb[24].mxu1 %v17085_v31 }
 0x5fc   : > { %12306 = vmatprep.mubr.f32.mxu1 %v17086_v20  ;;  %v17114_v20 = vld [vmem:[#allocation35_spill] sm:$0xff] }
 0x5ff   : > { %12307 = vmatmul.mubr.f32.gmra.mrb[26].mxu1 %v17087_v34  ;;  %v17115_v34 = vld [vmem:[#allocation83_spill] sm:$0xff] }
 0x600   : > { %12309 = vmatprep.mubr.f32.mxu1 %v17088_v15  ;;  %v5083_v15 = vadd.f32 %v17115_v34, %v17114_v20  ;;  %v17140_v20 = vld [vmem:[#allocation46_spill] sm:$0xff]  ;;  %v17141_v34 = vld [vmem:[#allocation68_spill] sm:$0xff] }
 0x603   : > { %12310 = vmatmul.mubr.f32.gmra.mrb[28].mxu1 %v16161_v60  ;;  %v17094_v60 = vld [vmem:[#allocation20_spill] sm:$0xff] }
 0x604   : > { %12312 = vmatprep.mubr.f32.mxu1 %v17089_v3  ;;  %v5073_v32 = vadd.f32 %v17095_v33, %v17094_v60  ;;  %v17120_v60 = vld [vmem:[#allocation36_spill] sm:$0xff]  ;;  %v17121_v33 = vld [vmem:[#allocation91_spill] sm:$0xff] }
 0x607   : > { %12313 = vmatmul.mubr.f32.gmra.mrb[30].mxu1 %v17089_v3 }
 0x69e   : > { %v12269_v7 = vpop.f32.mrb[0].mxu1 }
 0x69f   : > { %v9833_v50 = vadd.f32 %v12269_v7, %v5071_v13  ;;  %v9641_v22 = vpop.f32.mrb[1].mxu1  ;;  %v5082_v13 = vadd.f32 %v17117_v2, %v17116_v36 }
 0x6a0   : > { %v9832_v23 = vadd.f32 %v9641_v22, %v5070_v28  ;;  %v17118_v28 = vld [vmem:[#allocation37_spill] sm:$0xff] }
 0x6a1   : > { %9865 = vst [vmem:[%s16266_s15 + $0x8] sm:$0xff] %v9833_v50  ;;  %v17119_v50 = vld [vmem:[#allocation90_spill] sm:$0xff] }
 0x6a2   : > { %9864 = vst [vmem:[%s16266_s15] sm:$0xff] %v9832_v23  ;;  %v12272_v1 = vpop.f32.mrb[2].mxu1  ;;  %v5085_v22 = vadd.f32 %v17119_v50, %v17118_v28  ;;  %v17144_v28 = vld [vmem:[#allocation48_spill] sm:$0xff]  ;;  %v17145_v50 = vld [vmem:[#allocation70_spill] sm:$0xff] }
 0x6a3   : > { %v9835_v19 = vadd.f32 %v12272_v1, %v5073_v32  ;;  %v9651_v38 = vpop.f32.mrb[3].mxu1  ;;  %v5084_v32 = vadd.f32 %v17121_v33, %v17120_v60 }
 0x6a4   : > { %v9834_v55 = vadd.f32 %v9651_v38, %v5072_v0  ;;  %v17122_v0 = vld [vmem:[#allocation39_spill] sm:$0xff] }
 0x6a5   : > { %9867 = vst [vmem:[%s16266_s15 + $0x18] sm:$0xff] %v9835_v19  ;;  %v17123_v19 = vld [vmem:[#allocation99_spill] sm:$0xff] }
 0x6a6   : > { %9866 = vst [vmem:[%s16266_s15 + $0x10] sm:$0xff] %v9834_v55  ;;  %v12275_v16 = vpop.f32.mrb[4].mxu1  ;;  %v5087_v38 = vadd.f32 %v17123_v19, %v17122_v0  ;;  %v17148_v0 = vld [vmem:[#allocation50_spill] sm:$0xff]  ;;  %v17149_v19 = vld [vmem:[#allocation81_spill] sm:$0xff] }
 0x6a7   : > { %v9837_v58 = vadd.f32 %v12275_v16, %v5075_v39  ;;  %v9661_v6 = vpop.f32.mrb[5].mxu1  ;;  %v5086_v39 = vadd.f32 %v17125_v35, %v17124_v25 }
 0x6a8   : > { %v9836_v17 = vadd.f32 %v9661_v6, %v5074_v37  ;;  %v17126_v37 = vld [vmem:[#allocation41_spill] sm:$0xff] }
 0x6a9   : > { %9869 = vst [vmem:[%s16266_s15 + $0x28] sm:$0xff] %v9837_v58  ;;  %v17127_v58 = vld [vmem:[#allocation61_spill] sm:$0xff] }
 0x6aa   : > { %9868 = vst [vmem:[%s16266_s15 + $0x20] sm:$0xff] %v9836_v17  ;;  %v12278_v43 = vpop.f32.mrb[6].mxu1  ;;  %v5089_v6 = vadd.f32 %v17127_v58, %v17126_v37  ;;  %v17152_v37 = vld [vmem:[#allocation52_spill] sm:$0xff]  ;;  %v17153_v58 = vld [vmem:[#allocation54_spill] sm:$0xff] }
 0x6ab   : > { %v9839_v12 = vadd.f32 %v12278_v43, %v5077_v63  ;;  %v9671_v42 = vpop.f32.mrb[7].mxu1  ;;  %v5088_v63 = vadd.f32 %v17129_v51, %v17128_v10 }
 0x6ac   : > { %v9838_v62 = vadd.f32 %v9671_v42, %v5076_v27  ;;  %v17130_v27 = vld [vmem:[#allocation43_spill] sm:$0xff] }
 0x6ad   : > { %9871 = vst [vmem:[%s16266_s15 + $0x38] sm:$0xff] %v9839_v12  ;;  %v17131_v12 = vld [vmem:[#allocation63_spill] sm:$0xff] }
 0x6ae   : > { %9870 = vst [vmem:[%s16266_s15 + $0x30] sm:$0xff] %v9838_v62  ;;  %v12281_v29 = vpop.f32.mrb[8].mxu1  ;;  %v5091_v42 = vadd.f32 %v17131_v12, %v17130_v27 }
 0x6af   : > { %v9841_v18 = vadd.f32 %v12281_v29, %v5079_v59  ;;  %v9681_v61 = vpop.f32.mrb[9].mxu1  ;;  %v5090_v59 = vadd.f32 %v17133_v53, %v17132_v8 }
 0x6b0   : > { %v9840_v11 = vadd.f32 %v9681_v61, %v5078_v52  ;;  %v17134_v52 = vld [vmem:[#allocation45_spill] sm:$0xff] }
 0x6b1   : > { %9873 = vst [vmem:[%s16266_s15 + $0x48] sm:$0xff] %v9841_v18  ;;  %v17135_v18 = vld [vmem:[#allocation65_spill] sm:$0xff] }
 0x6b2   : > { %9872 = vst [vmem:[%s16266_s15 + $0x40] sm:$0xff] %v9840_v11  ;;  %v12284_v21 = vpop.f32.mrb[10].mxu1  ;;  %v5093_v61 = vadd.f32 %v17135_v18, %v17134_v52 }
 0x6b3   : > { %v9843_v46 = vadd.f32 %v12284_v21, %v5081_v45  ;;  %v9691_v24 = vpop.f32.mrb[11].mxu1  ;;  %v5092_v45 = vadd.f32 %v17137_v9, %v17136_v49 }
 0x6b4   : > { %v9842_v31 = vadd.f32 %v9691_v24, %v5080_v40  ;;  %v17138_v40 = vld [vmem:[#allocation47_spill] sm:$0xff] }
 0x6b5   : > { %9875 = vst [vmem:[%s16266_s15 + $0x58] sm:$0xff] %v9843_v46  ;;  %v17139_v46 = vld [vmem:[#allocation67_spill] sm:$0xff] }
 0x6b6   : > { %9874 = vst [vmem:[%s16266_s15 + $0x50] sm:$0xff] %v9842_v31  ;;  %v12287_v3 = vpop.f32.mrb[12].mxu1  ;;  %v5095_v24 = vadd.f32 %v17139_v46, %v17138_v40 }
 0x6b7   : > { %v9845_v7 = vadd.f32 %v12287_v3, %v5083_v15  ;;  %v9701_v4 = vpop.f32.mrb[13].mxu1  ;;  %v5094_v15 = vadd.f32 %v17141_v34, %v17140_v20 }
 0x6b8   : > { %v9844_v44 = vadd.f32 %v9701_v4, %v5082_v13  ;;  %v17142_v13 = vld [vmem:[#allocation49_spill] sm:$0xff] }
 0x6b9   : > { %9877 = vst [vmem:[%s16266_s15 + $0x68] sm:$0xff] %v9845_v7  ;;  %v17143_v7 = vld [vmem:[#allocation69_spill] sm:$0xff] }
 0x6ba   : > { %9876 = vst [vmem:[%s16266_s15 + $0x60] sm:$0xff] %v9844_v44  ;;  %v12290_v23 = vpop.f32.mrb[14].mxu1  ;;  %v5097_v4 = vadd.f32 %v17143_v7, %v17142_v13 }
 0x6bb   : > { %v9847_v1 = vadd.f32 %v12290_v23, %v5085_v22  ;;  %v9711_v5 = vpop.f32.mrb[15].mxu1  ;;  %v5096_v22 = vadd.f32 %v17145_v50, %v17144_v28 }
 0x6bc   : > { %v9846_v48 = vadd.f32 %v9711_v5, %v5084_v32  ;;  %v17146_v32 = vld [vmem:[#allocation51_spill] sm:$0xff] }
 0x6bd   : > { %9879 = vst [vmem:[%s16266_s15 + $0x78] sm:$0xff] %v9847_v1  ;;  %v17147_v1 = vld [vmem:[#allocation71_spill] sm:$0xff] }
 0x6be   : > { %9878 = vst [vmem:[%s16266_s15 + $0x70] sm:$0xff] %v9846_v48  ;;  %v12293_v55 = vpop.f32.mrb[16].mxu1  ;;  %v5099_v5 = vadd.f32 %v17147_v1, %v17146_v32 }
 0x6bf   : > { %v9849_v16 = vadd.f32 %v12293_v55, %v5087_v38  ;;  %v9721_v30 = vpop.f32.mrb[17].mxu1  ;;  %v5098_v38 = vadd.f32 %v17149_v19, %v17148_v0 }
 0x6c0   : > { %v9848_v14 = vadd.f32 %v9721_v30, %v5086_v39  ;;  %v17150_v39 = vld [vmem:[#allocation53_spill] sm:$0xff] }
 0x6c1   : > { %9881 = vst [vmem:[%s16266_s15 + $0x88] sm:$0xff] %v9849_v16  ;;  %v17151_v16 = vld [vmem:[#allocation72_spill] sm:$0xff] }
 0x6c2   : > { %9880 = vst [vmem:[%s16266_s15 + $0x80] sm:$0xff] %v9848_v14  ;;  %v12296_v17 = vpop.f32.mrb[18].mxu1  ;;  %v5101_v30 = vadd.f32 %v17151_v16, %v17150_v39 }
 0x6c3   : > { %v9851_v43 = vadd.f32 %v12296_v17, %v5089_v6  ;;  %v9731_v57 = vpop.f32.mrb[19].mxu1  ;;  %v5100_v6 = vadd.f32 %v17153_v58, %v17152_v37 }
 0x6c4   : > { %v9850_v54 = vadd.f32 %v9731_v57, %v5088_v63 }
 0x6c5   : > { %9883 = vst [vmem:[%s16266_s15 + $0x98] sm:$0xff] %v9851_v43 }
 0x6c6   : > { %9882 = vst [vmem:[%s16266_s15 + $0x90] sm:$0xff] %v9850_v54  ;;  %v12299_v62 = vpop.f32.mrb[20].mxu1 }
 0x6c7   : > { %v9853_v29 = vadd.f32 %v12299_v62, %v5091_v42  ;;  %v9741_v41 = vpop.f32.mrb[21].mxu1 }
 0x6c8   : > { %v9852_v26 = vadd.f32 %v9741_v41, %v5090_v59 }
 0x6c9   : > { %9885 = vst [vmem:[%s16266_s15 + $0xa8] sm:$0xff] %v9853_v29 }
 0x6ca   : > { %9884 = vst [vmem:[%s16266_s15 + $0xa0] sm:$0xff] %v9852_v26  ;;  %v12302_v11 = vpop.f32.mrb[22].mxu1 }
 0x6cb   : > { %v9855_v21 = vadd.f32 %v12302_v11, %v5093_v61  ;;  %v9751_v56 = vpop.f32.mrb[23].mxu1 }
 0x6cc   : > { %v9854_v47 = vadd.f32 %v9751_v56, %v5092_v45 }
 0x6cd   : > { %9887 = vst [vmem:[%s16266_s15 + $0xb8] sm:$0xff] %v9855_v21 }
 0x6ce   : > { %9886 = vst [vmem:[%s16266_s15 + $0xb0] sm:$0xff] %v9854_v47  ;;  %v12305_v31 = vpop.f32.mrb[24].mxu1 }
 0x6cf   : > { %v9857_v3 = vadd.f32 %v12305_v31, %v5095_v24  ;;  %v9761_v36 = vpop.f32.mrb[25].mxu1 }
 0x6d0   : > { %v9856_v2 = vadd.f32 %v9761_v36, %v5094_v15 }
 0x6d1   : > { %9889 = vst [vmem:[%s16266_s15 + $0xc8] sm:$0xff] %v9857_v3 }
 0x6d2   : > { %9888 = vst [vmem:[%s16266_s15 + $0xc0] sm:$0xff] %v9856_v2  ;;  %v12308_v44 = vpop.f32.mrb[26].mxu1 }
 0x6d3   : > { %v9859_v23 = vadd.f32 %v12308_v44, %v5097_v4  ;;  %v9771_v60 = vpop.f32.mrb[27].mxu1 }
 0x6d4   : > { %v9858_v33 = vadd.f32 %v9771_v60, %v5096_v22 }
 0x6d5   : > { %9891 = vst [vmem:[%s16266_s15 + $0xd8] sm:$0xff] %v9859_v23 }
 0x6d6   : > { %9890 = vst [vmem:[%s16266_s15 + $0xd0] sm:$0xff] %v9858_v33  ;;  %v12311_v48 = vpop.f32.mrb[28].mxu1 }
 0x6d7   : > { %v9861_v55 = vadd.f32 %v12311_v48, %v5099_v5  ;;  %v9781_v25 = vpop.f32.mrb[29].mxu1 }
 0x6d8   : > { %v9860_v35 = vadd.f32 %v9781_v25, %v5098_v38 }
 0x6d9   : > { %9893 = vst [vmem:[%s16266_s15 + $0xe8] sm:$0xff] %v9861_v55 }
 0x6da   : > { %9892 = vst [vmem:[%s16266_s15 + $0xe0] sm:$0xff] %v9860_v35  ;;  %v12314_v14 = vpop.f32.mrb[30].mxu1 }
 0x6db   : > { %v9863_v17 = vadd.f32 %v12314_v14, %v5101_v30  ;;  %v9791_v10 = vpop.f32.mrb[31].mxu1 }
 0x6dc   : > { %v9862_v51 = vadd.f32 %v9791_v10, %v5100_v6 }
 0x6dd   : > { %9895 = vst [vmem:[%s16266_s15 + $0xf8] sm:$0xff] %v9863_v17 }
 0x6de   : > { %9894 = vst [vmem:[%s16266_s15 + $0xf0] sm:$0xff] %v9862_v51 }
 0x6df   : > { %13537 = shalt.err (!%p13534_p7)
}
 0x6e0   : > { %s13538_s20 = scalar_lea.hbm %s16363_s22, 4096  ;;  %s13542_s25 = scalar_lea.hbm %s16413_s2, 8192 }
 0x6e1   : > { %p13539_p9 = scmp.ne.s32.totalorder %s16363_s22, %s13538_s20  ;;  %p13543_p5 = scmp.lt.u32.totalorder %s16363_s22, %s16413_s2 }
 0x6e2   : > { %p13544_p11 = scmp.lt.u32.totalorder %s13542_s25, %s13538_s20  ;;  %p13546_p4 = scmp.lt.u32.totalorder %s13538_s20, %s16363_s22 }
 0x6e3   : > { %p13540_p1 = pnand %p13539_p9, %p13714_p12 }
 0x6e4   : > { %p13545_p2 = por %p13544_p11, %p13543_p5 }
 0x6e5   : > { %p13541_p0 = pneg %p13540_p1 }
 0x6e6   : > { %p13547_p6 = por %p13546_p4, %p13545_p2 }
 0x6e8   : > { %p13548_p8 = pnand %p13547_p6, %p13541_p0 }
 0x6ea   : > { %13551 = shalt.err (!%p13548_p8)
}
 0x6eb   : > { %s13603_s30 = smov 128   ;;  %s13604_s23 = smov 8  }
 0x6ec   : > { %13409 = dma.vmem_to_hbm [thread:$0]  (%p13714_p12), %s16365_s4, 4096, %s16363_s22, %s9897_s13, %s13603_s30, %s13603_s30, %s13604_s23  }
 0x6ed PF: > { %s9925_s15 = sand.u32 1, %s13582_s9   ;;  %p17154_p10 = scmp.ne.s32.totalorder %s16692_s16, 0 }
 0x6ee   : > { %p17155_p13 = scmp.ge.s32.totalorder %s13594_s12, 2  ;;  %s9926_s17 = scalar_lea.sflag [#allocation6], %s9925_s15 }
 0x6f0   : > { %p13420_p3 = pnand %p17155_p13, %p17154_p10 }
 0x6f2   : > { %13577 = dma.done.wait (!%p13420_p3), %s9926_s17, 4096  }
 0x6f3   : > { %13579 = vsyncadd (!%p13420_p3), %s9926_s17, 4294963200  ;;  %p16_p7 = scmp.ge.s32.totalorder %s13676_s21, 4   ;;  %s17156_s9 = smov %s13586_s10 }
 0x6f4   : > { %s17157_s10 = smov %s13590_s11  ;;  %s17158_s11 = smov %s13710_s8 }
 0x6f5   : > { %s17159_s12 = smov %s13676_s21  ;;  %18 = sbr.rel (!%p16_p7) target bundleno = 6 (0x6), region = 86 }
 0x6fc   :  { %9931 = vsyncpa [#allocation5], 1 }
 0x6fd   :  { %9933 = vsyncpa [#allocation5 + $0x1], 1 }
 0x6fe   :  { %9934 = vsyncpa [#allocation8], 1 }
 0x6ff   :  { %9935 = vsyncpa [#allocation6], 1 }
 0x700   :  { %9937 = vsyncpa [#allocation6 + $0x1], 1 }

</bundles_post_ra>
